<compile_context>
chip_gen: v7x
topology: tpu7x:2x2x1
jax: 0.10.0
libtpu: 0.0.40
codegen_flags: <defaults>
</compile_context>

<pallas_src>
import functools

import jax
import jax.numpy as jnp
import numpy as np
from jax.experimental import pallas as pl
from jax.experimental.pallas import tpu as pltpu


def _pick_row_tile(H):
    """Largest 'nice' strip height that divides H and yields >1 strip."""
    for cand in (16, 14, 8, 7, 4):
        if H % cand == 0 and H // cand > 1:
            return cand
    return H


def _bottleneck_kernel(x_ref, xh_ref, w1_ref, s1_ref, b1_ref,
                       w2_ref, s2_ref, b2_ref,
                       w3_ref, s3_ref, b3_ref,
                       out_ref, pad_ref, *, TH, W, Wp, planes, nh):
    """One (batch, row-strip) tile per grid step.

    x_ref   : (TH, W, Cin)          input strip (NHWC, batch/strip dims squeezed)
    xh_ref  : (2, W, Cin)           rows directly above / below the strip
                                    (zeros where the strip touches the border)
    w1_ref  : (Cin, planes)   bf16  1x1 conv as matmul
    w2_ref  : (9, planes, planes) bf16  3x3 taps, index ky*3+kx, each (Ci, Co)
    w3_ref  : (planes, Cout)  bf16  1x1 conv as matmul
    s*/b*   : (1, C) f32            folded BatchNorm scale / bias
    out_ref : (TH, W, Cout)
    pad_ref : (TH+2, Wp, planes) bf16  scratch; conv1 output of the strip at
              rows 1..TH, cols 8..8+W-1 (sublane-aligned), zero halo around it
    """
    f32, bf16 = jnp.float32, jnp.bfloat16
    Cin = x_ref.shape[-1]
    Cout = out_ref.shape[-1]
    M = TH * W
    hb = pl.program_id(1)                       # row-strip index

    # ---- zero only the halo cells conv2 actually reads ----------------------
    # aligned 8-wide column block containing col 7, the single col 8+W, and the
    # top/bottom halo rows; the interior is fully overwritten every step.
    pad_ref[:, 0:8, :] = jnp.zeros((TH + 2, 8, planes), bf16)
    pad_ref[:, 8 + W:9 + W, :] = jnp.zeros((TH + 2, 1, planes), bf16)
    zero_row = jnp.zeros((W, planes), bf16)
    pad_ref[0, 8:8 + W, :] = zero_row
    pad_ref[TH + 1, 8:8 + W, :] = zero_row

    # ---- conv1 (1x1) + bn1 + relu on the strip: one (TH*W, Cin) matmul ------
    x_bf = x_ref[...].reshape(M, Cin).astype(bf16)
    y1 = jnp.dot(x_bf, w1_ref[...], preferred_element_type=f32)
    y1 = jnp.maximum(y1 * s1_ref[...] + b1_ref[...], 0.0)
    pad_ref[1:TH + 1, 8:8 + W, :] = y1.astype(bf16).reshape(TH, W, planes)

    # ---- conv1 + bn1 + relu on the two halo rows; only stored when they are
    #      real image rows (otherwise the zero halo == conv2's zero padding) --
    xh_bf = xh_ref[...].reshape(2 * W, Cin).astype(bf16)
    y1h = jnp.dot(xh_bf, w1_ref[...], preferred_element_type=f32)
    y1h = jnp.maximum(y1h * s1_ref[...] + b1_ref[...], 0.0).astype(bf16)

    @pl.when(hb > 0)
    def _():
        pad_ref[0, 8:8 + W, :] = y1h[0:W]

    @pl.when(hb < nh - 1)
    def _():
        pad_ref[TH + 1, 8:8 + W, :] = y1h[W:2 * W]

    # ---- conv2 (3x3, stride 1, pad 1): 9 shifted whole-strip matmuls ---------
    # First tap initialises the accumulator (no zeros-fill / extra add).
    # TODO(synk): the kx=0/2 window reads are sublane-unaligned (col offsets
    # 7/9); a pltpu.roll of the aligned kx=1 slab would move that shift onto
    # the XLU, but the kernel is HBM-bound at real shapes so it is secondary.
    acc = None
    for ky in range(3):
        for kx in range(3):
            patch = pad_ref[ky:ky + TH, 7 + kx:7 + kx + W, :].reshape(M, planes)
            part = jnp.dot(patch, w2_ref[ky * 3 + kx],
                           preferred_element_type=f32)
            acc = part if acc is None else acc + part
    y2 = jnp.maximum(acc * s2_ref[...] + b2_ref[...], 0.0)

    # ---- conv3 (1x1) + bn3 + residual + relu, one lane-dense store ----------
    y3 = jnp.dot(y2.astype(bf16), w3_ref[...], preferred_element_type=f32)
    y3 = y3 * s3_ref[...] + b3_ref[...]
    # Residual re-read here (input block is VMEM-resident) instead of keeping
    # an f32 copy live across all three convs (less spill pressure).
    res = x_ref[...].reshape(M, Cin).astype(f32)
    out = jnp.maximum(y3 + res, 0.0)
    out_ref[...] = out.reshape(TH, W, Cout).astype(out_ref.dtype)


def bottleneck_pallas(x_nhwc, params):
    N, H, W, Cin = x_nhwc.shape
    planes = params["w1"].shape[1]
    Cout = params["w3"].shape[1]
    assert Cin == Cout, "downsample=None requires inplanes == planes * expansion"

    TH = _pick_row_tile(H)          # row-strip height (divides H)
    nh = H // TH
    # Padded-scratch width: data at sublane-aligned column 8, halo at columns
    # 7 and 8+W, rounded up to a multiple of 8 sublanes.
    Wp = ((W + 9 + 7) // 8) * 8

    kernel = functools.partial(_bottleneck_kernel, TH=TH, W=W, Wp=Wp,
                               planes=planes, nh=nh)

    # bf16 matmul operands (f32 MXU accumulation inside the kernel).
    w1 = params["w1"].astype(jnp.bfloat16)
    w2 = params["w2"].astype(jnp.bfloat16)
    w3 = params["w3"].astype(jnp.bfloat16)
    s1, b1 = params["s1"], params["b1"]
    s2, b2 = params["s2"], params["b2"]
    s3, b3 = params["s3"], params["b3"]

    # Per-strip halo rows (row above / below each strip; zeros at the image
    # border).  Built once in the wrapper with cheap HBM-level slices.
    zrow = jnp.zeros((N, 1, W, Cin), x_nhwc.dtype)
    top = jnp.concatenate([zrow, x_nhwc[:, TH - 1:H - 1:TH]], axis=1)  # above strips
    bot = jnp.concatenate([x_nhwc[:, TH:H:TH], zrow], axis=1)          # below strips
    xh = jnp.stack([top, bot], axis=2)                                 # (N, nh, 2, W, Cin)

    # ---- generation-aware VMEM limit ----------------------------------------
    esz = np.dtype(x_nhwc.dtype).itemsize
    M = TH * W
    weight_bytes = ((Cin * planes + 9 * planes * planes + planes * Cout) * 2
                    + (4 * planes + 2 * Cout) * 4)
    need = (2 * (M * Cin + M * Cout + 2 * W * Cin) * esz   # double-buffered act blocks
            + weight_bytes                                 # (single-buffered) consts
            + (TH + 2) * Wp * planes * 2                   # conv1 bf16 scratch
            + M * (6 * Cin + 14 * planes + 10 * Cout))     # in-kernel value slabs
    try:
        cap = pltpu.get_tpu_info().vmem_capacity_bytes
    except Exception:
        cap = 64 * 2 ** 20                                 # conservative: v7x per-TC
    vmem_limit = int(max(32 * 2 ** 20, min(2 * need, cap - 8 * 2 ** 20)))

    def _call(single_buffer_consts):
        def const_spec(shape):
            idx = lambda n, h: (0,) * len(shape)
            if single_buffer_consts:
                # weights / BN params never change across the grid -> 1 buffer
                return pl.BlockSpec(shape, idx, pipeline_mode=pl.Buffered(1))
            return pl.BlockSpec(shape, idx)

        in_specs = [
            pl.BlockSpec((None, TH, W, Cin), lambda n, h: (n, h, 0, 0)),        # x strip
            pl.BlockSpec((None, None, 2, W, Cin), lambda n, h: (n, h, 0, 0, 0)),  # halo rows
            const_spec((Cin, planes)),                                          # w1
            const_spec((1, planes)),                                            # s1
            const_spec((1, planes)),                                            # b1
            const_spec((9, planes, planes)),                                    # w2
            const_spec((1, planes)),                                            # s2
            const_spec((1, planes)),                                            # b2
            const_spec((planes, Cout)),                                         # w3
            const_spec((1, Cout)),                                              # s3
            const_spec((1, Cout)),                                              # b3
        ]
        out_specs = pl.BlockSpec((None, TH, W, Cout), lambda n, h: (n, h, 0, 0))

        return pl.pallas_call(
            kernel,
            out_shape=jax.ShapeDtypeStruct((N, H, W, Cout), x_nhwc.dtype),
            grid_spec=pltpu.PrefetchScalarGridSpec(
                num_scalar_prefetch=0,
                grid=(N, nh),
                in_specs=in_specs,
                out_specs=out_specs,
                scratch_shapes=[pltpu.VMEM((TH + 2, Wp, planes), jnp.bfloat16)],
            ),
            compiler_params=pltpu.CompilerParams(
                # disjoint per-(batch, strip) output blocks, no carried state
                dimension_semantics=("parallel", "parallel"),
                vmem_limit_bytes=vmem_limit),
        )(x_nhwc, xh, w1, s1, b1, w2, s2, b2, w3, s3, b3)

    try:
        if hasattr(pl, "Buffered"):
            return _call(True)
    except Exception:
        pass   # pipeline_mode / Buffered(1) unsupported -> default buffering
    return _call(False)


def _reference(x_nhwc, p, w2_hwio):
    """Pure-JAX eval-mode Bottleneck forward, mirroring the kernel's bf16
    matmul operands (f32 accumulation) for a tight numerical comparison.
    NOTE: this intentionally matches the kernel's bf16 casts, so it checks
    kernel consistency, not strict fp32 parity with PyTorch."""
    f32 = jnp.float32
    bf = lambda a: a.astype(jnp.bfloat16).astype(f32)
    dn = ("NHWC", "HWIO", "NHWC")
    hp = jax.lax.Precision.HIGHEST
    y = jax.lax.conv_general_dilated(bf(x_nhwc), bf(p["w1"])[None, None], (1, 1),
                                     "VALID", dimension_numbers=dn, precision=hp)
    y = jnp.maximum(y * p["s1"] + p["b1"], 0.0)
    y = jax.lax.conv_general_dilated(bf(y), bf(w2_hwio), (1, 1), ((1, 1), (1, 1)),
                                     dimension_numbers=dn, precision=hp)
    y = jnp.maximum(y * p["s2"] + p["b2"], 0.0)
    y = jax.lax.conv_general_dilated(bf(y), bf(p["w3"])[None, None], (1, 1),
                                     "VALID", dimension_numbers=dn, precision=hp)
    y = y * p["s3"] + p["b3"]
    return jnp.maximum(y + x_nhwc, 0.0)


def _fold_bn(gamma, beta, mean, var, eps=1e-5):
    scale = gamma / jnp.sqrt(var + eps)
    bias = beta - mean * scale
    return scale[None, :], bias[None, :]


if __name__ == "__main__":
    # Small shapes consistent with the module: inplanes = planes * expansion so
    # the identity residual path is valid (downsample=None, stride=1).  Cin and
    # Cout are 128 so the residual/conv1/conv3 channel axes fill the 128 lanes.
    N, H, W = 2, 16, 16
    planes = 32
    inplanes = planes * 4          # expansion = 4  -> 128
    cout = planes * 4              # 128

    key = jax.random.PRNGKey(0)
    keys = jax.random.split(key, 16)

    # Input in PyTorch NCHW convention, converted to NHWC for the kernel.
    x_nchw = jax.random.normal(keys[0], (N, inplanes, H, W), jnp.float32)
    x_nhwc = jnp.transpose(x_nchw, (0, 2, 3, 1))

    # Conv weights (built directly as (Cin, Cout) matmul matrices / HWIO taps;
    # a real PyTorch OIHW weight would be transposed the same way).
    w1 = 0.1 * jax.random.normal(keys[1], (inplanes, planes), jnp.float32)
    w2_hwio = 0.1 * jax.random.normal(keys[2], (3, 3, planes, planes), jnp.float32)
    w3 = 0.1 * jax.random.normal(keys[3], (planes, cout), jnp.float32)

    # BatchNorm parameters (eval-mode running stats), folded to scale/bias.
    def bn_params(kg, kb, km, kv, c):
        gamma = 1.0 + 0.1 * jax.random.normal(kg, (c,), jnp.float32)
        beta = 0.1 * jax.random.normal(kb, (c,), jnp.float32)
        mean = 0.1 * jax.random.normal(km, (c,), jnp.float32)
        var = jnp.abs(jax.random.normal(kv, (c,), jnp.float32)) + 0.5
        return _fold_bn(gamma, beta, mean, var)

    s1, b1 = bn_params(keys[4], keys[5], keys[6], keys[7], planes)
    s2, b2 = bn_params(keys[8], keys[9], keys[10], keys[11], planes)
    s3, b3 = bn_params(keys[12], keys[13], keys[14], keys[15], cout)

    params = {
        "w1": w1,
        "w2": w2_hwio.reshape(9, planes, planes),   # index ky*3+kx, (Ci, Co)
        "w3": w3,
        "s1": s1, "b1": b1,
        "s2": s2, "b2": b2,
        "s3": s3, "b3": b3,
    }

    out = jax.block_until_ready(bottleneck_pallas(x_nhwc, params))
    ref = jax.block_until_ready(_reference(x_nhwc, params, w2_hwio))
    np.testing.assert_allclose(np.asarray(out), np.asarray(ref),
                               rtol=1e-2, atol=1e-2)

    print("KERNEL_OK")
</pallas_src>

<mosaic_0001>
module attributes {stable_mosaic.version = 11 : i64} {
  func.func @_bottleneck_kernel(%arg0: i32, %arg1: i32, %arg2: memref<1x8x16x128xf32, #tpu.memory_space<vmem>>, %arg3: memref<1x1x2x16x128xf32, #tpu.memory_space<vmem>>, %arg4: memref<128x32xbf16, #tpu.memory_space<vmem>>, %arg5: memref<1x32xf32, #tpu.memory_space<vmem>>, %arg6: memref<1x32xf32, #tpu.memory_space<vmem>>, %arg7: memref<9x32x32xbf16, #tpu.memory_space<vmem>>, %arg8: memref<1x32xf32, #tpu.memory_space<vmem>>, %arg9: memref<1x32xf32, #tpu.memory_space<vmem>>, %arg10: memref<32x128xbf16, #tpu.memory_space<vmem>>, %arg11: memref<1x128xf32, #tpu.memory_space<vmem>>, %arg12: memref<1x128xf32, #tpu.memory_space<vmem>>, %arg13: memref<1x8x16x128xf32, #tpu.memory_space<vmem>>, %arg14: memref<10x32x32xbf16, #tpu.memory_space<vmem>>) attributes {dimension_semantics = [#tpu.dimension_semantics<parallel>, #tpu.dimension_semantics<parallel>], iteration_bounds = array<i64: 2, 2>, scalar_prefetch = 0 : i64, scratch_operands = 1 : i64, tpu.core_type = #tpu.core_type<tc>, window_params = [{transform_indices = @transform_0, window_bounds = array<i64: 1, 8, 16, 128>}, {transform_indices = @transform_1, window_bounds = array<i64: 1, 1, 2, 16, 128>}, {pipeline_mode = #tpu.pipeline_mode<synchronous>, transform_indices = @transform_2, window_bounds = array<i64: 128, 32>}, {pipeline_mode = #tpu.pipeline_mode<synchronous>, transform_indices = @transform_3, window_bounds = array<i64: 1, 32>}, {pipeline_mode = #tpu.pipeline_mode<synchronous>, transform_indices = @transform_4, window_bounds = array<i64: 1, 32>}, {pipeline_mode = #tpu.pipeline_mode<synchronous>, transform_indices = @transform_5, window_bounds = array<i64: 9, 32, 32>}, {pipeline_mode = #tpu.pipeline_mode<synchronous>, transform_indices = @transform_6, window_bounds = array<i64: 1, 32>}, {pipeline_mode = #tpu.pipeline_mode<synchronous>, transform_indices = @transform_7, window_bounds = array<i64: 1, 32>}, {pipeline_mode = #tpu.pipeline_mode<synchronous>, transform_indices = @transform_8, window_bounds = array<i64: 32, 128>}, {pipeline_mode = #tpu.pipeline_mode<synchronous>, transform_indices = @transform_9, window_bounds = array<i64: 1, 128>}, {pipeline_mode = #tpu.pipeline_mode<synchronous>, transform_indices = @transform_10, window_bounds = array<i64: 1, 128>}, {transform_indices = @transform_11, window_bounds = array<i64: 1, 8, 16, 128>}]} {
    %cst = arith.constant 0.000000e+00 : bf16
    %0 = vector.broadcast %cst : bf16 to vector<10x8x32xbf16>
    %c0 = arith.constant 0 : index
    %c0_0 = arith.constant 0 : index
    %c0_1 = arith.constant 0 : index
    %1 = vector.load %arg14[%c0, %c0_0, %c0_1] : memref<10x32x32xbf16, #tpu.memory_space<vmem>>, vector<10x8x32xbf16>
    tpu.vector_store %arg14[%c0, %c0_0, %c0_1], %0 {strides = array<i32>} : memref<10x32x32xbf16, #tpu.memory_space<vmem>>, vector<10x8x32xbf16>,
    %cst_2 = arith.constant 0.000000e+00 : bf16
    %2 = vector.broadcast %cst_2 : bf16 to vector<10x1x32xbf16>
    %c0_3 = arith.constant 0 : index
    %c24 = arith.constant 24 : index
    %c0_4 = arith.constant 0 : index
    %3 = vector.load %arg14[%c0_3, %c24, %c0_4] : memref<10x32x32xbf16, #tpu.memory_space<vmem>>, vector<10x1x32xbf16>
    tpu.vector_store %arg14[%c0_3, %c24, %c0_4], %2 {strides = array<i32>} : memref<10x32x32xbf16, #tpu.memory_space<vmem>>, vector<10x1x32xbf16>,
    %cst_5 = arith.constant 0.000000e+00 : bf16
    %4 = vector.broadcast %cst_5 : bf16 to vector<16x32xbf16>
    %c0_6 = arith.constant 0 : index
    %c8 = arith.constant 8 : index
    %c0_7 = arith.constant 0 : index
    %5 = vector.load %arg14[%c0_6, %c8, %c0_7] : memref<10x32x32xbf16, #tpu.memory_space<vmem>>, vector<1x16x32xbf16>
    %6 = vector.shape_cast %5 : vector<1x16x32xbf16> to vector<16x32xbf16>
    %7 = vector.shape_cast %4 : vector<16x32xbf16> to vector<1x16x32xbf16>
    tpu.vector_store %arg14[%c0_6, %c8, %c0_7], %7 {strides = array<i32>} : memref<10x32x32xbf16, #tpu.memory_space<vmem>>, vector<1x16x32xbf16>,
    %c9 = arith.constant 9 : index
    %c8_8 = arith.constant 8 : index
    %c0_9 = arith.constant 0 : index
    %8 = vector.load %arg14[%c9, %c8_8, %c0_9] : memref<10x32x32xbf16, #tpu.memory_space<vmem>>, vector<1x16x32xbf16>
    %9 = vector.shape_cast %8 : vector<1x16x32xbf16> to vector<16x32xbf16>
    %10 = vector.shape_cast %4 : vector<16x32xbf16> to vector<1x16x32xbf16>
    tpu.vector_store %arg14[%c9, %c8_8, %c0_9], %10 {strides = array<i32>} : memref<10x32x32xbf16, #tpu.memory_space<vmem>>, vector<1x16x32xbf16>,
    %c0_10 = arith.constant 0 : index
    %c0_11 = arith.constant 0 : index
    %c0_12 = arith.constant 0 : index
    %c0_13 = arith.constant 0 : index
    %11 = vector.load %arg2[%c0_10, %c0_11, %c0_12, %c0_13] : memref<1x8x16x128xf32, #tpu.memory_space<vmem>>, vector<1x8x16x128xf32>
    %12 = vector.shape_cast %11 : vector<1x8x16x128xf32> to vector<8x16x128xf32>
    %13 = vector.shape_cast %12 : vector<8x16x128xf32> to vector<128x128xf32>
    %14 = arith.truncf %13 : vector<128x128xf32> to vector<128x128xbf16>
    %c0_14 = arith.constant 0 : index
    %c0_15 = arith.constant 0 : index
    %15 = vector.load %arg4[%c0_14, %c0_15] : memref<128x32xbf16, #tpu.memory_space<vmem>>, vector<128x32xbf16>
    %cst_16 = arith.constant dense<0.000000e+00> : vector<128x32xf32>
    %16 = tpu.matmul %14, %15, %cst_16 {dimension_numbers = #tpu.dot_dimension_numbers<[1], [0], [0], [1], [0, 0, 1, 1], [], []>} : vector<128x128xbf16>, vector<128x32xbf16>, vector<128x32xf32> -> vector<128x32xf32>
    %c0_17 = arith.constant 0 : index
    %c0_18 = arith.constant 0 : index
    %17 = vector.load %arg5[%c0_17, %c0_18] : memref<1x32xf32, #tpu.memory_space<vmem>>, vector<1x32xf32>
    %18 = vector.broadcast %17 : vector<1x32xf32> to vector<128x32xf32>
    %19 = arith.mulf %16, %18 : vector<128x32xf32>
    %c0_19 = arith.constant 0 : index
    %c0_20 = arith.constant 0 : index
    %20 = vector.load %arg6[%c0_19, %c0_20] : memref<1x32xf32, #tpu.memory_space<vmem>>, vector<1x32xf32>
    %21 = vector.broadcast %20 : vector<1x32xf32> to vector<128x32xf32>
    %22 = arith.addf %19, %21 : vector<128x32xf32>
    %cst_21 = arith.constant 0.000000e+00 : f32
    %23 = vector.broadcast %cst_21 : f32 to vector<128x32xf32>
    %24 = arith.maximumf %22, %23 : vector<128x32xf32>
    %25 = arith.truncf %24 : vector<128x32xf32> to vector<128x32xbf16>
    %26 = vector.shape_cast %25 : vector<128x32xbf16> to vector<8x16x32xbf16>
    %c1 = arith.constant 1 : index
    %c8_22 = arith.constant 8 : index
    %c0_23 = arith.constant 0 : index
    %27 = vector.load %arg14[%c1, %c8_22, %c0_23] : memref<10x32x32xbf16, #tpu.memory_space<vmem>>, vector<8x16x32xbf16>
    tpu.vector_store %arg14[%c1, %c8_22, %c0_23], %26 {strides = array<i32>} : memref<10x32x32xbf16, #tpu.memory_space<vmem>>, vector<8x16x32xbf16>,
    %c0_24 = arith.constant 0 : index
    %c0_25 = arith.constant 0 : index
    %c0_26 = arith.constant 0 : index
    %c0_27 = arith.constant 0 : index
    %c0_28 = arith.constant 0 : index
    %28 = vector.load %arg3[%c0_24, %c0_25, %c0_26, %c0_27, %c0_28] : memref<1x1x2x16x128xf32, #tpu.memory_space<vmem>>, vector<1x1x2x16x128xf32>
    %29 = vector.shape_cast %28 : vector<1x1x2x16x128xf32> to vector<2x16x128xf32>
    %30 = vector.shape_cast %29 : vector<2x16x128xf32> to vector<32x128xf32>
    %31 = arith.truncf %30 : vector<32x128xf32> to vector<32x128xbf16>
    %c0_29 = arith.constant 0 : index
    %c0_30 = arith.constant 0 : index
    %32 = vector.load %arg4[%c0_29, %c0_30] : memref<128x32xbf16, #tpu.memory_space<vmem>>, vector<128x32xbf16>
    %cst_31 = arith.constant dense<0.000000e+00> : vector<32x32xf32>
    %33 = tpu.matmul %31, %32, %cst_31 {dimension_numbers = #tpu.dot_dimension_numbers<[1], [0], [0], [1], [0, 0, 1, 1], [], []>} : vector<32x128xbf16>, vector<128x32xbf16>, vector<32x32xf32> -> vector<32x32xf32>
    %c0_32 = arith.constant 0 : index
    %c0_33 = arith.constant 0 : index
    %34 = vector.load %arg5[%c0_32, %c0_33] : memref<1x32xf32, #tpu.memory_space<vmem>>, vector<1x32xf32>
    %35 = vector.broadcast %34 : vector<1x32xf32> to vector<32x32xf32>
    %36 = arith.mulf %33, %35 : vector<32x32xf32>
    %c0_34 = arith.constant 0 : index
    %c0_35 = arith.constant 0 : index
    %37 = vector.load %arg6[%c0_34, %c0_35] : memref<1x32xf32, #tpu.memory_space<vmem>>, vector<1x32xf32>
    %38 = vector.broadcast %37 : vector<1x32xf32> to vector<32x32xf32>
    %39 = arith.addf %36, %38 : vector<32x32xf32>
    %cst_36 = arith.constant 0.000000e+00 : f32
    %40 = vector.broadcast %cst_36 : f32 to vector<32x32xf32>
    %41 = arith.maximumf %39, %40 : vector<32x32xf32>
    %42 = arith.truncf %41 : vector<32x32xf32> to vector<32x32xbf16>
    %c0_i32 = arith.constant 0 : i32
    %43 = arith.cmpi sgt, %arg1, %c0_i32 : i32
    %44 = arith.extui %43 : i1 to i32
    %c0_i32_37 = arith.constant 0 : i32
    %45 = arith.cmpi ne, %44, %c0_i32_37 : i32
    scf.if %45 {
      %129 = vector.extract_strided_slice %42 {offsets = [0, 0], sizes = [16, 32], strides = [1, 1]} : vector<32x32xbf16> to vector<16x32xbf16>
      %c0_117 = arith.constant 0 : index
      %c8_118 = arith.constant 8 : index
      %c0_119 = arith.constant 0 : index
      %130 = vector.load %arg14[%c0_117, %c8_118, %c0_119] : memref<10x32x32xbf16, #tpu.memory_space<vmem>>, vector<1x16x32xbf16>
      %131 = vector.shape_cast %130 : vector<1x16x32xbf16> to vector<16x32xbf16>
      %132 = vector.shape_cast %129 : vector<16x32xbf16> to vector<1x16x32xbf16>
      tpu.vector_store %arg14[%c0_117, %c8_118, %c0_119], %132 {strides = array<i32>} : memref<10x32x32xbf16, #tpu.memory_space<vmem>>, vector<1x16x32xbf16>,
    } else {
    }
    %c1_i32 = arith.constant 1 : i32
    %46 = arith.cmpi slt, %arg1, %c1_i32 : i32
    %47 = arith.extui %46 : i1 to i32
    %c0_i32_38 = arith.constant 0 : i32
    %48 = arith.cmpi ne, %47, %c0_i32_38 : i32
    scf.if %48 {
      %129 = vector.extract_strided_slice %42 {offsets = [16, 0], sizes = [16, 32], strides = [1, 1]} : vector<32x32xbf16> to vector<16x32xbf16>
      %c9_117 = arith.constant 9 : index
      %c8_118 = arith.constant 8 : index
      %c0_119 = arith.constant 0 : index
      %130 = vector.load %arg14[%c9_117, %c8_118, %c0_119] : memref<10x32x32xbf16, #tpu.memory_space<vmem>>, vector<1x16x32xbf16>
      %131 = vector.shape_cast %130 : vector<1x16x32xbf16> to vector<16x32xbf16>
      %132 = vector.shape_cast %129 : vector<16x32xbf16> to vector<1x16x32xbf16>
      tpu.vector_store %arg14[%c9_117, %c8_118, %c0_119], %132 {strides = array<i32>} : memref<10x32x32xbf16, #tpu.memory_space<vmem>>, vector<1x16x32xbf16>,
    } else {
    }
    %c0_39 = arith.constant 0 : index
    %c7 = arith.constant 7 : index
    %c0_40 = arith.constant 0 : index
    %49 = vector.load %arg14[%c0_39, %c7, %c0_40] : memref<10x32x32xbf16, #tpu.memory_space<vmem>>, vector<8x16x32xbf16>
    %50 = vector.shape_cast %49 : vector<8x16x32xbf16> to vector<128x32xbf16>
    %c0_41 = arith.constant 0 : index
    %c0_42 = arith.constant 0 : index
    %c0_43 = arith.constant 0 : index
    %51 = vector.load %arg7[%c0_41, %c0_42, %c0_43] : memref<9x32x32xbf16, #tpu.memory_space<vmem>>, vector<1x32x32xbf16>
    %52 = vector.shape_cast %51 : vector<1x32x32xbf16> to vector<32x32xbf16>
    %cst_44 = arith.constant dense<0.000000e+00> : vector<128x32xf32>
    %53 = tpu.matmul %50, %52, %cst_44 {dimension_numbers = #tpu.dot_dimension_numbers<[1], [0], [0], [1], [0, 0, 1, 1], [], []>} : vector<128x32xbf16>, vector<32x32xbf16>, vector<128x32xf32> -> vector<128x32xf32>
    %c0_45 = arith.constant 0 : index
    %c8_46 = arith.constant 8 : index
    %c0_47 = arith.constant 0 : index
    %54 = vector.load %arg14[%c0_45, %c8_46, %c0_47] : memref<10x32x32xbf16, #tpu.memory_space<vmem>>, vector<8x16x32xbf16>
    %55 = vector.shape_cast %54 : vector<8x16x32xbf16> to vector<128x32xbf16>
    %c1_48 = arith.constant 1 : index
    %c0_49 = arith.constant 0 : index
    %c0_50 = arith.constant 0 : index
    %56 = vector.load %arg7[%c1_48, %c0_49, %c0_50] : memref<9x32x32xbf16, #tpu.memory_space<vmem>>, vector<1x32x32xbf16>
    %57 = vector.shape_cast %56 : vector<1x32x32xbf16> to vector<32x32xbf16>
    %cst_51 = arith.constant dense<0.000000e+00> : vector<128x32xf32>
    %58 = tpu.matmul %55, %57, %cst_51 {dimension_numbers = #tpu.dot_dimension_numbers<[1], [0], [0], [1], [0, 0, 1, 1], [], []>} : vector<128x32xbf16>, vector<32x32xbf16>, vector<128x32xf32> -> vector<128x32xf32>
    %59 = arith.addf %53, %58 : vector<128x32xf32>
    %c0_52 = arith.constant 0 : index
    %c9_53 = arith.constant 9 : index
    %c0_54 = arith.constant 0 : index
    %60 = vector.load %arg14[%c0_52, %c9_53, %c0_54] : memref<10x32x32xbf16, #tpu.memory_space<vmem>>, vector<8x16x32xbf16>
    %61 = vector.shape_cast %60 : vector<8x16x32xbf16> to vector<128x32xbf16>
    %c2 = arith.constant 2 : index
    %c0_55 = arith.constant 0 : index
    %c0_56 = arith.constant 0 : index
    %62 = vector.load %arg7[%c2, %c0_55, %c0_56] : memref<9x32x32xbf16, #tpu.memory_space<vmem>>, vector<1x32x32xbf16>
    %63 = vector.shape_cast %62 : vector<1x32x32xbf16> to vector<32x32xbf16>
    %cst_57 = arith.constant dense<0.000000e+00> : vector<128x32xf32>
    %64 = tpu.matmul %61, %63, %cst_57 {dimension_numbers = #tpu.dot_dimension_numbers<[1], [0], [0], [1], [0, 0, 1, 1], [], []>} : vector<128x32xbf16>, vector<32x32xbf16>, vector<128x32xf32> -> vector<128x32xf32>
    %65 = arith.addf %59, %64 : vector<128x32xf32>
    %c1_58 = arith.constant 1 : index
    %c7_59 = arith.constant 7 : index
    %c0_60 = arith.constant 0 : index
    %66 = vector.load %arg14[%c1_58, %c7_59, %c0_60] : memref<10x32x32xbf16, #tpu.memory_space<vmem>>, vector<8x16x32xbf16>
    %67 = vector.shape_cast %66 : vector<8x16x32xbf16> to vector<128x32xbf16>
    %c3 = arith.constant 3 : index
    %c0_61 = arith.constant 0 : index
    %c0_62 = arith.constant 0 : index
    %68 = vector.load %arg7[%c3, %c0_61, %c0_62] : memref<9x32x32xbf16, #tpu.memory_space<vmem>>, vector<1x32x32xbf16>
    %69 = vector.shape_cast %68 : vector<1x32x32xbf16> to vector<32x32xbf16>
    %cst_63 = arith.constant dense<0.000000e+00> : vector<128x32xf32>
    %70 = tpu.matmul %67, %69, %cst_63 {dimension_numbers = #tpu.dot_dimension_numbers<[1], [0], [0], [1], [0, 0, 1, 1], [], []>} : vector<128x32xbf16>, vector<32x32xbf16>, vector<128x32xf32> -> vector<128x32xf32>
    %71 = arith.addf %65, %70 : vector<128x32xf32>
    %c1_64 = arith.constant 1 : index
    %c8_65 = arith.constant 8 : index
    %c0_66 = arith.constant 0 : index
    %72 = vector.load %arg14[%c1_64, %c8_65, %c0_66] : memref<10x32x32xbf16, #tpu.memory_space<vmem>>, vector<8x16x32xbf16>
    %73 = vector.shape_cast %72 : vector<8x16x32xbf16> to vector<128x32xbf16>
    %c4 = arith.constant 4 : index
    %c0_67 = arith.constant 0 : index
    %c0_68 = arith.constant 0 : index
    %74 = vector.load %arg7[%c4, %c0_67, %c0_68] : memref<9x32x32xbf16, #tpu.memory_space<vmem>>, vector<1x32x32xbf16>
    %75 = vector.shape_cast %74 : vector<1x32x32xbf16> to vector<32x32xbf16>
    %cst_69 = arith.constant dense<0.000000e+00> : vector<128x32xf32>
    %76 = tpu.matmul %73, %75, %cst_69 {dimension_numbers = #tpu.dot_dimension_numbers<[1], [0], [0], [1], [0, 0, 1, 1], [], []>} : vector<128x32xbf16>, vector<32x32xbf16>, vector<128x32xf32> -> vector<128x32xf32>
    %77 = arith.addf %71, %76 : vector<128x32xf32>
    %c1_70 = arith.constant 1 : index
    %c9_71 = arith.constant 9 : index
    %c0_72 = arith.constant 0 : index
    %78 = vector.load %arg14[%c1_70, %c9_71, %c0_72] : memref<10x32x32xbf16, #tpu.memory_space<vmem>>, vector<8x16x32xbf16>
    %79 = vector.shape_cast %78 : vector<8x16x32xbf16> to vector<128x32xbf16>
    %c5 = arith.constant 5 : index
    %c0_73 = arith.constant 0 : index
    %c0_74 = arith.constant 0 : index
    %80 = vector.load %arg7[%c5, %c0_73, %c0_74] : memref<9x32x32xbf16, #tpu.memory_space<vmem>>, vector<1x32x32xbf16>
    %81 = vector.shape_cast %80 : vector<1x32x32xbf16> to vector<32x32xbf16>
    %cst_75 = arith.constant dense<0.000000e+00> : vector<128x32xf32>
    %82 = tpu.matmul %79, %81, %cst_75 {dimension_numbers = #tpu.dot_dimension_numbers<[1], [0], [0], [1], [0, 0, 1, 1], [], []>} : vector<128x32xbf16>, vector<32x32xbf16>, vector<128x32xf32> -> vector<128x32xf32>
    %83 = arith.addf %77, %82 : vector<128x32xf32>
    %c2_76 = arith.constant 2 : index
    %c7_77 = arith.constant 7 : index
    %c0_78 = arith.constant 0 : index
    %84 = vector.load %arg14[%c2_76, %c7_77, %c0_78] : memref<10x32x32xbf16, #tpu.memory_space<vmem>>, vector<8x16x32xbf16>
    %85 = vector.shape_cast %84 : vector<8x16x32xbf16> to vector<128x32xbf16>
    %c6 = arith.constant 6 : index
    %c0_79 = arith.constant 0 : index
    %c0_80 = arith.constant 0 : index
    %86 = vector.load %arg7[%c6, %c0_79, %c0_80] : memref<9x32x32xbf16, #tpu.memory_space<vmem>>, vector<1x32x32xbf16>
    %87 = vector.shape_cast %86 : vector<1x32x32xbf16> to vector<32x32xbf16>
    %cst_81 = arith.constant dense<0.000000e+00> : vector<128x32xf32>
    %88 = tpu.matmul %85, %87, %cst_81 {dimension_numbers = #tpu.dot_dimension_numbers<[1], [0], [0], [1], [0, 0, 1, 1], [], []>} : vector<128x32xbf16>, vector<32x32xbf16>, vector<128x32xf32> -> vector<128x32xf32>
    %89 = arith.addf %83, %88 : vector<128x32xf32>
    %c2_82 = arith.constant 2 : index
    %c8_83 = arith.constant 8 : index
    %c0_84 = arith.constant 0 : index
    %90 = vector.load %arg14[%c2_82, %c8_83, %c0_84] : memref<10x32x32xbf16, #tpu.memory_space<vmem>>, vector<8x16x32xbf16>
    %91 = vector.shape_cast %90 : vector<8x16x32xbf16> to vector<128x32xbf16>
    %c7_85 = arith.constant 7 : index
    %c0_86 = arith.constant 0 : index
    %c0_87 = arith.constant 0 : index
    %92 = vector.load %arg7[%c7_85, %c0_86, %c0_87] : memref<9x32x32xbf16, #tpu.memory_space<vmem>>, vector<1x32x32xbf16>
    %93 = vector.shape_cast %92 : vector<1x32x32xbf16> to vector<32x32xbf16>
    %cst_88 = arith.constant dense<0.000000e+00> : vector<128x32xf32>
    %94 = tpu.matmul %91, %93, %cst_88 {dimension_numbers = #tpu.dot_dimension_numbers<[1], [0], [0], [1], [0, 0, 1, 1], [], []>} : vector<128x32xbf16>, vector<32x32xbf16>, vector<128x32xf32> -> vector<128x32xf32>
    %95 = arith.addf %89, %94 : vector<128x32xf32>
    %c2_89 = arith.constant 2 : index
    %c9_90 = arith.constant 9 : index
    %c0_91 = arith.constant 0 : index
    %96 = vector.load %arg14[%c2_89, %c9_90, %c0_91] : memref<10x32x32xbf16, #tpu.memory_space<vmem>>, vector<8x16x32xbf16>
    %97 = vector.shape_cast %96 : vector<8x16x32xbf16> to vector<128x32xbf16>
    %c8_92 = arith.constant 8 : index
    %c0_93 = arith.constant 0 : index
    %c0_94 = arith.constant 0 : index
    %98 = vector.load %arg7[%c8_92, %c0_93, %c0_94] : memref<9x32x32xbf16, #tpu.memory_space<vmem>>, vector<1x32x32xbf16>
    %99 = vector.shape_cast %98 : vector<1x32x32xbf16> to vector<32x32xbf16>
    %cst_95 = arith.constant dense<0.000000e+00> : vector<128x32xf32>
    %100 = tpu.matmul %97, %99, %cst_95 {dimension_numbers = #tpu.dot_dimension_numbers<[1], [0], [0], [1], [0, 0, 1, 1], [], []>} : vector<128x32xbf16>, vector<32x32xbf16>, vector<128x32xf32> -> vector<128x32xf32>
    %101 = arith.addf %95, %100 : vector<128x32xf32>
    %c0_96 = arith.constant 0 : index
    %c0_97 = arith.constant 0 : index
    %102 = vector.load %arg8[%c0_96, %c0_97] : memref<1x32xf32, #tpu.memory_space<vmem>>, vector<1x32xf32>
    %103 = vector.broadcast %102 : vector<1x32xf32> to vector<128x32xf32>
    %104 = arith.mulf %101, %103 : vector<128x32xf32>
    %c0_98 = arith.constant 0 : index
    %c0_99 = arith.constant 0 : index
    %105 = vector.load %arg9[%c0_98, %c0_99] : memref<1x32xf32, #tpu.memory_space<vmem>>, vector<1x32xf32>
    %106 = vector.broadcast %105 : vector<1x32xf32> to vector<128x32xf32>
    %107 = arith.addf %104, %106 : vector<128x32xf32>
    %cst_100 = arith.constant 0.000000e+00 : f32
    %108 = vector.broadcast %cst_100 : f32 to vector<128x32xf32>
    %109 = arith.maximumf %107, %108 : vector<128x32xf32>
    %110 = arith.truncf %109 : vector<128x32xf32> to vector<128x32xbf16>
    %c0_101 = arith.constant 0 : index
    %c0_102 = arith.constant 0 : index
    %111 = vector.load %arg10[%c0_101, %c0_102] : memref<32x128xbf16, #tpu.memory_space<vmem>>, vector<32x128xbf16>
    %cst_103 = arith.constant dense<0.000000e+00> : vector<128x128xf32>
    %112 = tpu.matmul %110, %111, %cst_103 {dimension_numbers = #tpu.dot_dimension_numbers<[1], [0], [0], [1], [0, 0, 1, 1], [], []>} : vector<128x32xbf16>, vector<32x128xbf16>, vector<128x128xf32> -> vector<128x128xf32>
    %c0_104 = arith.constant 0 : index
    %c0_105 = arith.constant 0 : index
    %113 = vector.load %arg11[%c0_104, %c0_105] : memref<1x128xf32, #tpu.memory_space<vmem>>, vector<1x128xf32>
    %114 = vector.broadcast %113 : vector<1x128xf32> to vector<128x128xf32>
    %115 = arith.mulf %112, %114 : vector<128x128xf32>
    %c0_106 = arith.constant 0 : index
    %c0_107 = arith.constant 0 : index
    %116 = vector.load %arg12[%c0_106, %c0_107] : memref<1x128xf32, #tpu.memory_space<vmem>>, vector<1x128xf32>
    %117 = vector.broadcast %116 : vector<1x128xf32> to vector<128x128xf32>
    %118 = arith.addf %115, %117 : vector<128x128xf32>
    %c0_108 = arith.constant 0 : index
    %c0_109 = arith.constant 0 : index
    %c0_110 = arith.constant 0 : index
    %c0_111 = arith.constant 0 : index
    %119 = vector.load %arg2[%c0_108, %c0_109, %c0_110, %c0_111] : memref<1x8x16x128xf32, #tpu.memory_space<vmem>>, vector<1x8x16x128xf32>
    %120 = vector.shape_cast %119 : vector<1x8x16x128xf32> to vector<8x16x128xf32>
    %121 = vector.shape_cast %120 : vector<8x16x128xf32> to vector<128x128xf32>
    %122 = arith.addf %118, %121 : vector<128x128xf32>
    %cst_112 = arith.constant 0.000000e+00 : f32
    %123 = vector.broadcast %cst_112 : f32 to vector<128x128xf32>
    %124 = arith.maximumf %122, %123 : vector<128x128xf32>
    %125 = vector.shape_cast %124 : vector<128x128xf32> to vector<8x16x128xf32>
    %c0_113 = arith.constant 0 : index
    %c0_114 = arith.constant 0 : index
    %c0_115 = arith.constant 0 : index
    %c0_116 = arith.constant 0 : index
    %126 = vector.load %arg13[%c0_113, %c0_114, %c0_115, %c0_116] : memref<1x8x16x128xf32, #tpu.memory_space<vmem>>, vector<1x8x16x128xf32>
    %127 = vector.shape_cast %126 : vector<1x8x16x128xf32> to vector<8x16x128xf32>
    %128 = vector.shape_cast %125 : vector<8x16x128xf32> to vector<1x8x16x128xf32>
    tpu.vector_store %arg13[%c0_113, %c0_114, %c0_115, %c0_116], %128 {strides = array<i32>} : memref<1x8x16x128xf32, #tpu.memory_space<vmem>>, vector<1x8x16x128xf32>,
    return
  }
  func.func @transform_0(%arg0: i32, %arg1: i32) -> (i32, i32, i32, i32) {
    %c0_i32 = arith.constant 0 : i32
    %c0_i32_0 = arith.constant 0 : i32
    %c0_i32_1 = arith.constant 0 : i32
    return %arg0, %arg1, %c0_i32, %c0_i32_0 : i32, i32, i32, i32
  }
  func.func @transform_1(%arg0: i32, %arg1: i32) -> (i32, i32, i32, i32, i32) {
    %c0_i32 = arith.constant 0 : i32
    %c0_i32_0 = arith.constant 0 : i32
    %c0_i32_1 = arith.constant 0 : i32
    %c0_i32_2 = arith.constant 0 : i32
    return %arg0, %arg1, %c0_i32, %c0_i32_0, %c0_i32_1 : i32, i32, i32, i32, i32
  }
  func.func @transform_2(%arg0: i32, %arg1: i32) -> (i32, i32) {
    %c0_i32 = arith.constant 0 : i32
    %c0_i32_0 = arith.constant 0 : i32
    %c0_i32_1 = arith.constant 0 : i32
    return %c0_i32, %c0_i32_0 : i32, i32
  }
  func.func @transform_3(%arg0: i32, %arg1: i32) -> (i32, i32) {
    %c0_i32 = arith.constant 0 : i32
    %c0_i32_0 = arith.constant 0 : i32
    %c0_i32_1 = arith.constant 0 : i32
    return %c0_i32, %c0_i32_0 : i32, i32
  }
  func.func @transform_4(%arg0: i32, %arg1: i32) -> (i32, i32) {
    %c0_i32 = arith.constant 0 : i32
    %c0_i32_0 = arith.constant 0 : i32
    %c0_i32_1 = arith.constant 0 : i32
    return %c0_i32, %c0_i32_0 : i32, i32
  }
  func.func @transform_5(%arg0: i32, %arg1: i32) -> (i32, i32, i32) {
    %c0_i32 = arith.constant 0 : i32
    %c0_i32_0 = arith.constant 0 : i32
    %c0_i32_1 = arith.constant 0 : i32
    %c0_i32_2 = arith.constant 0 : i32
    return %c0_i32, %c0_i32_0, %c0_i32_1 : i32, i32, i32
  }
  func.func @transform_6(%arg0: i32, %arg1: i32) -> (i32, i32) {
    %c0_i32 = arith.constant 0 : i32
    %c0_i32_0 = arith.constant 0 : i32
    %c0_i32_1 = arith.constant 0 : i32
    return %c0_i32, %c0_i32_0 : i32, i32
  }
  func.func @transform_7(%arg0: i32, %arg1: i32) -> (i32, i32) {
    %c0_i32 = arith.constant 0 : i32
    %c0_i32_0 = arith.constant 0 : i32
    %c0_i32_1 = arith.constant 0 : i32
    return %c0_i32, %c0_i32_0 : i32, i32
  }
  func.func @transform_8(%arg0: i32, %arg1: i32) -> (i32, i32) {
    %c0_i32 = arith.constant 0 : i32
    %c0_i32_0 = arith.constant 0 : i32
    %c0_i32_1 = arith.constant 0 : i32
    return %c0_i32, %c0_i32_0 : i32, i32
  }
  func.func @transform_9(%arg0: i32, %arg1: i32) -> (i32, i32) {
    %c0_i32 = arith.constant 0 : i32
    %c0_i32_0 = arith.constant 0 : i32
    %c0_i32_1 = arith.constant 0 : i32
    return %c0_i32, %c0_i32_0 : i32, i32
  }
  func.func @transform_10(%arg0: i32, %arg1: i32) -> (i32, i32) {
    %c0_i32 = arith.constant 0 : i32
    %c0_i32_0 = arith.constant 0 : i32
    %c0_i32_1 = arith.constant 0 : i32
    return %c0_i32, %c0_i32_0 : i32, i32
  }
  func.func @transform_11(%arg0: i32, %arg1: i32) -> (i32, i32, i32, i32) {
    %c0_i32 = arith.constant 0 : i32
    %c0_i32_0 = arith.constant 0 : i32
    %c0_i32_1 = arith.constant 0 : i32
    return %arg0, %arg1, %c0_i32, %c0_i32_0 : i32, i32, i32, i32
  }
}

module attributes {stable_mosaic.version = 11 : i64} {
  func.func @_bottleneck_kernel(%arg0: i32, %arg1: i32, %arg2: memref<1x8x16x128xf32, #tpu.memory_space<vmem>>, %arg3: memref<1x1x2x16x128xf32, #tpu.memory_space<vmem>>, %arg4: memref<128x32xbf16, #tpu.memory_space<vmem>>, %arg5: memref<1x32xf32, #tpu.memory_space<vmem>>, %arg6: memref<1x32xf32, #tpu.memory_space<vmem>>, %arg7: memref<9x32x32xbf16, #tpu.memory_space<vmem>>, %arg8: memref<1x32xf32, #tpu.memory_space<vmem>>, %arg9: memref<1x32xf32, #tpu.memory_space<vmem>>, %arg10: memref<32x128xbf16, #tpu.memory_space<vmem>>, %arg11: memref<1x128xf32, #tpu.memory_space<vmem>>, %arg12: memref<1x128xf32, #tpu.memory_space<vmem>>, %arg13: memref<1x8x16x128xf32, #tpu.memory_space<vmem>>, %arg14: memref<10x32x32xbf16, #tpu.memory_space<vmem>>) attributes {dimension_semantics = [#tpu.dimension_semantics<parallel>, #tpu.dimension_semantics<parallel>], iteration_bounds = array<i64: 2, 2>, scalar_prefetch = 0 : i64, scratch_operands = 1 : i64, tpu.core_type = #tpu.core_type<tc>, window_params = [{transform_indices = @transform_0, window_bounds = array<i64: 1, 8, 16, 128>}, {transform_indices = @transform_1, window_bounds = array<i64: 1, 1, 2, 16, 128>}, {pipeline_mode = #tpu.pipeline_mode<synchronous>, transform_indices = @transform_2, window_bounds = array<i64: 128, 32>}, {pipeline_mode = #tpu.pipeline_mode<synchronous>, transform_indices = @transform_3, window_bounds = array<i64: 1, 32>}, {pipeline_mode = #tpu.pipeline_mode<synchronous>, transform_indices = @transform_4, window_bounds = array<i64: 1, 32>}, {pipeline_mode = #tpu.pipeline_mode<synchronous>, transform_indices = @transform_5, window_bounds = array<i64: 9, 32, 32>}, {pipeline_mode = #tpu.pipeline_mode<synchronous>, transform_indices = @transform_6, window_bounds = array<i64: 1, 32>}, {pipeline_mode = #tpu.pipeline_mode<synchronous>, transform_indices = @transform_7, window_bounds = array<i64: 1, 32>}, {pipeline_mode = #tpu.pipeline_mode<synchronous>, transform_indices = @transform_8, window_bounds = array<i64: 32, 128>}, {pipeline_mode = #tpu.pipeline_mode<synchronous>, transform_indices = @transform_9, window_bounds = array<i64: 1, 128>}, {pipeline_mode = #tpu.pipeline_mode<synchronous>, transform_indices = @transform_10, window_bounds = array<i64: 1, 128>}, {transform_indices = @transform_11, window_bounds = array<i64: 1, 8, 16, 128>}]} {
    %cst = arith.constant 0.000000e+00 : bf16
    %0 = vector.broadcast %cst : bf16 to vector<10x8x32xbf16>
    %c0 = arith.constant 0 : index
    %c0_0 = arith.constant 0 : index
    %c0_1 = arith.constant 0 : index
    %1 = vector.load %arg14[%c0, %c0_0, %c0_1] : memref<10x32x32xbf16, #tpu.memory_space<vmem>>, vector<10x8x32xbf16>
    tpu.vector_store %arg14[%c0, %c0_0, %c0_1], %0 {strides = array<i32>} : memref<10x32x32xbf16, #tpu.memory_space<vmem>>, vector<10x8x32xbf16>,
    %cst_2 = arith.constant 0.000000e+00 : bf16
    %2 = vector.broadcast %cst_2 : bf16 to vector<10x1x32xbf16>
    %c0_3 = arith.constant 0 : index
    %c24 = arith.constant 24 : index
    %c0_4 = arith.constant 0 : index
    %3 = vector.load %arg14[%c0_3, %c24, %c0_4] : memref<10x32x32xbf16, #tpu.memory_space<vmem>>, vector<10x1x32xbf16>
    tpu.vector_store %arg14[%c0_3, %c24, %c0_4], %2 {strides = array<i32>} : memref<10x32x32xbf16, #tpu.memory_space<vmem>>, vector<10x1x32xbf16>,
    %cst_5 = arith.constant 0.000000e+00 : bf16
    %4 = vector.broadcast %cst_5 : bf16 to vector<16x32xbf16>
    %c0_6 = arith.constant 0 : index
    %c8 = arith.constant 8 : index
    %c0_7 = arith.constant 0 : index
    %5 = vector.load %arg14[%c0_6, %c8, %c0_7] : memref<10x32x32xbf16, #tpu.memory_space<vmem>>, vector<1x16x32xbf16>
    %6 = vector.shape_cast %5 : vector<1x16x32xbf16> to vector<16x32xbf16>
    %7 = vector.shape_cast %4 : vector<16x32xbf16> to vector<1x16x32xbf16>
    tpu.vector_store %arg14[%c0_6, %c8, %c0_7], %7 {strides = array<i32>} : memref<10x32x32xbf16, #tpu.memory_space<vmem>>, vector<1x16x32xbf16>,
    %c9 = arith.constant 9 : index
    %c8_8 = arith.constant 8 : index
    %c0_9 = arith.constant 0 : index
    %8 = vector.load %arg14[%c9, %c8_8, %c0_9] : memref<10x32x32xbf16, #tpu.memory_space<vmem>>, vector<1x16x32xbf16>
    %9 = vector.shape_cast %8 : vector<1x16x32xbf16> to vector<16x32xbf16>
    %10 = vector.shape_cast %4 : vector<16x32xbf16> to vector<1x16x32xbf16>
    tpu.vector_store %arg14[%c9, %c8_8, %c0_9], %10 {strides = array<i32>} : memref<10x32x32xbf16, #tpu.memory_space<vmem>>, vector<1x16x32xbf16>,
    %c0_10 = arith.constant 0 : index
    %c0_11 = arith.constant 0 : index
    %c0_12 = arith.constant 0 : index
    %c0_13 = arith.constant 0 : index
    %11 = vector.load %arg2[%c0_10, %c0_11, %c0_12, %c0_13] : memref<1x8x16x128xf32, #tpu.memory_space<vmem>>, vector<1x8x16x128xf32>
    %12 = vector.shape_cast %11 : vector<1x8x16x128xf32> to vector<8x16x128xf32>
    %13 = vector.shape_cast %12 : vector<8x16x128xf32> to vector<128x128xf32>
    %14 = arith.truncf %13 : vector<128x128xf32> to vector<128x128xbf16>
    %c0_14 = arith.constant 0 : index
    %c0_15 = arith.constant 0 : index
    %15 = vector.load %arg4[%c0_14, %c0_15] : memref<128x32xbf16, #tpu.memory_space<vmem>>, vector<128x32xbf16>
    %cst_16 = arith.constant dense<0.000000e+00> : vector<128x32xf32>
    %16 = tpu.matmul %14, %15, %cst_16 {dimension_numbers = #tpu.dot_dimension_numbers<[1], [0], [0], [1], [0, 0, 1, 1], [], []>} : vector<128x128xbf16>, vector<128x32xbf16>, vector<128x32xf32> -> vector<128x32xf32>
    %c0_17 = arith.constant 0 : index
    %c0_18 = arith.constant 0 : index
    %17 = vector.load %arg5[%c0_17, %c0_18] : memref<1x32xf32, #tpu.memory_space<vmem>>, vector<1x32xf32>
    %18 = vector.broadcast %17 : vector<1x32xf32> to vector<128x32xf32>
    %19 = arith.mulf %16, %18 : vector<128x32xf32>
    %c0_19 = arith.constant 0 : index
    %c0_20 = arith.constant 0 : index
    %20 = vector.load %arg6[%c0_19, %c0_20] : memref<1x32xf32, #tpu.memory_space<vmem>>, vector<1x32xf32>
    %21 = vector.broadcast %20 : vector<1x32xf32> to vector<128x32xf32>
    %22 = arith.addf %19, %21 : vector<128x32xf32>
    %cst_21 = arith.constant 0.000000e+00 : f32
    %23 = vector.broadcast %cst_21 : f32 to vector<128x32xf32>
    %24 = arith.maximumf %22, %23 : vector<128x32xf32>
    %25 = arith.truncf %24 : vector<128x32xf32> to vector<128x32xbf16>
    %26 = vector.shape_cast %25 : vector<128x32xbf16> to vector<8x16x32xbf16>
    %c1 = arith.constant 1 : index
    %c8_22 = arith.constant 8 : index
    %c0_23 = arith.constant 0 : index
    %27 = vector.load %arg14[%c1, %c8_22, %c0_23] : memref<10x32x32xbf16, #tpu.memory_space<vmem>>, vector<8x16x32xbf16>
    tpu.vector_store %arg14[%c1, %c8_22, %c0_23], %26 {strides = array<i32>} : memref<10x32x32xbf16, #tpu.memory_space<vmem>>, vector<8x16x32xbf16>,
    %c0_24 = arith.constant 0 : index
    %c0_25 = arith.constant 0 : index
    %c0_26 = arith.constant 0 : index
    %c0_27 = arith.constant 0 : index
    %c0_28 = arith.constant 0 : index
    %28 = vector.load %arg3[%c0_24, %c0_25, %c0_26, %c0_27, %c0_28] : memref<1x1x2x16x128xf32, #tpu.memory_space<vmem>>, vector<1x1x2x16x128xf32>
    %29 = vector.shape_cast %28 : vector<1x1x2x16x128xf32> to vector<2x16x128xf32>
    %30 = vector.shape_cast %29 : vector<2x16x128xf32> to vector<32x128xf32>
    %31 = arith.truncf %30 : vector<32x128xf32> to vector<32x128xbf16>
    %c0_29 = arith.constant 0 : index
    %c0_30 = arith.constant 0 : index
    %32 = vector.load %arg4[%c0_29, %c0_30] : memref<128x32xbf16, #tpu.memory_space<vmem>>, vector<128x32xbf16>
    %cst_31 = arith.constant dense<0.000000e+00> : vector<32x32xf32>
    %33 = tpu.matmul %31, %32, %cst_31 {dimension_numbers = #tpu.dot_dimension_numbers<[1], [0], [0], [1], [0, 0, 1, 1], [], []>} : vector<32x128xbf16>, vector<128x32xbf16>, vector<32x32xf32> -> vector<32x32xf32>
    %c0_32 = arith.constant 0 : index
    %c0_33 = arith.constant 0 : index
    %34 = vector.load %arg5[%c0_32, %c0_33] : memref<1x32xf32, #tpu.memory_space<vmem>>, vector<1x32xf32>
    %35 = vector.broadcast %34 : vector<1x32xf32> to vector<32x32xf32>
    %36 = arith.mulf %33, %35 : vector<32x32xf32>
    %c0_34 = arith.constant 0 : index
    %c0_35 = arith.constant 0 : index
    %37 = vector.load %arg6[%c0_34, %c0_35] : memref<1x32xf32, #tpu.memory_space<vmem>>, vector<1x32xf32>
    %38 = vector.broadcast %37 : vector<1x32xf32> to vector<32x32xf32>
    %39 = arith.addf %36, %38 : vector<32x32xf32>
    %cst_36 = arith.constant 0.000000e+00 : f32
    %40 = vector.broadcast %cst_36 : f32 to vector<32x32xf32>
    %41 = arith.maximumf %39, %40 : vector<32x32xf32>
    %42 = arith.truncf %41 : vector<32x32xf32> to vector<32x32xbf16>
    %c0_i32 = arith.constant 0 : i32
    %43 = arith.cmpi sgt, %arg1, %c0_i32 : i32
    %44 = arith.extui %43 : i1 to i32
    %c0_i32_37 = arith.constant 0 : i32
    %45 = arith.cmpi ne, %44, %c0_i32_37 : i32
    scf.if %45 {
      %129 = vector.extract_strided_slice %42 {offsets = [0, 0], sizes = [16, 32], strides = [1, 1]} : vector<32x32xbf16> to vector<16x32xbf16>
      %c0_117 = arith.constant 0 : index
      %c8_118 = arith.constant 8 : index
      %c0_119 = arith.constant 0 : index
      %130 = vector.load %arg14[%c0_117, %c8_118, %c0_119] : memref<10x32x32xbf16, #tpu.memory_space<vmem>>, vector<1x16x32xbf16>
      %131 = vector.shape_cast %130 : vector<1x16x32xbf16> to vector<16x32xbf16>
      %132 = vector.shape_cast %129 : vector<16x32xbf16> to vector<1x16x32xbf16>
      tpu.vector_store %arg14[%c0_117, %c8_118, %c0_119], %132 {strides = array<i32>} : memref<10x32x32xbf16, #tpu.memory_space<vmem>>, vector<1x16x32xbf16>,
    } else {
    }
    %c1_i32 = arith.constant 1 : i32
    %46 = arith.cmpi slt, %arg1, %c1_i32 : i32
    %47 = arith.extui %46 : i1 to i32
    %c0_i32_38 = arith.constant 0 : i32
    %48 = arith.cmpi ne, %47, %c0_i32_38 : i32
    scf.if %48 {
      %129 = vector.extract_strided_slice %42 {offsets = [16, 0], sizes = [16, 32], strides = [1, 1]} : vector<32x32xbf16> to vector<16x32xbf16>
      %c9_117 = arith.constant 9 : index
      %c8_118 = arith.constant 8 : index
      %c0_119 = arith.constant 0 : index
      %130 = vector.load %arg14[%c9_117, %c8_118, %c0_119] : memref<10x32x32xbf16, #tpu.memory_space<vmem>>, vector<1x16x32xbf16>
      %131 = vector.shape_cast %130 : vector<1x16x32xbf16> to vector<16x32xbf16>
      %132 = vector.shape_cast %129 : vector<16x32xbf16> to vector<1x16x32xbf16>
      tpu.vector_store %arg14[%c9_117, %c8_118, %c0_119], %132 {strides = array<i32>} : memref<10x32x32xbf16, #tpu.memory_space<vmem>>, vector<1x16x32xbf16>,
    } else {
    }
    %c0_39 = arith.constant 0 : index
    %c7 = arith.constant 7 : index
    %c0_40 = arith.constant 0 : index
    %49 = vector.load %arg14[%c0_39, %c7, %c0_40] : memref<10x32x32xbf16, #tpu.memory_space<vmem>>, vector<8x16x32xbf16>
    %50 = vector.shape_cast %49 : vector<8x16x32xbf16> to vector<128x32xbf16>
    %c0_41 = arith.constant 0 : index
    %c0_42 = arith.constant 0 : index
    %c0_43 = arith.constant 0 : index
    %51 = vector.load %arg7[%c0_41, %c0_42, %c0_43] : memref<9x32x32xbf16, #tpu.memory_space<vmem>>, vector<1x32x32xbf16>
    %52 = vector.shape_cast %51 : vector<1x32x32xbf16> to vector<32x32xbf16>
    %cst_44 = arith.constant dense<0.000000e+00> : vector<128x32xf32>
    %53 = tpu.matmul %50, %52, %cst_44 {dimension_numbers = #tpu.dot_dimension_numbers<[1], [0], [0], [1], [0, 0, 1, 1], [], []>} : vector<128x32xbf16>, vector<32x32xbf16>, vector<128x32xf32> -> vector<128x32xf32>
    %c0_45 = arith.constant 0 : index
    %c8_46 = arith.constant 8 : index
    %c0_47 = arith.constant 0 : index
    %54 = vector.load %arg14[%c0_45, %c8_46, %c0_47] : memref<10x32x32xbf16, #tpu.memory_space<vmem>>, vector<8x16x32xbf16>
    %55 = vector.shape_cast %54 : vector<8x16x32xbf16> to vector<128x32xbf16>
    %c1_48 = arith.constant 1 : index
    %c0_49 = arith.constant 0 : index
    %c0_50 = arith.constant 0 : index
    %56 = vector.load %arg7[%c1_48, %c0_49, %c0_50] : memref<9x32x32xbf16, #tpu.memory_space<vmem>>, vector<1x32x32xbf16>
    %57 = vector.shape_cast %56 : vector<1x32x32xbf16> to vector<32x32xbf16>
    %cst_51 = arith.constant dense<0.000000e+00> : vector<128x32xf32>
    %58 = tpu.matmul %55, %57, %cst_51 {dimension_numbers = #tpu.dot_dimension_numbers<[1], [0], [0], [1], [0, 0, 1, 1], [], []>} : vector<128x32xbf16>, vector<32x32xbf16>, vector<128x32xf32> -> vector<128x32xf32>
    %59 = arith.addf %53, %58 : vector<128x32xf32>
    %c0_52 = arith.constant 0 : index
    %c9_53 = arith.constant 9 : index
    %c0_54 = arith.constant 0 : index
    %60 = vector.load %arg14[%c0_52, %c9_53, %c0_54] : memref<10x32x32xbf16, #tpu.memory_space<vmem>>, vector<8x16x32xbf16>
    %61 = vector.shape_cast %60 : vector<8x16x32xbf16> to vector<128x32xbf16>
    %c2 = arith.constant 2 : index
    %c0_55 = arith.constant 0 : index
    %c0_56 = arith.constant 0 : index
    %62 = vector.load %arg7[%c2, %c0_55, %c0_56] : memref<9x32x32xbf16, #tpu.memory_space<vmem>>, vector<1x32x32xbf16>
    %63 = vector.shape_cast %62 : vector<1x32x32xbf16> to vector<32x32xbf16>
    %cst_57 = arith.constant dense<0.000000e+00> : vector<128x32xf32>
    %64 = tpu.matmul %61, %63, %cst_57 {dimension_numbers = #tpu.dot_dimension_numbers<[1], [0], [0], [1], [0, 0, 1, 1], [], []>} : vector<128x32xbf16>, vector<32x32xbf16>, vector<128x32xf32> -> vector<128x32xf32>
    %65 = arith.addf %59, %64 : vector<128x32xf32>
    %c1_58 = arith.constant 1 : index
    %c7_59 = arith.constant 7 : index
    %c0_60 = arith.constant 0 : index
    %66 = vector.load %arg14[%c1_58, %c7_59, %c0_60] : memref<10x32x32xbf16, #tpu.memory_space<vmem>>, vector<8x16x32xbf16>
    %67 = vector.shape_cast %66 : vector<8x16x32xbf16> to vector<128x32xbf16>
    %c3 = arith.constant 3 : index
    %c0_61 = arith.constant 0 : index
    %c0_62 = arith.constant 0 : index
    %68 = vector.load %arg7[%c3, %c0_61, %c0_62] : memref<9x32x32xbf16, #tpu.memory_space<vmem>>, vector<1x32x32xbf16>
    %69 = vector.shape_cast %68 : vector<1x32x32xbf16> to vector<32x32xbf16>
    %cst_63 = arith.constant dense<0.000000e+00> : vector<128x32xf32>
    %70 = tpu.matmul %67, %69, %cst_63 {dimension_numbers = #tpu.dot_dimension_numbers<[1], [0], [0], [1], [0, 0, 1, 1], [], []>} : vector<128x32xbf16>, vector<32x32xbf16>, vector<128x32xf32> -> vector<128x32xf32>
    %71 = arith.addf %65, %70 : vector<128x32xf32>
    %c1_64 = arith.constant 1 : index
    %c8_65 = arith.constant 8 : index
    %c0_66 = arith.constant 0 : index
    %72 = vector.load %arg14[%c1_64, %c8_65, %c0_66] : memref<10x32x32xbf16, #tpu.memory_space<vmem>>, vector<8x16x32xbf16>
    %73 = vector.shape_cast %72 : vector<8x16x32xbf16> to vector<128x32xbf16>
    %c4 = arith.constant 4 : index
    %c0_67 = arith.constant 0 : index
    %c0_68 = arith.constant 0 : index
    %74 = vector.load %arg7[%c4, %c0_67, %c0_68] : memref<9x32x32xbf16, #tpu.memory_space<vmem>>, vector<1x32x32xbf16>
    %75 = vector.shape_cast %74 : vector<1x32x32xbf16> to vector<32x32xbf16>
    %cst_69 = arith.constant dense<0.000000e+00> : vector<128x32xf32>
    %76 = tpu.matmul %73, %75, %cst_69 {dimension_numbers = #tpu.dot_dimension_numbers<[1], [0], [0], [1], [0, 0, 1, 1], [], []>} : vector<128x32xbf16>, vector<32x32xbf16>, vector<128x32xf32> -> vector<128x32xf32>
    %77 = arith.addf %71, %76 : vector<128x32xf32>
    %c1_70 = arith.constant 1 : index
    %c9_71 = arith.constant 9 : index
    %c0_72 = arith.constant 0 : index
    %78 = vector.load %arg14[%c1_70, %c9_71, %c0_72] : memref<10x32x32xbf16, #tpu.memory_space<vmem>>, vector<8x16x32xbf16>
    %79 = vector.shape_cast %78 : vector<8x16x32xbf16> to vector<128x32xbf16>
    %c5 = arith.constant 5 : index
    %c0_73 = arith.constant 0 : index
    %c0_74 = arith.constant 0 : index
    %80 = vector.load %arg7[%c5, %c0_73, %c0_74] : memref<9x32x32xbf16, #tpu.memory_space<vmem>>, vector<1x32x32xbf16>
    %81 = vector.shape_cast %80 : vector<1x32x32xbf16> to vector<32x32xbf16>
    %cst_75 = arith.constant dense<0.000000e+00> : vector<128x32xf32>
    %82 = tpu.matmul %79, %81, %cst_75 {dimension_numbers = #tpu.dot_dimension_numbers<[1], [0], [0], [1], [0, 0, 1, 1], [], []>} : vector<128x32xbf16>, vector<32x32xbf16>, vector<128x32xf32> -> vector<128x32xf32>
    %83 = arith.addf %77, %82 : vector<128x32xf32>
    %c2_76 = arith.constant 2 : index
    %c7_77 = arith.constant 7 : index
    %c0_78 = arith.constant 0 : index
    %84 = vector.load %arg14[%c2_76, %c7_77, %c0_78] : memref<10x32x32xbf16, #tpu.memory_space<vmem>>, vector<8x16x32xbf16>
    %85 = vector.shape_cast %84 : vector<8x16x32xbf16> to vector<128x32xbf16>
    %c6 = arith.constant 6 : index
    %c0_79 = arith.constant 0 : index
    %c0_80 = arith.constant 0 : index
    %86 = vector.load %arg7[%c6, %c0_79, %c0_80] : memref<9x32x32xbf16, #tpu.memory_space<vmem>>, vector<1x32x32xbf16>
    %87 = vector.shape_cast %86 : vector<1x32x32xbf16> to vector<32x32xbf16>
    %cst_81 = arith.constant dense<0.000000e+00> : vector<128x32xf32>
    %88 = tpu.matmul %85, %87, %cst_81 {dimension_numbers = #tpu.dot_dimension_numbers<[1], [0], [0], [1], [0, 0, 1, 1], [], []>} : vector<128x32xbf16>, vector<32x32xbf16>, vector<128x32xf32> -> vector<128x32xf32>
    %89 = arith.addf %83, %88 : vector<128x32xf32>
    %c2_82 = arith.constant 2 : index
    %c8_83 = arith.constant 8 : index
    %c0_84 = arith.constant 0 : index
    %90 = vector.load %arg14[%c2_82, %c8_83, %c0_84] : memref<10x32x32xbf16, #tpu.memory_space<vmem>>, vector<8x16x32xbf16>
    %91 = vector.shape_cast %90 : vector<8x16x32xbf16> to vector<128x32xbf16>
    %c7_85 = arith.constant 7 : index
    %c0_86 = arith.constant 0 : index
    %c0_87 = arith.constant 0 : index
    %92 = vector.load %arg7[%c7_85, %c0_86, %c0_87] : memref<9x32x32xbf16, #tpu.memory_space<vmem>>, vector<1x32x32xbf16>
    %93 = vector.shape_cast %92 : vector<1x32x32xbf16> to vector<32x32xbf16>
    %cst_88 = arith.constant dense<0.000000e+00> : vector<128x32xf32>
    %94 = tpu.matmul %91, %93, %cst_88 {dimension_numbers = #tpu.dot_dimension_numbers<[1], [0], [0], [1], [0, 0, 1, 1], [], []>} : vector<128x32xbf16>, vector<32x32xbf16>, vector<128x32xf32> -> vector<128x32xf32>
    %95 = arith.addf %89, %94 : vector<128x32xf32>
    %c2_89 = arith.constant 2 : index
    %c9_90 = arith.constant 9 : index
    %c0_91 = arith.constant 0 : index
    %96 = vector.load %arg14[%c2_89, %c9_90, %c0_91] : memref<10x32x32xbf16, #tpu.memory_space<vmem>>, vector<8x16x32xbf16>
    %97 = vector.shape_cast %96 : vector<8x16x32xbf16> to vector<128x32xbf16>
    %c8_92 = arith.constant 8 : index
    %c0_93 = arith.constant 0 : index
    %c0_94 = arith.constant 0 : index
    %98 = vector.load %arg7[%c8_92, %c0_93, %c0_94] : memref<9x32x32xbf16, #tpu.memory_space<vmem>>, vector<1x32x32xbf16>
    %99 = vector.shape_cast %98 : vector<1x32x32xbf16> to vector<32x32xbf16>
    %cst_95 = arith.constant dense<0.000000e+00> : vector<128x32xf32>
    %100 = tpu.matmul %97, %99, %cst_95 {dimension_numbers = #tpu.dot_dimension_numbers<[1], [0], [0], [1], [0, 0, 1, 1], [], []>} : vector<128x32xbf16>, vector<32x32xbf16>, vector<128x32xf32> -> vector<128x32xf32>
    %101 = arith.addf %95, %100 : vector<128x32xf32>
    %c0_96 = arith.constant 0 : index
    %c0_97 = arith.constant 0 : index
    %102 = vector.load %arg8[%c0_96, %c0_97] : memref<1x32xf32, #tpu.memory_space<vmem>>, vector<1x32xf32>
    %103 = vector.broadcast %102 : vector<1x32xf32> to vector<128x32xf32>
    %104 = arith.mulf %101, %103 : vector<128x32xf32>
    %c0_98 = arith.constant 0 : index
    %c0_99 = arith.constant 0 : index
    %105 = vector.load %arg9[%c0_98, %c0_99] : memref<1x32xf32, #tpu.memory_space<vmem>>, vector<1x32xf32>
    %106 = vector.broadcast %105 : vector<1x32xf32> to vector<128x32xf32>
    %107 = arith.addf %104, %106 : vector<128x32xf32>
    %cst_100 = arith.constant 0.000000e+00 : f32
    %108 = vector.broadcast %cst_100 : f32 to vector<128x32xf32>
    %109 = arith.maximumf %107, %108 : vector<128x32xf32>
    %110 = arith.truncf %109 : vector<128x32xf32> to vector<128x32xbf16>
    %c0_101 = arith.constant 0 : index
    %c0_102 = arith.constant 0 : index
    %111 = vector.load %arg10[%c0_101, %c0_102] : memref<32x128xbf16, #tpu.memory_space<vmem>>, vector<32x128xbf16>
    %cst_103 = arith.constant dense<0.000000e+00> : vector<128x128xf32>
    %112 = tpu.matmul %110, %111, %cst_103 {dimension_numbers = #tpu.dot_dimension_numbers<[1], [0], [0], [1], [0, 0, 1, 1], [], []>} : vector<128x32xbf16>, vector<32x128xbf16>, vector<128x128xf32> -> vector<128x128xf32>
    %c0_104 = arith.constant 0 : index
    %c0_105 = arith.constant 0 : index
    %113 = vector.load %arg11[%c0_104, %c0_105] : memref<1x128xf32, #tpu.memory_space<vmem>>, vector<1x128xf32>
    %114 = vector.broadcast %113 : vector<1x128xf32> to vector<128x128xf32>
    %115 = arith.mulf %112, %114 : vector<128x128xf32>
    %c0_106 = arith.constant 0 : index
    %c0_107 = arith.constant 0 : index
    %116 = vector.load %arg12[%c0_106, %c0_107] : memref<1x128xf32, #tpu.memory_space<vmem>>, vector<1x128xf32>
    %117 = vector.broadcast %116 : vector<1x128xf32> to vector<128x128xf32>
    %118 = arith.addf %115, %117 : vector<128x128xf32>
    %c0_108 = arith.constant 0 : index
    %c0_109 = arith.constant 0 : index
    %c0_110 = arith.constant 0 : index
    %c0_111 = arith.constant 0 : index
    %119 = vector.load %arg2[%c0_108, %c0_109, %c0_110, %c0_111] : memref<1x8x16x128xf32, #tpu.memory_space<vmem>>, vector<1x8x16x128xf32>
    %120 = vector.shape_cast %119 : vector<1x8x16x128xf32> to vector<8x16x128xf32>
    %121 = vector.shape_cast %120 : vector<8x16x128xf32> to vector<128x128xf32>
    %122 = arith.addf %118, %121 : vector<128x128xf32>
    %cst_112 = arith.constant 0.000000e+00 : f32
    %123 = vector.broadcast %cst_112 : f32 to vector<128x128xf32>
    %124 = arith.maximumf %122, %123 : vector<128x128xf32>
    %125 = vector.shape_cast %124 : vector<128x128xf32> to vector<8x16x128xf32>
    %c0_113 = arith.constant 0 : index
    %c0_114 = arith.constant 0 : index
    %c0_115 = arith.constant 0 : index
    %c0_116 = arith.constant 0 : index
    %126 = vector.load %arg13[%c0_113, %c0_114, %c0_115, %c0_116] : memref<1x8x16x128xf32, #tpu.memory_space<vmem>>, vector<1x8x16x128xf32>
    %127 = vector.shape_cast %126 : vector<1x8x16x128xf32> to vector<8x16x128xf32>
    %128 = vector.shape_cast %125 : vector<8x16x128xf32> to vector<1x8x16x128xf32>
    tpu.vector_store %arg13[%c0_113, %c0_114, %c0_115, %c0_116], %128 {strides = array<i32>} : memref<1x8x16x128xf32, #tpu.memory_space<vmem>>, vector<1x8x16x128xf32>,
    return
  }
  func.func @transform_0(%arg0: i32, %arg1: i32) -> (i32, i32, i32, i32) {
    %c0_i32 = arith.constant 0 : i32
    %c0_i32_0 = arith.constant 0 : i32
    %c0_i32_1 = arith.constant 0 : i32
    return %arg0, %arg1, %c0_i32, %c0_i32_0 : i32, i32, i32, i32
  }
  func.func @transform_1(%arg0: i32, %arg1: i32) -> (i32, i32, i32, i32, i32) {
    %c0_i32 = arith.constant 0 : i32
    %c0_i32_0 = arith.constant 0 : i32
    %c0_i32_1 = arith.constant 0 : i32
    %c0_i32_2 = arith.constant 0 : i32
    return %arg0, %arg1, %c0_i32, %c0_i32_0, %c0_i32_1 : i32, i32, i32, i32, i32
  }
  func.func @transform_2(%arg0: i32, %arg1: i32) -> (i32, i32) {
    %c0_i32 = arith.constant 0 : i32
    %c0_i32_0 = arith.constant 0 : i32
    %c0_i32_1 = arith.constant 0 : i32
    return %c0_i32, %c0_i32_0 : i32, i32
  }
  func.func @transform_3(%arg0: i32, %arg1: i32) -> (i32, i32) {
    %c0_i32 = arith.constant 0 : i32
    %c0_i32_0 = arith.constant 0 : i32
    %c0_i32_1 = arith.constant 0 : i32
    return %c0_i32, %c0_i32_0 : i32, i32
  }
  func.func @transform_4(%arg0: i32, %arg1: i32) -> (i32, i32) {
    %c0_i32 = arith.constant 0 : i32
    %c0_i32_0 = arith.constant 0 : i32
    %c0_i32_1 = arith.constant 0 : i32
    return %c0_i32, %c0_i32_0 : i32, i32
  }
  func.func @transform_5(%arg0: i32, %arg1: i32) -> (i32, i32, i32) {
    %c0_i32 = arith.constant 0 : i32
    %c0_i32_0 = arith.constant 0 : i32
    %c0_i32_1 = arith.constant 0 : i32
    %c0_i32_2 = arith.constant 0 : i32
    return %c0_i32, %c0_i32_0, %c0_i32_1 : i32, i32, i32
  }
  func.func @transform_6(%arg0: i32, %arg1: i32) -> (i32, i32) {
    %c0_i32 = arith.constant 0 : i32
    %c0_i32_0 = arith.constant 0 : i32
    %c0_i32_1 = arith.constant 0 : i32
    return %c0_i32, %c0_i32_0 : i32, i32
  }
  func.func @transform_7(%arg0: i32, %arg1: i32) -> (i32, i32) {
    %c0_i32 = arith.constant 0 : i32
    %c0_i32_0 = arith.constant 0 : i32
    %c0_i32_1 = arith.constant 0 : i32
    return %c0_i32, %c0_i32_0 : i32, i32
  }
  func.func @transform_8(%arg0: i32, %arg1: i32) -> (i32, i32) {
    %c0_i32 = arith.constant 0 : i32
    %c0_i32_0 = arith.constant 0 : i32
    %c0_i32_1 = arith.constant 0 : i32
    return %c0_i32, %c0_i32_0 : i32, i32
  }
  func.func @transform_9(%arg0: i32, %arg1: i32) -> (i32, i32) {
    %c0_i32 = arith.constant 0 : i32
    %c0_i32_0 = arith.constant 0 : i32
    %c0_i32_1 = arith.constant 0 : i32
    return %c0_i32, %c0_i32_0 : i32, i32
  }
  func.func @transform_10(%arg0: i32, %arg1: i32) -> (i32, i32) {
    %c0_i32 = arith.constant 0 : i32
    %c0_i32_0 = arith.constant 0 : i32
    %c0_i32_1 = arith.constant 0 : i32
    return %c0_i32, %c0_i32_0 : i32, i32
  }
  func.func @transform_11(%arg0: i32, %arg1: i32) -> (i32, i32, i32, i32) {
    %c0_i32 = arith.constant 0 : i32
    %c0_i32_0 = arith.constant 0 : i32
    %c0_i32_1 = arith.constant 0 : i32
    return %arg0, %arg1, %c0_i32, %c0_i32_0 : i32, i32, i32, i32
  }
}

</mosaic_0001>

<bundles_post_ra>
// kernel: tpu_custom_call.1
= control target key start
LH: loop header
LB: loop body
LE: loop exit
PB: predicated region body
PF: predicated region fallthrough
CT: control target
= control target key end

     0   :  { %s5981_s0 = inlined_call_operand.hbm [shape: f32[2,16,16,128], index: 0, kind: input, shape index: {}]   ;;  %s5982_s1 = inlined_call_operand.hbm [shape: f32[2,2,2,16,128], index: 1, kind: input, shape index: {}]   ;;  %s5983_s2 = inlined_call_operand.vmem [shape: bf16[128,32], index: 2, kind: input, shape index: {}]   ;;  %s5984_s3 = inlined_call_operand.vmem [shape: f32[1,32], index: 3, kind: input, shape index: {}]   ;;  %s5985_s4 = inlined_call_operand.vmem [shape: f32[1,32], index: 4, kind: input, shape index: {}]   ;;  %s5986_s5 = inlined_call_operand.hbm [shape: bf16[9,32,32], index: 5, kind: input, shape index: {}]   ;;  %s5987_s6 = inlined_call_operand.vmem [shape: f32[1,32], index: 6, kind: input, shape index: {}]   ;;  %s5988_s7 = inlined_call_operand.vmem [shape: f32[1,32], index: 7, kind: input, shape index: {}]   ;;  %s5989_s8 = inlined_call_operand.vmem [shape: bf16[32,128], index: 8, kind: input, shape index: {}]   ;;  %s5990_s9 = inlined_call_operand.vmem [shape: f32[1,128], index: 9, kind: input, shape index: {}]   ;;  %s5991_s10 = inlined_call_operand.vmem [shape: f32[1,128], index: 10, kind: input, shape index: {}]   ;;  %s5992_s11 = inlined_call_operand.hbm [shape: f32[2,16,16,128], index: 11, kind: output, shape index: {}]  }
   0x1   :  { %6004 = sst [smem:[#allocation21_spill]] %s5981_s0 }
   0x2   :  { %6005 = sst [smem:[#allocation22_spill]] %s5986_s5 }
   0x3   :  { %6006 = sst [smem:[#allocation23_spill]] %s5987_s6 }
   0x4   :  { %6007 = sst [smem:[#allocation24_spill]] %s5988_s7 }
   0x5   :  { %6008 = sst [smem:[#allocation25_spill]] %s5989_s8 }
   0x6   :  { %6009 = sst [smem:[#allocation26_spill]] %s5990_s9 }
   0x7   :  { %6010 = sst [smem:[#allocation27_spill]] %s5991_s10 }
   0x8   :  { %6011 = sst [smem:[#allocation28_spill]] %s5992_s11 }
   0x9   :  { %16 = vsyncpa [#allocation4], 0 }
   0xa   :  { %18 = vsyncpa [#allocation4 + $0x1], 0 }
   0xb   :  { %19 = vsyncpa [#allocation7], 0 }
   0xc   :  { %21 = vsyncpa [#allocation7 + $0x1], 0 }
   0xd   :  { %22 = vsyncpa [#allocation5], 0 }
   0xe   :  { %24 = vsyncpa [#allocation5 + $0x1], 0  ;;  %s4908_s17 = smov 0   ;;  %s4910_s18 = smov 0  }
   0xf   :  { %s4912_s19 = smov 0   ;;  %s4914_s20 = smov 0  }
  0x10   :  { %s4916_s21 = smov 0   ;;  %s4918_s22 = smov 0  }
  0x11   :  { %s4920_s23 = smov 0   ;;  %s4922_s24 = smov 0  }
  0x12 LB: > { %6012 = sst [smem:[#allocation14_spill]] %s4807_s17  ;;  %s4949_s25 = sadd.s32 4294967295, %s4835_s24   ;;  %s4835_s24 = sphi %s4922_s24, %s30_s24   ;;  %s4831_s23 = sphi %s4920_s23, %s6056_s23   ;;  %s4827_s22 = sphi %s4918_s22, %s6055_s22   ;;  %s4823_s21 = sphi %s4916_s21, %s6054_s21   ;;  %s4819_s20 = sphi %s4914_s20, %s6053_s20   ;;  %s4815_s19 = sphi %s4912_s19, %s6052_s19   ;;  %s4811_s18 = sphi %s4910_s18, %s6051_s18   ;;  %s4807_s17 = sphi %s4908_s17, %s6050_s17  }
  0x13   : > { %6013 = sst [smem:[#allocation15_spill]] %s4823_s21  ;;  %s3845_s26 = sadd.s32 4294967294, %s4835_s24  }
  0x14   : > { %p64_p0 = scmp.ne.s32.totalorder %s4811_s18, %s4807_s17  ;;  %p5996_p1 = scmp.eq.s32.totalorder %s4949_s25, 0 }
  0x15   : > { %p313_p3 = scmp.eq.s32.totalorder %s3845_s26, 3  ;;  %p3846_p5 = scmp.ge.s32.totalorder %s4835_s24, 1 }
  0x16   : > { %p4958_p4 = por %p5996_p1, %p64_p0  ;;  %p320_p7 = scmp.lt.s32.totalorder %s4835_s24, 5 }
  0x17   : > { %p4963_p6 = por %p313_p3, %p64_p0  ;;  %s4837_s30 = smov [#allocation8]  }
  0x18   : > { %s6014_s27 = scalar_select %p4958_p4, 1, 0 }
  0x19   : > { %s6015_s28 = scalar_select %p4963_p6, 1, 0 }
  0x1a   : > { %p4968_p8 = pnand %p3846_p5, %p320_p7  ;;  %s341_s12 = sshll.u32 %s4837_s30, 4  ;;  %s342_s12 = int_to_ptr.vmem [resolvable:$true] %s341_s12 }
  0x1b   : > { %6016 = sst [smem:[#allocation16_spill]] %s6015_s28  ;;  %s6019_s5 = sld [smem:[#allocation22_spill]] }
  0x1c   : > { %s6017_s29 = scalar_select %p4968_p8, 1, 0 }
  0x1d   : > { %p4514_p9 = pneg %p4968_p8 }
  0x1f   : > { %p4976_p10 = pnand %p4514_p9, %p5996_p1 }
  0x21   : > { %s4641_s16 = scalar_lea.hbm %s6019_s5, 2304  ;;  %p4643_p12 = pneg %p4976_p10 }
  0x22   : > { %p4642_p11 = scmp.ne.s32.totalorder %s6019_s5, %s4641_s16  ;;  %p4648_p3 = scmp.lt.u32.totalorder %s4641_s16, %s6019_s5 }
  0x24   : > { %p4644_p13 = pnand %p4643_p12, %p4642_p11 }
  0x26   : > { %p4645_p0 = pneg %p4644_p13 }
  0x28   : > { %p4650_p5 = pnand %p4648_p3, %p4645_p0 }
  0x2a   : > { %4653 = shalt.err (!%p4650_p5)
}
  0x2b   : > { %s4654_s11 = scalar_lea.vmem %s342_s12, 2304  ;;  %p4662_p2 = scmp.lt.s32.totalorder %s342_s12, %s342_s12 }
  0x2c   : > { %p4655_p7 = scmp.ne.s32.totalorder %s342_s12, %s4654_s11  ;;  %p4663_p6 = scmp.lt.s32.totalorder %s4654_s11, %s4654_s11 }
  0x2e   : > { %p4657_p9 = pnand %p4655_p7, %p4643_p12  ;;  %p4664_p4 = por %p4663_p6, %p4662_p2 }
  0x30   : > { %p4658_p1 = pneg %p4657_p9 }
  0x32   : > { %p4665_p8 = pnand %p4664_p4, %p4658_p1 }
  0x34   : > { %4668 = shalt.err (!%p4665_p8)
}
  0x35   : > { %s4838_s28 = smov 64   ;;  %s4839_s17 = smov 4  }
  0x36   : > { %4517 = dma.hbm_to_vmem [thread:$0]  (!%p4976_p10), %s6019_s5, 2304, %s342_s12, [#allocation7], %s4838_s28, %s4838_s28, %s4839_s17  }
  0x37   : > { %s39_s11 = sadd.s32 1, %s4827_s22  ;;  %s42_s16 = sadd.s32 1, %s4831_s23 }
  0x38   : > { %p40_p1 = scmp.ge.s32.totalorder %s39_s11, 2  ;;  %s51_s26 = sadd.s32 1, %s4815_s19 }
  0x39   : > { %p58_p2 = scmp.ne.s32.totalorder %s4815_s19, %s4811_s18  ;;  %p59_p4 = scmp.eq.s32.totalorder %s4835_s24, 0 }
  0x3a   : > { %s6058_s11 = smov (%p40_p1, %s39_s11), 0  ;;  %s6060_s16 = smov (!%p40_p1, %s42_s16), %s4831_s23 }
  0x3b   : > { %6020 = sst [smem:[#allocation17_spill]] %s6058_s11  ;;  %s47_s30 = ssub.s32 %s4827_s22, %s6058_s11 }
  0x3c   : > { %p44_p6 = scmp.ge.s32.totalorder %s6060_s16, 2  ;;  %p6021_p8 = scmp.eq.s32.totalorder %s4949_s25, 3 }
  0x3d   : > { %p5013_p10 = por %p59_p4, %p58_p2  ;;  %p4530_p12 = scmp.lt.s32.totalorder %s4835_s24, 4 }
  0x3e   : > { %p5009_p11 = por %p6021_p8, %p58_p2  ;;  %s6062_s16 = smov (%p44_p6, %s6060_s16), 0 }
  0x3f   : > { %6025 = sst [smem:[#allocation19_spill]] %s6062_s16  ;;  %s5021_s28 = sand.u32 1, %s4815_s19  }
  0x40   : > { %s6022_s13 = scalar_select %p5009_p11, 1, 0 }
  0x41   : > { %s3996_s17 = sshll.u32 %s4827_s22, 4  ;;  %s46_s14 = ssub.s32 %s4831_s23, %s6062_s16 }
  0x42   : > { %6023 = sst [smem:[#allocation18_spill]] %s6022_s13  ;;  %s48_s15 = sor.u32 %s47_s30, %s46_s14 }
  0x43   : > { %s3849_s5 = sshll.u32 %s5021_s28, 7  ;;  %p49_p13 = scmp.eq.s32.totalorder %s48_s15, 0 }
  0x44   : > { %s3852_s11 = sshll.u32 %s4831_s23, 5  ;;  %s374_s13 = scalar_lea.vmem [#allocation3], %s3849_s5 }
  0x45   : > { %s384_s21 = sshll.u32 %s374_s13, 4  ;;  %s381_s9 = sadd.s32 %s3996_s17, %s3852_s11  ;;  %s5031_s21 = int_to_ptr.vmem [resolvable:$true] %s384_s21 }
  0x46   : > { %s5029_s10 = scalar_select %p49_p13, %s4815_s19, %s51_s26  }
  0x47   : > { %s3853_s7 = sshll.u32 %s381_s9, 7  ;;  %p5037_p0 = pnand %p4530_p12, %p5013_p10 }
  0x48   : > { %6026 = sst [smem:[#allocation20_spill]] %s5029_s10  ;;  %s6028_s0 = sld [smem:[#allocation21_spill]] }
  0x49   : > { %s371_s5 = scalar_lea.sflag [#allocation4], %s5021_s28  ;;  %p4671_p5 = pneg %p5037_p0 }
  0x4e   : > { %s5044_s30 = scalar_lea.hbm %s6028_s0, %s3853_s7  ;;  %s4674_s8 = scalar_lea.hbm %s6028_s0, 8192 }
  0x4f   : > { %s4669_s11 = scalar_lea.hbm %s5044_s30, 2048  ;;  %p4675_p1 = scmp.lt.u32.totalorder %s5044_s30, %s6028_s0 }
  0x50   : > { %p4670_p3 = scmp.ne.s32.totalorder %s5044_s30, %s4669_s11  ;;  %p4676_p2 = scmp.lt.u32.totalorder %s4674_s8, %s4669_s11 }
  0x51   : > { %p4678_p6 = scmp.lt.u32.totalorder %s4669_s11, %s5044_s30 }
  0x52   : > { %p4672_p7 = pnand %p4671_p5, %p4670_p3  ;;  %p4677_p4 = por %p4676_p2, %p4675_p1 }
  0x54   : > { %p4673_p9 = pneg %p4672_p7  ;;  %p4679_p8 = por %p4678_p6, %p4677_p4 }
  0x56   : > { %p4680_p10 = pnand %p4679_p8, %p4673_p9 }
  0x58   : > { %4683 = shalt.err (!%p4680_p10)
}
  0x59   : > { %s4684_s13 = scalar_lea.vmem %s5031_s21, 2048  ;;  %s4840_s12 = smov [#allocation3]  }
  0x5a   : > { %p4685_p12 = scmp.ne.s32.totalorder %s5031_s21, %s4684_s13  ;;  %s4689_s17 = sshll.u32 %s4840_s12, 4  ;;  %s4690_s17 = int_to_ptr.vmem [resolvable:$false] %s4689_s17 }
  0x5b   : > { %s4691_s14 = scalar_lea.vmem %s4690_s17, 4096  ;;  %p4692_p7 = scmp.lt.s32.totalorder %s5031_s21, %s4690_s17 }
  0x5c   : > { %p4687_p13 = pnand %p4685_p12, %p4671_p5  ;;  %p4693_p1 = scmp.lt.s32.totalorder %s4691_s14, %s4684_s13 }
  0x5e   : > { %p4688_p3 = pneg %p4687_p13  ;;  %p4694_p2 = por %p4693_p1, %p4692_p7 }
  0x60   : > { %p4695_p4 = pnand %p4694_p2, %p4688_p3 }
  0x62   : > { %4698 = shalt.err (!%p4695_p4)
}
  0x63   : > { %s4841_s15 = smov 128   ;;  %s4842_s11 = smov 8  }
  0x64   : > { %4521 = dma.hbm_to_vmem [thread:$0]  (!%p5037_p0), %s5044_s30, 2048, %s5031_s21, %s371_s5, %s4841_s15, %s4841_s15, %s4842_s11  }
  0x65   : > { %s394_s9 = sand.u32 1, %s4835_s24   ;;  %s3854_s26 = sshll.u32 %s5021_s28, 5 }
  0x66   : > { %s3855_s8 = sshll.u32 %s4827_s22, 2  ;;  %s3856_s16 = sshll.u32 %s4831_s23, 3 }
  0x67   : > { %s404_s7 = sadd.s32 %s3856_s16, %s3855_s8  ;;  %s398_s13 = scalar_lea.vmem [#allocation6], %s3854_s26 }
  0x68   : > { %s407_s12 = sshll.u32 %s398_s13, 4  ;;  %s3857_s17 = sshll.u32 %s404_s7, 7  ;;  %s5081_s12 = int_to_ptr.vmem [resolvable:$true] %s407_s12 }
  0x69   : > { %s5086_s10 = scalar_lea.hbm %s5982_s1, %s3857_s17  ;;  %s5088_s21 = scalar_lea.sflag [#allocation7], %s394_s9 }
  0x6a   : > { %s4699_s28 = scalar_lea.hbm %s5086_s10, 512  ;;  %s4704_s26 = scalar_lea.hbm %s5982_s1, 2048 }
  0x6b   : > { %p4700_p9 = scmp.ne.s32.totalorder %s5086_s10, %s4699_s28  ;;  %p4705_p10 = scmp.lt.u32.totalorder %s5086_s10, %s5982_s1 }
  0x6c   : > { %p4706_p12 = scmp.lt.u32.totalorder %s4704_s26, %s4699_s28  ;;  %p4708_p3 = scmp.lt.u32.totalorder %s4699_s28, %s5086_s10 }
  0x6d   : > { %p4702_p6 = pnand %p4700_p9, %p4671_p5 }
  0x6e   : > { %p4707_p13 = por %p4706_p12, %p4705_p10 }
  0x6f   : > { %p4703_p8 = pneg %p4702_p6 }
  0x70   : > { %p4709_p7 = por %p4708_p3, %p4707_p13 }
  0x72   : > { %p4710_p1 = pnand %p4709_p7, %p4703_p8 }
  0x74   : > { %4713 = shalt.err (!%p4710_p1)
}
  0x75   : > { %s4714_s9 = scalar_lea.vmem %s5081_s12, 512  ;;  %s4843_s16 = smov [#allocation6]  }
  0x76   : > { %p4715_p2 = scmp.ne.s32.totalorder %s5081_s12, %s4714_s9  ;;  %s4719_s7 = sshll.u32 %s4843_s16, 4  ;;  %s4720_s7 = int_to_ptr.vmem [resolvable:$false] %s4719_s7 }
  0x77   : > { %s4721_s13 = scalar_lea.vmem %s4720_s7, 1024  ;;  %p4722_p6 = scmp.lt.s32.totalorder %s5081_s12, %s4720_s7 }
  0x78   : > { %p4717_p4 = pnand %p4715_p2, %p4671_p5  ;;  %p4723_p10 = scmp.lt.s32.totalorder %s4721_s13, %s4714_s9 }
  0x7a   : > { %p4718_p9 = pneg %p4717_p4  ;;  %p4724_p12 = por %p4723_p10, %p4722_p6 }
  0x7c   : > { %p4725_p13 = pnand %p4724_p12, %p4718_p9 }
  0x7e   : > { %4728 = shalt.err (!%p4725_p13)
}
  0x7f   : > { %4524 = dma.hbm_to_vmem [thread:$0]  (!%p5037_p0), %s5086_s10, 512, %s5081_s12, %s5088_s21, %s4841_s15, %s4841_s15, %s4842_s11  }
  0x80   : > { %p6029_p5 = scmp.ne.s32.totalorder %s6017_s29, 0 }
  0x81   : > { %s5120_s17 = sand.u32 (!%p6029_p5), 1, %s4811_s18   ;;  %p6030_p8 = scmp.ne.s32.totalorder (!%p6029_p5), %s6014_s27, 0 }
  0x82   : > { %419 = sbr.rel (%p6029_p5) target bundleno = 1103 (0x44f), region = 64  ;;  %s3859_s14 = sshll.u32 (!%p6029_p5), %s5120_s17, 7 }
  0x83   : > { %s422_s28 = scalar_lea.sflag (!%p6029_p5), [#allocation4], %s5120_s17  ;;  %s5126_s6 = scalar_lea.vmem (!%p6029_p5), [#allocation3], %s3859_s14 }
  0x89   : > { %4790 = dma.done.wait (%p6030_p8), %s422_s28, 2048  }
  0x8a   : > { %4792 = vsyncadd (%p6030_p8), %s422_s28, 4294965248  ;;  %s430_s10 = sand.u32 1, %s4949_s25   ;;  %s3860_s29 = sshll.u32 %s5120_s17, 5 }
  0x8b   : > { %s431_s15 = scalar_lea.sflag [#allocation7], %s430_s10  ;;  %s5134_s11 = scalar_lea.vmem [#allocation6], %s3860_s29 }
  0x8c   : > { %4794 = dma.done.wait (%p6030_p8), %s431_s15, 512  }
  0x8d   : > { %4796 = vsyncadd (%p6030_p8), %s431_s15, 4294966784  ;;  %p6031_p0 = scmp.eq.s32.totalorder %s4949_s25, 0 }
  0x8f   : > { %4798 = dma.done.wait (%p6031_p0), [#allocation7], 2304   ;;  %p6032_p3 = pmov %p6031_p0 }
  0x90   : > { %vm496_vm0 = vcmask 258052   ;;  %vm497_vm1 = vsmask.f32 4352  ;;  %v499_v1 = vld [vmem:[#allocation2 + $0x8] sm:$0x10]  ;;  %v4605_v8 = vld [vmem:[%s5983_s2] sm:$0xff]  }
  0x91   : > { %4800 = vsyncadd (%p6032_p3), [#allocation7], 4294964992  ;;  %v502_v2 = vld [vmem:[#allocation2 + $0x18] sm:$0x10]  ;;  %v505_v3 = vld [vmem:[#allocation2 + $0x28] sm:$0x10]  ;;  %4124 = vmatprep.subr.bf16.mxu0 %v4605_v8 }
  0x92   : > { %vm5145_vm2 = vmand %vm496_vm0, %vm497_vm1  ;;  %v508_v7 = vld [vmem:[#allocation2 + $0x38] sm:$0x10]  ;;  %v511_v10 = vld [vmem:[#allocation2 + $0x48] sm:$0x10]  ;;  %4125 = vmatpush3.bf16.msra.mxu0 %v4605_v8  ;;  %vm485_vm3 = vcmask 257024   ;;  %vm529_vm4 = vcmask 261124  }
  0x93   : > { %v500_v4 = vsel %vm5145_vm2, 0, %v499_v1  ;;  %v503_v5 = vsel %vm5145_vm2, 0, %v502_v2  ;;  %v506_v6 = vsel %vm5145_vm2, 0, %v505_v3  ;;  %v509_v9 = vsel %vm5145_vm2, 0, %v508_v7  ;;  %v514_v11 = vld [vmem:[#allocation2 + $0x58] sm:$0x10] }
  0x94   : > { %501 = vst [vmem:[#allocation2 + $0x8] sm:$0x10] %v500_v4  ;;  %504 = vst [vmem:[#allocation2 + $0x18] sm:$0x10] %v503_v5  ;;  %v4606_v12 = vld [vmem:[%s5983_s2 + $0x8] sm:$0xff]   ;;  %v512_v13 = vsel %vm5145_vm2, 0, %v511_v10 }
  0x95   : > { %507 = vst [vmem:[#allocation2 + $0x28] sm:$0x10] %v506_v6  ;;  %510 = vst [vmem:[#allocation2 + $0x38] sm:$0x10] %v509_v9  ;;  %v515_v14 = vsel %vm5145_vm2, 0, %v514_v11  ;;  %4126 = vmatprep.subr.bf16.mxu0 %v4606_v12  ;;  %v4607_v23 = vld [vmem:[%s5983_s2 + $0x10] sm:$0xff]  }
  0x96   : > { %v517_v15 = vld [vmem:[#allocation2 + $0x68] sm:$0x10]  ;;  %v520_v16 = vld [vmem:[#allocation2 + $0x78] sm:$0x10]  ;;  %513 = vst [vmem:[#allocation2 + $0x48] sm:$0x10] %v512_v13  ;;  %4127 = vmatpush3.bf16.msra.mxu0 %v4606_v12 }
  0x97   : > { %516 = vst [vmem:[#allocation2 + $0x58] sm:$0x10] %v515_v14  ;;  %v518_v17 = vsel %vm5145_vm2, 0, %v517_v15  ;;  %v521_v18 = vsel %vm5145_vm2, 0, %v520_v16  ;;  %v523_v19 = vld [vmem:[#allocation2 + $0x88] sm:$0x10]  ;;  %4128 = vmatprep.subr.bf16.mxu0 %v4607_v23 }
  0x98   : > { %v526_v20 = vld [vmem:[#allocation2 + $0x98] sm:$0x10]  ;;  %519 = vst [vmem:[#allocation2 + $0x68] sm:$0x10] %v518_v17  ;;  %522 = vst [vmem:[#allocation2 + $0x78] sm:$0x10] %v521_v18 }
  0x99   : > { %v524_v21 = vsel %vm5145_vm2, 0, %v523_v19  ;;  %v527_v22 = vsel %vm5145_vm2, 0, %v526_v20  ;;  %v4608_v24 = vld [vmem:[%s5983_s2 + $0x18] sm:$0xff]   ;;  %v535_v25 = vld [vmem:[%s5126_s6] sm:$0xff]  ;;  %v536_v27 = vld [vmem:[%s5126_s6 + $0x8] sm:$0xff]  ;;  %v4844_v3 = vmov 0  }
  0x9a   : > { %525 = vst [vmem:[#allocation2 + $0x88] sm:$0x10] %v524_v21  ;;  %528 = vst [vmem:[#allocation2 + $0x98] sm:$0x10] %v527_v22  ;;  %4129 = vmatpush3.bf16.msra.mxu0 %v4607_v23  ;;  %v4609_v26 = vld [vmem:[%s5983_s2 + $0x20] sm:$0xff]   ;;  %v551_v28 = vpack.c.bf16 %v536_v27, %v535_v25  ;;  %v4610_v29 = vld [vmem:[%s5983_s2 + $0x28] sm:$0xff]  }
  0x9b   : > { %4130 = vmatprep.subr.bf16.mxu0 %v4608_v24  ;;  %v4611_v30 = vld [vmem:[%s5983_s2 + $0x30] sm:$0xff]   ;;  %v4612_v31 = vld [vmem:[%s5983_s2 + $0x38] sm:$0xff]   ;;  %v4613_v34 = vld [vmem:[%s5983_s2] sm:$0xff]   ;;  %486 = vst.msk [vmem:[#allocation2] sm:$0xf] %vm485_vm3, %v4844_v3  ;;  %s5319_s27 = scalar_lea.vmem [#allocation9], %s3859_s14 }
  0x9c   : > { %4140 = vmatprep.mubr.bf16.mxu0 %v551_v28  ;;  %v537_v32 = vld [vmem:[%s5126_s6 + $0x10] sm:$0xff]  ;;  %v538_v33 = vld [vmem:[%s5126_s6 + $0x18] sm:$0xff]  ;;  %v539_v35 = vld [vmem:[%s5126_s6 + $0x20] sm:$0xff]  ;;  %487 = vst.msk [vmem:[#allocation2 + $0x10] sm:$0xf] %vm485_vm3, %v4844_v3  ;;  %p3883_p7 = scmp.le.s32.totalorder %s4819_s20, 0 }
  0x9d   : > { %v540_v36 = vld [vmem:[%s5126_s6 + $0x28] sm:$0xff]  ;;  %v552_v37 = vpack.c.bf16 %v538_v33, %v537_v32  ;;  %v541_v40 = vld [vmem:[%s5126_s6 + $0x30] sm:$0xff]  ;;  %v542_v41 = vld [vmem:[%s5126_s6 + $0x38] sm:$0xff]  ;;  %488 = vst.msk [vmem:[#allocation2 + $0x20] sm:$0xf] %vm485_vm3, %v4844_v3 }
  0x9e   : > { %4131 = vmatpush3.bf16.msra.mxu0 %v4608_v24  ;;  %v553_v38 = vpack.c.bf16 %v540_v36, %v539_v35  ;;  %v4614_v39 = vld [vmem:[%s5983_s2 + $0x8] sm:$0xff]   ;;  %v4615_v42 = vld [vmem:[%s5983_s2 + $0x10] sm:$0xff]   ;;  %v543_v43 = vld [vmem:[%s5126_s6 + $0x40] sm:$0xff]  ;;  %v554_v45 = vpack.c.bf16 %v542_v41, %v541_v40  ;;  %489 = vst.msk [vmem:[#allocation2 + $0x30] sm:$0xf] %vm485_vm3, %v4844_v3 }
  0x9f   : > { %4132 = vmatprep.subr.bf16.mxu0 %v4609_v26  ;;  %v544_v44 = vld [vmem:[%s5126_s6 + $0x48] sm:$0xff]  ;;  %v4616_v47 = vld [vmem:[%s5983_s2 + $0x18] sm:$0xff]   ;;  %v545_v48 = vld [vmem:[%s5126_s6 + $0x50] sm:$0xff]  ;;  %490 = vst.msk [vmem:[#allocation2 + $0x40] sm:$0xf] %vm485_vm3, %v4844_v3 }
  0xa0   : > { %v555_v46 = vpack.c.bf16 %v544_v44, %v543_v43  ;;  %v546_v49 = vld [vmem:[%s5126_s6 + $0x58] sm:$0xff]  ;;  %v4617_v50 = vld [vmem:[%s5983_s2 + $0x20] sm:$0xff]   ;;  %v548_v52 = vld [vmem:[%s5126_s6 + $0x68] sm:$0xff]  ;;  %491 = vst.msk [vmem:[#allocation2 + $0x50] sm:$0xf] %vm485_vm3, %v4844_v3 }
  0xa1   : > { %v547_v51 = vld [vmem:[%s5126_s6 + $0x60] sm:$0xff]  ;;  %v556_v53 = vpack.c.bf16 %v546_v49, %v545_v48  ;;  %v4618_v55 = vld [vmem:[%s5983_s2 + $0x28] sm:$0xff]   ;;  %v549_v56 = vld [vmem:[%s5126_s6 + $0x70] sm:$0xff]  ;;  %492 = vst.msk [vmem:[#allocation2 + $0x60] sm:$0xf] %vm485_vm3, %v4844_v3 }
  0xa2   : > { %4133 = vmatpush3.bf16.msra.mxu0 %v4609_v26  ;;  %v557_v54 = vpack.c.bf16 %v548_v52, %v547_v51  ;;  %v550_v57 = vld [vmem:[%s5126_s6 + $0x78] sm:$0xff]  ;;  %v4619_v58 = vld [vmem:[%s5983_s2 + $0x30] sm:$0xff]   ;;  %v831_v59 = vld [vmem:[%s5134_s11] sm:$0xff]  ;;  %493 = vst.msk [vmem:[#allocation2 + $0x70] sm:$0xf] %vm485_vm3, %v4844_v3 }
  0xa3   : > { %4134 = vmatprep.subr.bf16.mxu0 %v4610_v29  ;;  %v832_v60 = vld [vmem:[%s5134_s11 + $0x8] sm:$0xff]  ;;  %v558_v61 = vpack.c.bf16 %v550_v57, %v549_v56  ;;  %v4620_v63 = vld [vmem:[%s5983_s2 + $0x38] sm:$0xff]   ;;  %v833_v0 = vld [vmem:[%s5134_s11 + $0x10] sm:$0xff]  ;;  %494 = vst.msk [vmem:[#allocation2 + $0x80] sm:$0xf] %vm485_vm3, %v4844_v3 }
  0xa4   : > { %v835_v62 = vpack.c.bf16 %v832_v60, %v831_v59  ;;  %v834_v1 = vld [vmem:[%s5134_s11 + $0x18] sm:$0xff]  ;;  %495 = vst.msk [vmem:[#allocation2 + $0x90] sm:$0xf] %vm485_vm3, %v4844_v3  ;;  %531 = vst.msk [vmem:[#allocation2 + $0x8] sm:$0xf] %vm485_vm3, %v4844_v3 }
  0xa5   : > { %v836_v2 = vpack.c.bf16 %v834_v1, %v833_v0  ;;  %530 = vst.msk [vmem:[#allocation2] sm:$0xf0] %vm529_vm4, %v4844_v3  ;;  %533 = vst.msk [vmem:[#allocation2 + $0x90] sm:$0xf0] %vm529_vm4, %v4844_v3  ;;  %v5254_v4 = vld [vmem:[%s5984_s3] ss:$0 sm:$0xff] }
  0xa6   : > { %4135 = vmatpush3.bf16.msra.mxu0 %v4610_v29  ;;  %534 = vst.msk [vmem:[#allocation2 + $0x98] sm:$0xf] %vm485_vm3, %v4844_v3  ;;  %v5259_v6 = vld [vmem:[%s5985_s4] ss:$0 sm:$0xff] }
  0xa7   : > { %4136 = vmatprep.subr.bf16.mxu0 %v4611_v30 }
  0xaa   : > { %4137 = vmatpush3.bf16.msra.mxu0 %v4611_v30 }
  0xab   : > { %4138 = vmatprep.subr.bf16.mxu0 %v4612_v31 }
  0xae   : > { %4139 = vmatpush3.bf16.msra.mxu0 %v4612_v31 }
  0xaf   : > { %4156 = vmatprep.subr.bf16.mxu0 %v4613_v34 }
  0xb1   : > { %4141 = vmatmul.mubr.bf16.vlgmr.msra.gmra.mrb[0].mxu0 %v552_v37 }
  0xb2   : > { %4157 = vmatpush3.bf16.msra.mxu0 %v4613_v34  ;;  %4144 = vmatprep.mubr.bf16.mxu0 %v553_v38 }
  0xb3   : > { %4158 = vmatprep.subr.bf16.mxu0 %v4614_v39 }
  0xb6   : > { %4159 = vmatpush3.bf16.msra.mxu0 %v4614_v39 }
  0xb7   : > { %4160 = vmatprep.subr.bf16.mxu0 %v4615_v42 }
  0xb9   : > { %4145 = vmatmul.mubr.bf16.gmra.mrb[4].mxu0 %v554_v45 }
  0xba   : > { %4161 = vmatpush3.bf16.msra.mxu0 %v4615_v42  ;;  %4148 = vmatprep.mubr.bf16.mxu0 %v555_v46 }
  0xbb   : > { %4162 = vmatprep.subr.bf16.mxu0 %v4616_v47 }
  0xbe   : > { %4163 = vmatpush3.bf16.msra.mxu0 %v4616_v47 }
  0xbf   : > { %4164 = vmatprep.subr.bf16.mxu0 %v4617_v50 }
  0xc1   : > { %4149 = vmatmul.mubr.bf16.gmra.mrb[8].mxu0 %v556_v53 }
  0xc2   : > { %4165 = vmatpush3.bf16.msra.mxu0 %v4617_v50  ;;  %4152 = vmatprep.mubr.bf16.mxu0 %v557_v54 }
  0xc3   : > { %4166 = vmatprep.subr.bf16.mxu0 %v4618_v55 }
  0xc6   : > { %4167 = vmatpush3.bf16.msra.mxu0 %v4618_v55 }
  0xc7   : > { %4168 = vmatprep.subr.bf16.mxu0 %v4619_v58 }
  0xc9   : > { %4153 = vmatmul.mubr.bf16.gmra.mrb[12].mxu0 %v558_v61 }
  0xca   : > { %4169 = vmatpush3.bf16.msra.mxu0 %v4619_v58  ;;  %4172 = vmatprep.mubr.bf16.mxu0 %v835_v62 }
  0xcb   : > { %4170 = vmatprep.subr.bf16.mxu0 %v4620_v63 }
  0xce   : > { %4171 = vmatpush3.bf16.msra.mxu0 %v4620_v63 }
  0xd1   : > { %4173 = vmatmul.mubr.bf16.vlgmr.msra.gmra.mrb[16].mxu0 %v836_v2 }
 0x184   : > { %v4142_v5 = vpop.f32.mrb[0].mxu0 }
 0x185   : > { %v729_v7 = vmul.f32 %v4142_v5, %v5254_v4  ;;  %v657_v8 = vpop.f32.mrb[1].mxu0 }
 0x186   : > { %v727_v9 = vmul.f32 %v5254_v4, %v657_v8  ;;  %v4143_v10 = vpop.f32.mrb[2].mxu0 }
 0x187   : > { %v752_v11 = vadd.f32 %v5259_v6, %v729_v7  ;;  %v730_v12 = vmul.f32 %v4143_v10, %v5254_v4  ;;  %v660_v13 = vpop.f32.mrb[3].mxu0 }
 0x188   : > { %v750_v14 = vadd.f32 %v5259_v6, %v727_v9  ;;  %v728_v15 = vmul.f32 %v5254_v4, %v660_v13 }
 0x189   : > { %v753_v16 = vadd.f32 %v5259_v6, %v730_v12  ;;  %v768_v18 = vmax.f32 %v752_v11, 0.0 }
 0x18a   : > { %v751_v17 = vadd.f32 %v5259_v6, %v728_v15  ;;  %v766_v20 = vmax.f32 %v750_v14, 0.0 }
 0x18b   : > { %v769_v19 = vmax.f32 %v753_v16, 0.0 }
 0x18c   : > { %v767_v21 = vmax.f32 %v751_v17, 0.0  ;;  %v4146_v22 = vpop.f32.mrb[4].mxu0 }
 0x18d   : > { %v783_v23 = vpack.c.bf16 %v769_v19, %v768_v18  ;;  %v733_v24 = vmul.f32 %v4146_v22, %v5254_v4  ;;  %v673_v25 = vpop.f32.mrb[5].mxu0 }
 0x18e   : > { %v782_v26 = vpack.c.bf16 %v767_v21, %v766_v20  ;;  %v731_v27 = vmul.f32 %v5254_v4, %v673_v25  ;;  %v4147_v28 = vpop.f32.mrb[6].mxu0 }
 0x18f   : > { %v799_v29 = vrot.slane %v783_v23, 4  ;;  %v756_v30 = vadd.f32 %v5259_v6, %v733_v24  ;;  %v734_v31 = vmul.f32 %v4147_v28, %v5254_v4  ;;  %v676_v32 = vpop.f32.mrb[7].mxu0 }
 0x190   : > { %v798_v33 = vrot.slane %v782_v26, 4  ;;  %v754_v34 = vadd.f32 %v5259_v6, %v731_v27  ;;  %v732_v35 = vmul.f32 %v5254_v4, %v676_v32 }
 0x191   : > { %817 = vst.msk [vmem:[#allocation2 + $0x20] sm:$0xf0] %vm529_vm4, %v799_v29  ;;  %v757_v36 = vadd.f32 %v5259_v6, %v734_v31  ;;  %v772_v38 = vmax.f32 %v756_v30, 0.0 }
 0x192   : > { %818 = vst.msk [vmem:[#allocation2 + $0x28] sm:$0xf] %vm485_vm3, %v799_v29  ;;  %816 = vst.msk [vmem:[#allocation2 + $0x18] sm:$0xf] %vm485_vm3, %v798_v33  ;;  %v755_v37 = vadd.f32 %v5259_v6, %v732_v35  ;;  %v770_v40 = vmax.f32 %v754_v34, 0.0 }
 0x193   : > { %815 = vst.msk [vmem:[#allocation2 + $0x10] sm:$0xf0] %vm529_vm4, %v798_v33  ;;  %v773_v39 = vmax.f32 %v757_v36, 0.0 }
 0x194   : > { %v771_v41 = vmax.f32 %v755_v37, 0.0  ;;  %v4150_v42 = vpop.f32.mrb[8].mxu0 }
 0x195   : > { %v785_v43 = vpack.c.bf16 %v773_v39, %v772_v38  ;;  %v737_v44 = vmul.f32 %v4150_v42, %v5254_v4  ;;  %v689_v45 = vpop.f32.mrb[9].mxu0 }
 0x196   : > { %v784_v46 = vpack.c.bf16 %v771_v41, %v770_v40  ;;  %v735_v47 = vmul.f32 %v5254_v4, %v689_v45  ;;  %v4151_v48 = vpop.f32.mrb[10].mxu0 }
 0x197   : > { %v801_v49 = vrot.slane %v785_v43, 4  ;;  %v760_v50 = vadd.f32 %v5259_v6, %v737_v44  ;;  %v738_v51 = vmul.f32 %v4151_v48, %v5254_v4  ;;  %v692_v52 = vpop.f32.mrb[11].mxu0 }
 0x198   : > { %v800_v53 = vrot.slane %v784_v46, 4  ;;  %v758_v54 = vadd.f32 %v5259_v6, %v735_v47  ;;  %v736_v55 = vmul.f32 %v5254_v4, %v692_v52 }
 0x199   : > { %821 = vst.msk [vmem:[#allocation2 + $0x40] sm:$0xf0] %vm529_vm4, %v801_v49  ;;  %v761_v56 = vadd.f32 %v5259_v6, %v738_v51  ;;  %v776_v58 = vmax.f32 %v760_v50, 0.0 }
 0x19a   : > { %822 = vst.msk [vmem:[#allocation2 + $0x48] sm:$0xf] %vm485_vm3, %v801_v49  ;;  %820 = vst.msk [vmem:[#allocation2 + $0x38] sm:$0xf] %vm485_vm3, %v800_v53  ;;  %v759_v57 = vadd.f32 %v5259_v6, %v736_v55  ;;  %v774_v60 = vmax.f32 %v758_v54, 0.0 }
 0x19b   : > { %819 = vst.msk [vmem:[#allocation2 + $0x30] sm:$0xf0] %vm529_vm4, %v800_v53  ;;  %v777_v59 = vmax.f32 %v761_v56, 0.0 }
 0x19c   : > { %v775_v61 = vmax.f32 %v759_v57, 0.0  ;;  %v4154_v62 = vpop.f32.mrb[12].mxu0 }
 0x19d   : > { %v787_v63 = vpack.c.bf16 %v777_v59, %v776_v58  ;;  %v741_v0 = vmul.f32 %v4154_v62, %v5254_v4  ;;  %v705_v1 = vpop.f32.mrb[13].mxu0 }
 0x19e   : > { %v786_v2 = vpack.c.bf16 %v775_v61, %v774_v60  ;;  %v739_v3 = vmul.f32 %v5254_v4, %v705_v1  ;;  %v4155_v5 = vpop.f32.mrb[14].mxu0 }
 0x19f   : > { %v803_v7 = vrot.slane %v787_v63, 4  ;;  %v764_v8 = vadd.f32 %v5259_v6, %v741_v0  ;;  %v742_v9 = vmul.f32 %v4155_v5, %v5254_v4  ;;  %v708_v10 = vpop.f32.mrb[15].mxu0 }
 0x1a0   : > { %v802_v11 = vrot.slane %v786_v2, 4  ;;  %v762_v12 = vadd.f32 %v5259_v6, %v739_v3  ;;  %v740_v13 = vmul.f32 %v5254_v4, %v708_v10 }
 0x1a1   : > { %825 = vst.msk [vmem:[#allocation2 + $0x60] sm:$0xf0] %vm529_vm4, %v803_v7  ;;  %v765_v14 = vadd.f32 %v5259_v6, %v742_v9  ;;  %v780_v16 = vmax.f32 %v764_v8, 0.0 }
 0x1a2   : > { %826 = vst.msk [vmem:[#allocation2 + $0x68] sm:$0xf] %vm485_vm3, %v803_v7  ;;  %824 = vst.msk [vmem:[#allocation2 + $0x58] sm:$0xf] %vm485_vm3, %v802_v11  ;;  %v763_v15 = vadd.f32 %v5259_v6, %v740_v13  ;;  %v778_v18 = vmax.f32 %v762_v12, 0.0 }
 0x1a3   : > { %823 = vst.msk [vmem:[#allocation2 + $0x50] sm:$0xf0] %vm529_vm4, %v802_v11  ;;  %v781_v17 = vmax.f32 %v765_v14, 0.0 }
 0x1a4   : > { %v779_v19 = vmax.f32 %v763_v15, 0.0  ;;  %v4174_v20 = vpop.f32.mrb[16].mxu0 }
 0x1a5   : > { %v789_v21 = vpack.c.bf16 %v781_v17, %v780_v16  ;;  %v959_v22 = vmul.f32 %v4174_v20, %v5254_v4  ;;  %v935_v23 = vpop.f32.mrb[17].mxu0 }
 0x1a6   : > { %v788_v24 = vpack.c.bf16 %v779_v19, %v778_v18  ;;  %v957_v25 = vmul.f32 %v5254_v4, %v935_v23  ;;  %v4175_v26 = vpop.f32.mrb[18].mxu0 }
 0x1a7   : > { %v805_v27 = vrot.slane %v789_v21, 4  ;;  %v970_v28 = vadd.f32 %v5259_v6, %v959_v22  ;;  %v960_v29 = vmul.f32 %v4175_v26, %v5254_v4  ;;  %v938_v30 = vpop.f32.mrb[19].mxu0 }
 0x1a8   : > { %v804_v31 = vrot.slane %v788_v24, 4  ;;  %v968_v32 = vadd.f32 %v5259_v6, %v957_v25  ;;  %v958_v33 = vmul.f32 %v5254_v4, %v938_v30  ;;  %981 = sbr.rel (%p3883_p7) target bundleno = 436 (0x1b4), region = 80 }
 0x1a9   : > { %829 = vst.msk [vmem:[#allocation2 + $0x80] sm:$0xf0] %vm529_vm4, %v805_v27  ;;  %v971_v34 = vadd.f32 %v5259_v6, %v960_v29  ;;  %v974_v36 = vmax.f32 %v970_v28, 0.0 }
 0x1aa   : > { %830 = vst.msk [vmem:[#allocation2 + $0x88] sm:$0xf] %vm485_vm3, %v805_v27  ;;  %828 = vst.msk [vmem:[#allocation2 + $0x78] sm:$0xf] %vm485_vm3, %v804_v31  ;;  %v969_v35 = vadd.f32 %v5259_v6, %v958_v33  ;;  %v972_v38 = vmax.f32 %v968_v32, 0.0 }
 0x1ab   : > { %827 = vst.msk [vmem:[#allocation2 + $0x70] sm:$0xf0] %vm529_vm4, %v804_v31  ;;  %v975_v37 = vmax.f32 %v971_v34, 0.0 }
 0x1ac   : > { %v973_v39 = vmax.f32 %v969_v35, 0.0 }
 0x1ad   : > { %v977_v40 = vpack.c.bf16 %v975_v37, %v974_v36 }
 0x1ae   : > { %v976_v41 = vpack.c.bf16 %v973_v39, %v972_v38 }
 0x1b0   : > { %v983_v4 = vrot.slane %v976_v41, 4 }
 0x1b2   : > { %985 = vst.msk [vmem:[#allocation2] sm:$0xf0] %vm529_vm4, %v983_v4 }
 0x1b3   : > { %986 = vst.msk [vmem:[#allocation2 + $0x8] sm:$0xf] %vm485_vm3, %v983_v4 }
 0x1b4 PF: > { %p3884_p1 = scmp.ge.s32.totalorder %s4819_s20, 1 }
 0x1b5   : > { %v992_v6 = vrot.slane (!%p3884_p1), %v977_v40, 4 }
 0x1b6   : > { %990 = sbr.rel (%p3884_p1) target bundleno = 445 (0x1bd), region = 84 }
 0x1b7   : > { %994 = vst.msk [vmem:[#allocation2 + $0x90] sm:$0xf0] (!%p3884_p1), %vm529_vm4, %v992_v6 }
 0x1b8   : > { %995 = vst.msk [vmem:[#allocation2 + $0x98] sm:$0xf] (!%p3884_p1), %vm485_vm3, %v992_v6 }
 0x1bd PF: > { %v4621_v42 = vld [vmem:[#allocation8 + $0x30] sm:$0xff]   ;;  %v4622_v43 = vld [vmem:[#allocation8 + $0x38] sm:$0xff]   ;;  %v1774_v46 = vld [vmem:[#allocation2 + $0x20] sm:$0xf8]  ;;  %vm1218_vm5 = vcmask 261120   ;;  %vm1176_vm6 = vcmask 1043456  }
 0x1be   : > { %4236 = vmatprep.subr.bf16.mxu1 %v4621_v42  ;;  %v1772_v44 = vld [vmem:[#allocation2 + $0x10] sm:$0xf8]  ;;  %v5327_v45 = vld [vmem:[#allocation2 + $0x18] sm:$0xf]  ;;  %v5331_v51 = vld [vmem:[#allocation2 + $0x28] sm:$0xf] }
 0x1bf   : > { %4237 = vmatpush3.bf16.msra.mxu1 %v4621_v42  ;;  %v1789_v47 = vshrl.u32 %v1772_v44, 16  ;;  %v1792_v48 = vshll.u32 %v1772_v44, 16  ;;  %v1797_v49 = vshrl.u32 %v5327_v45, 16  ;;  %v1800_v50 = vshll.u32 %v5327_v45, 16  ;;  %v4623_v0 = vld [vmem:[#allocation8 + $0x40] sm:$0xff]   ;;  %v4624_v7 = vld [vmem:[#allocation8 + $0x48] sm:$0xff]  }
 0x1c0   : > { %4238 = vmatprep.subr.bf16.mxu1 %v4622_v43  ;;  %v1806_v52 = vshrl.u32 %v1774_v46, 16  ;;  %v1809_v53 = vshll.u32 %v1774_v46, 16  ;;  %v1814_v54 = vshrl.u32 %v5331_v51, 16  ;;  %v1817_v55 = vshll.u32 %v5331_v51, 16  ;;  %v1776_v3 = vld [vmem:[#allocation2 + $0x30] sm:$0xf8] }
 0x1c1   : > { %v1791_v56 = vrot.slane %v1789_v47, 3  ;;  %v1794_v57 = vrot.slane %v1792_v48, 4  ;;  %v1799_v58 = vrot.slane %v1797_v49, 3  ;;  %v1802_v59 = vrot.slane %v1800_v50, 4  ;;  %v5335_v5 = vld [vmem:[#allocation2 + $0x38] sm:$0xf] }
 0x1c2   : > { %v1808_v60 = vrot.slane %v1806_v52, 3  ;;  %v1811_v61 = vrot.slane %v1809_v53, 4  ;;  %v1816_v62 = vrot.slane %v1814_v54, 3  ;;  %v1819_v63 = vrot.slane %v1817_v55, 4  ;;  %v4625_v8 = vld [vmem:[#allocation8 + $0x10] sm:$0xff]   ;;  %v4626_v20 = vld [vmem:[#allocation8 + $0x18] sm:$0xff]  }
 0x1c3   : > { %4239 = vmatpush3.bf16.msra.mxu1 %v4622_v43  ;;  %v1795_v1 = vor.u32 %v1794_v57, %v1791_v56  ;;  %v1803_v2 = vor.u32 %v1802_v59, %v1799_v58  ;;  %v1823_v11 = vshrl.u32 %v1776_v3, 16  ;;  %v1826_v12 = vshll.u32 %v1776_v3, 16  ;;  %v1778_v13 = vld [vmem:[#allocation2 + $0x40] sm:$0xf8]  ;;  %v5337_v14 = vld [vmem:[#allocation2 + $0x48] sm:$0xf]  ;;  %4176 = vmatprep.subr.bf16.mxu0 %v4625_v8 }
 0x1c4   : > { %v1812_v9 = vor.u32 %v1811_v61, %v1808_v60  ;;  %v1820_v10 = vor.u32 %v1819_v63, %v1816_v62  ;;  %4256 = vmatprep.subr.bf16.mxu1 %v4623_v0  ;;  %v1831_v16 = vshrl.u32 %v5335_v5, 16  ;;  %v1834_v17 = vshll.u32 %v5335_v5, 16  ;;  %v1780_v19 = vld [vmem:[#allocation2 + $0x50] sm:$0xf8]  ;;  %v5344_v25 = vld [vmem:[#allocation2 + $0x58] sm:$0xf]  ;;  %4177 = vmatpush3.bf16.msra.mxu0 %v4625_v8 }
 0x1c5   : > { %v1804_v15 = vsel %vm497_vm1, %v1795_v1, %v1803_v2  ;;  %v1840_v18 = vshrl.u32 %v1778_v13, 16  ;;  %v1825_v22 = vrot.slane %v1823_v11, 3  ;;  %v1828_v23 = vrot.slane %v1826_v12, 4  ;;  %v1782_v30 = vld [vmem:[#allocation2 + $0x60] sm:$0xf8]  ;;  %4178 = vmatprep.subr.bf16.mxu0 %v4626_v20  ;;  %v5351_v36 = vld [vmem:[#allocation8 + $0x50] sm:$0xff]  }
 0x1c6   : > { %4240 = vmatprep.mubr.msk.bf16.mxu1 %vm1218_vm5, %v1804_v15  ;;  %v1821_v21 = vsel %vm497_vm1, %v1812_v9, %v1820_v10  ;;  %v1843_v24 = vshll.u32 %v1778_v13, 16  ;;  %v1833_v26 = vrot.slane %v1831_v16, 3  ;;  %v1836_v27 = vrot.slane %v1834_v17, 4  ;;  %v5349_v35 = vld [vmem:[#allocation2 + $0x68] sm:$0xf]  ;;  %v5354_v41 = vld [vmem:[#allocation8] sm:$0xff]  }
 0x1c7   : > { %4241 = vmatmul.mubr.msk.bf16.vlgmr.msra.gmra.mrb[0].mxu1 %vm1218_vm5, %v1821_v21  ;;  %v1842_v28 = vrot.slane %v1840_v18, 3  ;;  %v1848_v29 = vshrl.u32 %v5337_v14, 16  ;;  %v1829_v31 = vor.u32 %v1828_v23, %v1825_v22  ;;  %v1851_v33 = vshll.u32 %v5337_v14, 16  ;;  %v1784_v57 = vld [vmem:[#allocation2 + $0x70] sm:$0xf8]  ;;  %s6035_s21 = sld [smem:[#allocation25_spill]] }
 0x1c8   : > { %4257 = vmatpush3.bf16.msra.mxu1 %v4623_v0  ;;  %v1845_v32 = vrot.slane %v1843_v24, 4  ;;  %v1857_v34 = vshrl.u32 %v1780_v19, 16  ;;  %v1837_v37 = vor.u32 %v1836_v27, %v1833_v26  ;;  %v1860_v39 = vshll.u32 %v1780_v19, 16  ;;  %4179 = vmatpush3.bf16.msra.mxu0 %v4626_v20  ;;  %v5362_v58 = vld [vmem:[#allocation2 + $0x78] sm:$0xf]  ;;  %s6037_s9 = sld [smem:[#allocation23_spill]] }
 0x1c9   : > { %v1850_v38 = vrot.slane %v1848_v29, 3  ;;  %v1865_v40 = vshrl.u32 %v5344_v25, 16  ;;  %4258 = vmatprep.subr.bf16.mxu1 %v4624_v7  ;;  %v1853_v6 = vrot.slane %v1851_v33, 4  ;;  %v1868_v43 = vshll.u32 %v5344_v25, 16  ;;  %4196 = vmatprep.subr.bf16.mxu0 %v5354_v41  ;;  %v1786_v63 = vld [vmem:[#allocation2 + $0x80] sm:$0xf8] }
 0x1ca   : > { %v1846_v4 = vor.u32 %v1845_v32, %v1842_v28  ;;  %v1859_v42 = vrot.slane %v1857_v34, 3  ;;  %v1838_v44 = vsel %vm497_vm1, %v1829_v31, %v1837_v37  ;;  %v1862_v46 = vrot.slane %v1860_v39, 4  ;;  %v5366_v0 = vld [vmem:[#allocation2 + $0x88] sm:$0xf]  ;;  %v5375_v18 = vld [vmem:[#allocation2] sm:$0xf0] }
 0x1cb   : > { %v1867_v47 = vrot.slane %v1865_v40, 3  ;;  %v1874_v48 = vshrl.u32 %v1782_v30, 16  ;;  %4244 = vmatprep.mubr.msk.bf16.mxu1 %vm1218_vm5, %v1838_v44  ;;  %v1854_v49 = vor.u32 %v1853_v6, %v1850_v38  ;;  %v1870_v50 = vrot.slane %v1868_v43, 4  ;;  %v5372_v12 = vld [vmem:[#allocation2 + $0x8] sm:$0xf]  ;;  %s6038_s13 = sld [smem:[#allocation24_spill]] }
 0x1cc   : > { %v1877_v52 = vshll.u32 %v1782_v30, 16  ;;  %v1882_v53 = vshrl.u32 %v5349_v35, 16  ;;  %4259 = vmatpush3.bf16.msra.mxu1 %v4624_v7  ;;  %v1863_v54 = vor.u32 %v1862_v46, %v1859_v42  ;;  %v1885_v56 = vshll.u32 %v5349_v35, 16  ;;  %v5378_v23 = vld [vmem:[#allocation2 + $0x18] sm:$0xf]  ;;  %s6039_s11 = sld [smem:[#allocation26_spill]] }
 0x1cd   : > { %v1876_v55 = vrot.slane %v1874_v48, 3  ;;  %4276 = vmatprep.subr.bf16.mxu1 %v5351_v36  ;;  %v1855_v59 = vsel %vm497_vm1, %v1846_v4, %v1854_v49  ;;  %v1871_v60 = vor.u32 %v1870_v50, %v1867_v47  ;;  %v1891_v2 = vshrl.u32 %v1784_v57, 16  ;;  %v1153_v29 = vld [vmem:[#allocation2 + $0x10] sm:$0xf0]  ;;  %v5386_v37 = vld [vmem:[#allocation2 + $0x20] sm:$0xf0]  ;;  %s6036_s30 = smov %s6035_s21 }
 0x1ce   : > { %v1879_v61 = vrot.slane %v1877_v52, 4  ;;  %v1884_v62 = vrot.slane %v1882_v53, 3  ;;  %v1887_v1 = vrot.slane %v1885_v56, 4  ;;  %v1894_v3 = vshll.u32 %v1784_v57, 16  ;;  %v5383_v30 = vld [vmem:[#allocation2 + $0x10] sm:$0xf0] }
 0x1cf   : > { %4245 = vmatmul.mubr.msk.bf16.gmra.mrb[4].mxu1 %vm1218_vm5, %v1855_v59  ;;  %v1899_v7 = vshrl.u32 %v5362_v58, 16  ;;  %v1872_v8 = vsel %vm497_vm1, %v1863_v54, %v1871_v60  ;;  %v1902_v10 = vshll.u32 %v5362_v58, 16  ;;  %v1908_v11 = vshrl.u32 %v1786_v63, 16  ;;  %v5394_v46 = vld [vmem:[#allocation2 + $0x28] sm:$0xf]  ;;  %s6040_s25 = sld [smem:[#allocation27_spill]] }
 0x1d0   : > { %v1880_v9 = vor.u32 %v1879_v61, %v1876_v55  ;;  %4248 = vmatprep.mubr.msk.bf16.mxu1 %vm1218_vm5, %v1872_v8  ;;  %v1888_v13 = vor.u32 %v1887_v1, %v1884_v62  ;;  %v1893_v15 = vrot.slane %v1891_v2, 3  ;;  %v1896_v16 = vrot.slane %v1894_v3, 4  ;;  %v5399_v52 = vld [vmem:[#allocation2 + $0x20] sm:$0xf0]  ;;  %v4630_v53 = vld [vmem:[#allocation8 + $0x8] sm:$0xff]   ;;  %s6041_s14 = sld [smem:[#allocation15_spill]] }
 0x1d1   : > { %v1901_v17 = vrot.slane %v1899_v7, 3  ;;  %v1904_v19 = vrot.slane %v1902_v10, 4  ;;  %v1910_v20 = vrot.slane %v1908_v11, 3  ;;  %v1911_v21 = vshll.u32 %v1786_v63, 16  ;;  %v5405_v59 = vld [vmem:[#allocation2 + $0x38] sm:$0xf] }
 0x1d2   : > { %v1916_v22 = vshrl.u32 %v5366_v0, 16  ;;  %v1889_v24 = vsel %vm497_vm1, %v1880_v9, %v1888_v13  ;;  %v1897_v26 = vor.u32 %v1896_v16, %v1893_v15  ;;  %v1919_v27 = vshll.u32 %v5366_v0, 16  ;;  %v5410_v63 = vld [vmem:[#allocation2 + $0x30] sm:$0xf0]  ;;  %v5419_v7 = vld [vmem:[#allocation2 + $0x40] sm:$0xf0] }
 0x1d3   : > { %v1177_v28 = vrot.slane %v5375_v18, 4  ;;  %v1905_v31 = vor.u32 %v1904_v19, %v1901_v17  ;;  %v1913_v32 = vrot.slane %v1911_v21, 4  ;;  %v1178_v34 = vrot.slane %v5372_v12, 4  ;;  %v5412_v1 = vld [vmem:[#allocation2 + $0x30] sm:$0xf0]  ;;  %s3997_s12 = sshll.u32 %s4819_s20, 4 }
 0x1d4   : > { %v1918_v33 = vrot.slane %v1916_v22, 3  ;;  %v2106_v38 = vrot.slane %v5331_v51, 4  ;;  %v1921_v39 = vrot.slane %v1919_v27, 4  ;;  %v1483_v40 = vshrl.u32 %v5375_v18, 16  ;;  %v5421_v8 = vld [vmem:[#allocation2 + $0x48] sm:$0xf] }
 0x1d5   : > { %v1486_v4 = vshll.u32 %v5375_v18, 16  ;;  %v1906_v6 = vsel %vm497_vm1, %v1897_v26, %v1905_v31  ;;  %v1914_v42 = vor.u32 %v1913_v32, %v1910_v20  ;;  %v1179_v43 = vsel %vm1176_vm6, %v1177_v28, %v1178_v34  ;;  %v5428_v15 = vld [vmem:[#allocation2 + $0x40] sm:$0xf0]  ;;  %v5435_v21 = vld [vmem:[#allocation2 + $0x58] sm:$0xf]  ;;  %s3719_s26 = sshll.u32 %s5319_s27, 4  ;;  %s5924_s26 = int_to_ptr.vmem [resolvable:$true] %s3719_s26 }
 0x1d6   : > { %v1038_v44 = vshrl.u32 %v5378_v23, 16  ;;  %v1922_v47 = vor.u32 %v1921_v39, %v1918_v33  ;;  %4180 = vmatprep.mubr.msk.bf16.mxu0 %vm1218_vm5, %v1179_v43  ;;  %v1180_v48 = vrot.slane %v1153_v29, 4  ;;  %v1181_v49 = vrot.slane %v5378_v23, 4  ;;  %v5437_v22 = vld [vmem:[#allocation8 + $0x20] sm:$0xff]   ;;  %v5443_v27 = vld [vmem:[#allocation2 + $0x50] sm:$0xf0] }
 0x1d7   : > { %4249 = vmatmul.mubr.msk.bf16.gmra.mrb[8].mxu1 %vm1218_vm5, %v1889_v24  ;;  %v1500_v50 = vshrl.u32 %v1153_v29, 16  ;;  %v1041_v54 = vshll.u32 %v5378_v23, 16  ;;  %v1503_v55 = vshll.u32 %v1153_v29, 16  ;;  %v2102_v56 = vrot.slane %v5383_v30, 4  ;;  %v5451_v33 = vld [vmem:[#allocation2 + $0x60] sm:$0xf0] }
 0x1d8   : > { %4252 = vmatprep.mubr.msk.bf16.mxu1 %vm1218_vm5, %v1906_v6  ;;  %v2103_v57 = vrot.slane %v5327_v45, 4  ;;  %v1182_v60 = vsel %vm1176_vm6, %v1180_v48, %v1181_v49  ;;  %v2105_v61 = vrot.slane %v5386_v37, 4  ;;  %v1183_v62 = vrot.slane %v5399_v52, 4  ;;  %v5461_v43 = vld [vmem:[#allocation2 + $0x60] sm:$0xf0]  ;;  %s6043_s16 = sld [smem:[#allocation28_spill]] }
 0x1d9   : > { %v1923_v2 = vsel %vm497_vm1, %v1914_v42, %v1922_v47  ;;  %4181 = vmatmul.mubr.msk.bf16.vlgmr.msra.gmra.mrb[20].mxu0 %vm1218_vm5, %v1182_v60  ;;  %v5416_v3 = vrot.slane %v1500_v50, 4  ;;  %v1184_v45 = vrot.slane %v5394_v46, 4  ;;  %v5423_v9 = vrot.slane %v1503_v55, 5  ;;  %v5459_v42 = vld [vmem:[#allocation2 + $0x68] sm:$0xf]  ;;  %s4845_s28 = smov [#allocation9]  }
 0x1da   : > { %v1186_v10 = vrot.slane %v5410_v63, 4  ;;  %v1187_v11 = vrot.slane %v5405_v59, 4  ;;  %v2108_v13 = vrot.slane %v5412_v1, 4  ;;  %4197 = vmatpush3.bf16.msra.mxu0 %v5354_v41  ;;  %v2109_v17 = vrot.slane %v5335_v5, 4  ;;  %v5445_v5 = vld [vmem:[#allocation2 + $0x50] sm:$0xf0] }
 0x1db   : > { %v1185_v16 = vsel %vm1176_vm6, %v1183_v62, %v1184_v45  ;;  %v2111_v19 = vrot.slane %v5419_v7, 4  ;;  %v1189_v20 = vrot.slane %v5428_v15, 4  ;;  %4198 = vmatprep.subr.bf16.mxu0 %v4630_v53  ;;  %v2104_v24 = vsel %vm1176_vm6, %v2102_v56, %v2103_v57  ;;  %v5471_v49 = vld [vmem:[#allocation2 + $0x70] sm:$0xf0]  ;;  %v4628_v57 = vld [vmem:[#allocation8 + $0x58] sm:$0xff]   ;;  %s4733_s10 = sshll.u32 %s4845_s28, 4  ;;  %s4734_s10 = int_to_ptr.vmem [resolvable:$false] %s4733_s10 }
 0x1dc   : > { %4184 = vmatprep.mubr.msk.bf16.mxu0 %vm1218_vm5, %v1185_v16  ;;  %v2112_v26 = vrot.slane %v5337_v14, 4  ;;  %v1190_v41 = vrot.slane %v5421_v8, 4  ;;  %v1192_v28 = vrot.slane %v5443_v27, 4  ;;  %v1193_v29 = vrot.slane %v5435_v21, 4  ;;  %v5483_v60 = vld [vmem:[#allocation2 + $0x70] sm:$0xf0]  ;;  %p4736_p6 = scmp.lt.s32.totalorder %s5924_s26, %s4734_s10 }
 0x1dd   : > { %v2114_v31 = vrot.slane %v5445_v5, 4  ;;  %v2115_v32 = vrot.slane %v5344_v25, 4  ;;  %v1188_v14 = vsel %vm1176_vm6, %v1186_v10, %v1187_v11  ;;  %v2117_v34 = vrot.slane %v5451_v33, 4  ;;  %v5463_v25 = vld [vmem:[#allocation2 + $0x78] sm:$0xf] }
 0x1de   : > { %v2118_v39 = vrot.slane %v5349_v35, 4  ;;  %4199 = vmatpush3.bf16.msra.mxu0 %v4630_v53  ;;  %v1191_v6 = vsel %vm1176_vm6, %v1189_v20, %v1190_v41  ;;  %v2107_v47 = vsel %vm1176_vm6, %v2105_v61, %v2106_v38  ;;  %v1195_v48 = vrot.slane %v5461_v43, 4  ;;  %v5485_v61 = vld [vmem:[#allocation2 + $0x80] sm:$0xf0] }
 0x1df   : > { %4253 = vmatmul.mubr.msk.bf16.gmra.mrb[12].mxu1 %vm1218_vm5, %v1923_v2  ;;  %4216 = vmatprep.subr.bf16.mxu0 %v5437_v22  ;;  %v1196_v35 = vrot.slane %v5459_v42, 4  ;;  %v1199_v50 = vrot.slane %v5463_v25, 4  ;;  %v2110_v53 = vsel %vm1176_vm6, %v2108_v13, %v2109_v17  ;;  %v5477_v55 = vsel %vm1176_vm6, %v2111_v19, %v2112_v26 }
 0x1e0   : > { %4260 = vmatprep.mubr.msk.bf16.mxu1 %vm1218_vm5, %v2104_v24  ;;  %v1198_v56 = vrot.slane %v5471_v49, 4  ;;  %v2121_v51 = vrot.slane %v5362_v58, 4  ;;  %v1194_v38 = vsel %vm1176_vm6, %v1192_v28, %v1193_v29  ;;  %v2124_v62 = vrot.slane %v5366_v0, 4  ;;  %v996_v0 = vld [vmem:[#allocation2] sm:$0xf8] }
 0x1e1   : > { %4185 = vmatmul.mubr.msk.bf16.gmra.mrb[24].mxu0 %vm1218_vm5, %v1188_v14  ;;  %v1021_v2 = vshrl.u32 %v5372_v12, 16  ;;  %v1506_v45 = vor.u32 %v5423_v9, %v5416_v3  ;;  %v5492_v10 = vsel %vm1176_vm6, %v2114_v31, %v2115_v32  ;;  %v5495_v58 = vsel %vm1176_vm6, %v2117_v34, %v2118_v39  ;;  %v998_v24 = vld [vmem:[#allocation2 + $0x10] sm:$0xf8]  ;;  %v2280_v31 = vld [vmem:[#allocation2 + $0x18] sm:$0x1f] }
 0x1e2   : > { %4188 = vmatprep.mubr.msk.bf16.mxu0 %vm1218_vm5, %v1191_v6  ;;  %v2120_v11 = vrot.slane %v5483_v60, 4  ;;  %v2123_v13 = vrot.slane %v5485_v61, 4  ;;  %v1197_v16 = vsel %vm1176_vm6, %v1195_v48, %v1196_v35  ;;  %v5501_v17 = vsel %vm1176_vm6, %v1198_v56, %v1199_v50  ;;  %v2583_v3 = vld [vmem:[#allocation2 + $0x40] sm:$0xf8] }
 0x1e3   : > { %v1023_v19 = vrot.slane %v1021_v2, 3  ;;  %v1024_v20 = vshll.u32 %v5372_v12, 16  ;;  %v1013_v28 = vshrl.u32 %v996_v0, 16  ;;  %v1016_v29 = vshll.u32 %v996_v0, 16  ;;  %v2281_v2 = vld [vmem:[#allocation2 + $0x28] sm:$0x1f] }
 0x1e4   : > { %v5505_v26 = vsel %vm1176_vm6, %v2120_v11, %v2121_v51  ;;  %v5508_v41 = vsel %vm1176_vm6, %v2123_v13, %v2124_v62  ;;  %v1030_v14 = vshrl.u32 %v998_v24, 16  ;;  %v1033_v34 = vshll.u32 %v998_v24, 16  ;;  %v5518_v51 = vld [vmem:[#allocation8 + $0x60] sm:$0xff]  }
 0x1e5   : > { %v1026_v32 = vrot.slane %v1024_v20, 4  ;;  %v1040_v39 = vrot.slane %v1038_v44, 3  ;;  %v1015_v12 = vrot.slane %v1013_v28, 3  ;;  %v1018_v6 = vrot.slane %v1016_v29, 4  ;;  %v1000_v0 = vld [vmem:[#allocation2 + $0x20] sm:$0xf8] }
 0x1e6   : > { %v1043_v48 = vrot.slane %v1041_v54, 4  ;;  %vm1481_vm7 = vsmask.f32 3328  ;;  %v1032_v50 = vrot.slane %v1030_v14, 3  ;;  %v2289_v56 = vshrl.u32 %v5383_v30, 16 }
 0x1e7   : > { %4261 = vmatmul.mubr.msk.bf16.vlgmr.msra.gmra.mrb[0].mxu1 %vm1218_vm5, %v2107_v47  ;;  %v1027_v35 = vor.u32 %v1026_v32, %v1023_v19  ;;  %v1035_v47 = vrot.slane %v1033_v34, 4  ;;  %v1019_v44 = vor.u32 %v1018_v6, %v1015_v12  ;;  %v2297_v62 = vshrl.u32 %v2280_v31, 16 }
 0x1e8   : > { %4277 = vmatpush3.bf16.msra.mxu1 %v5351_v36  ;;  %4264 = vmatprep.mubr.msk.bf16.mxu1 %vm1218_vm5, %v2110_v53  ;;  %v1044_v36 = vor.u32 %v1043_v48, %v1040_v39  ;;  %v2292_v53 = vshll.u32 %v5383_v30, 16  ;;  %v2291_v54 = vrot.slane %v2289_v56, 4  ;;  %v2300_v11 = vshll.u32 %v2280_v31, 16  ;;  %v1002_v39 = vld [vmem:[#allocation2 + $0x30] sm:$0xf8] }
 0x1e9   : > { %4278 = vmatprep.subr.bf16.mxu1 %v4628_v57  ;;  %4189 = vmatmul.mubr.msk.bf16.gmra.mrb[28].mxu0 %vm1218_vm5, %v1194_v38  ;;  %v1036_v23 = vor.u32 %v1035_v47, %v1032_v50  ;;  %v2306_v13 = vshrl.u32 %v5386_v37, 16  ;;  %v1028_v19 = vsel %vm497_vm1, %v1019_v44, %v1027_v35  ;;  %v2299_v24 = vrot.slane %v2297_v62, 4  ;;  %v2282_v56 = vld [vmem:[#allocation2 + $0x38] sm:$0x1f] }
 0x1ea   : > { %4192 = vmatprep.mubr.msk.bf16.mxu0 %vm1218_vm5, %v1197_v16  ;;  %v2294_v20 = vrot.slane %v2292_v53, 5  ;;  %v2309_v38 = vshll.u32 %v5386_v37, 16  ;;  %v2302_v30 = vrot.slane %v2300_v11, 5  ;;  %v2314_v32 = vshrl.u32 %v2281_v2, 16 }
 0x1eb   : > { %v5527_v28 = vsel %vm497_vm1, %v1036_v23, %v1044_v36  ;;  %v2308_v29 = vrot.slane %v2306_v13, 4  ;;  %v2317_v14 = vshll.u32 %v2281_v2, 16  ;;  %v1047_v34 = vshrl.u32 %v1000_v0, 16 }
 0x1ec   : > { %4279 = vmatpush3.bf16.msra.mxu1 %v4628_v57  ;;  %v2295_v16 = vor.u32 %v2294_v20, %v2291_v54  ;;  %v2311_v31 = vrot.slane %v2309_v38, 5  ;;  %v2303_v57 = vor.u32 %v2302_v30, %v2299_v24  ;;  %v2316_v12 = vrot.slane %v2314_v32, 4 }
 0x1ed   : > { %4296 = vmatprep.subr.bf16.mxu1 %v5518_v51  ;;  %v1050_v6 = vshll.u32 %v1000_v0, 16  ;;  %v1055_v37 = vshrl.u32 %v5394_v46, 16  ;;  %v2319_v35 = vrot.slane %v2317_v14, 5  ;;  %v1049_v50 = vrot.slane %v1047_v34, 3  ;;  %v1004_v34 = vld [vmem:[#allocation2 + $0x40] sm:$0xf8] }
 0x1ee   : > { %v2312_v48 = vor.u32 %v2311_v31, %v2308_v29  ;;  %v1058_v47 = vshll.u32 %v5394_v46, 16  ;;  %v5537_v44 = vsel %vm1481_vm7, %v2295_v16, %v2303_v57  ;;  %v1067_v23 = vshll.u32 %v1002_v39, 16 }
 0x1ef   : > { %4265 = vmatmul.mubr.msk.bf16.gmra.mrb[4].mxu1 %vm1218_vm5, %v5477_v55  ;;  %v1052_v36 = vrot.slane %v1050_v6, 4  ;;  %v1057_v53 = vrot.slane %v1055_v37, 3  ;;  %v1064_v55 = vshrl.u32 %v1002_v39, 16  ;;  %v2320_v62 = vor.u32 %v2319_v35, %v2316_v12  ;;  %v4634_v37 = vld [vmem:[#allocation8 + $0x28] sm:$0xff]  }
 0x1f0   : > { %4268 = vmatprep.mubr.msk.bf16.mxu1 %vm1218_vm5, %v5492_v10  ;;  %v1060_v2 = vrot.slane %v1058_v47, 4  ;;  %v1072_v10 = vshrl.u32 %v5405_v59, 16  ;;  %v1075_v46 = vshll.u32 %v5405_v59, 16  ;;  %v2323_v13 = vshrl.u32 %v5412_v1, 16 }
 0x1f1   : > { %4193 = vmatmul.mubr.msk.bf16.gmra.mrb[32].mxu0 %vm1218_vm5, %v5501_v17  ;;  %v1053_v54 = vor.u32 %v1052_v36, %v1049_v50  ;;  %v1066_v11 = vrot.slane %v1064_v55, 3  ;;  %v5546_v0 = vsel %vm1481_vm7, %v2312_v48, %v2320_v62  ;;  %v1069_v24 = vrot.slane %v1067_v23, 4  ;;  %v2283_v17 = vld [vmem:[#allocation2 + $0x48] sm:$0x1f]  ;;  %v1006_v55 = vld [vmem:[#allocation2 + $0x50] sm:$0xf8] }
 0x1f2   : > { %4200 = vmatprep.mubr.msk.bf16.mxu0 %vm1218_vm5, %v1028_v19  ;;  %v1061_v20 = vor.u32 %v1060_v2, %v1057_v53  ;;  %v1074_v38 = vrot.slane %v1072_v10, 3  ;;  %v1077_v30 = vrot.slane %v1075_v46, 4  ;;  %v2325_v29 = vrot.slane %v2323_v13, 4 }
 0x1f3   : > { %v2326_v32 = vshll.u32 %v5412_v1, 16  ;;  %v2331_v16 = vshrl.u32 %v2282_v56, 16  ;;  %v1070_v31 = vor.u32 %v1069_v24, %v1066_v11  ;;  %v2334_v14 = vshll.u32 %v2282_v56, 16 }
 0x1f4   : > { %v1062_v19 = vsel %vm497_vm1, %v1053_v54, %v1061_v20  ;;  %v2340_v59 = vshrl.u32 %v5419_v7, 16  ;;  %v1078_v39 = vor.u32 %v1077_v30, %v1074_v38  ;;  %v2343_v6 = vshll.u32 %v5419_v7, 16 }
 0x1f5   : > { %v2328_v57 = vrot.slane %v2326_v32, 5  ;;  %v2333_v12 = vrot.slane %v2331_v16, 4  ;;  %v2336_v1 = vrot.slane %v2334_v14, 5  ;;  %v2348_v35 = vshrl.u32 %v2283_v17, 16 }
 0x1f6   : > { %v2342_v48 = vrot.slane %v2340_v59, 4  ;;  %v2351_v50 = vshll.u32 %v2283_v17, 16  ;;  %v1079_v47 = vsel %vm497_vm1, %v1070_v31, %v1078_v39  ;;  %v2345_v36 = vrot.slane %v2343_v6, 5 }
 0x1f7   : > { %4269 = vmatmul.mubr.msk.bf16.gmra.mrb[8].mxu1 %vm1218_vm5, %v5495_v58  ;;  %v2329_v56 = vor.u32 %v2328_v57, %v2325_v29  ;;  %v1081_v53 = vshrl.u32 %v1004_v34, 16  ;;  %v2337_v58 = vor.u32 %v2336_v1, %v2333_v12  ;;  %v2350_v62 = vrot.slane %v2348_v35, 4  ;;  %v2285_v12 = vld [vmem:[#allocation2 + $0x68] sm:$0x1f] }
 0x1f8   : > { %4272 = vmatprep.mubr.msk.bf16.mxu1 %vm1218_vm5, %v5505_v26  ;;  %v2353_v7 = vrot.slane %v2351_v50, 5  ;;  %v1084_v2 = vshll.u32 %v1004_v34, 16  ;;  %v2346_v26 = vor.u32 %v2345_v36, %v2342_v48  ;;  %v1089_v10 = vshrl.u32 %v5421_v8, 16  ;;  %v1008_v48 = vld [vmem:[#allocation2 + $0x60] sm:$0xf8] }
 0x1f9   : > { %4201 = vmatmul.mubr.msk.bf16.vlgmr.msra.gmra.mrb[20].mxu0 %vm1218_vm5, %v5527_v28  ;;  %v1083_v23 = vrot.slane %v1081_v53, 3  ;;  %v1092_v54 = vshll.u32 %v5421_v8, 16  ;;  %v2338_v11 = vsel %vm1481_vm7, %v2329_v56, %v2337_v58  ;;  %v1098_v20 = vshrl.u32 %v1006_v55, 16  ;;  %v2284_v28 = vld [vmem:[#allocation2 + $0x58] sm:$0x1f] }
 0x1fa   : > { %4204 = vmatprep.mubr.msk.bf16.mxu0 %vm1218_vm5, %v1062_v19  ;;  %4217 = vmatpush3.bf16.msra.mxu0 %v5437_v22  ;;  %v2354_v46 = vor.u32 %v2353_v7, %v2350_v62  ;;  %v1086_v13 = vrot.slane %v1084_v2, 4  ;;  %v1091_v24 = vrot.slane %v1089_v10, 3  ;;  %v1101_v17 = vshll.u32 %v1006_v55, 16  ;;  %v1010_v2 = vld [vmem:[#allocation2 + $0x70] sm:$0xf8]  ;;  %v4632_v10 = vld [vmem:[#allocation8 + $0x68] sm:$0xff]  }
 0x1fb   : > { %4218 = vmatprep.subr.bf16.mxu0 %v4634_v37  ;;  %v1094_v38 = vrot.slane %v1092_v54, 4  ;;  %v1106_v30 = vshrl.u32 %v5435_v21, 16  ;;  %v1100_v16 = vrot.slane %v1098_v20, 3  ;;  %v1109_v8 = vshll.u32 %v5435_v21, 16 }
 0x1fc   : > { %v5566_v29 = vsel %vm1481_vm7, %v2346_v26, %v2354_v46  ;;  %v1087_v32 = vor.u32 %v1086_v13, %v1083_v23  ;;  %v1103_v19 = vrot.slane %v1101_v17, 4  ;;  %v2357_v14 = vshrl.u32 %v5445_v5, 16 }
 0x1fd   : > { %v1095_v22 = vor.u32 %v1094_v38, %v1091_v24  ;;  %v1108_v31 = vrot.slane %v1106_v30, 3  ;;  %v1111_v59 = vrot.slane %v1109_v8, 4  ;;  %v2360_v34 = vshll.u32 %v5445_v5, 16  ;;  %v2286_v30 = vld [vmem:[#allocation2 + $0x78] sm:$0x1f] }
 0x1fe   : > { %4219 = vmatpush3.bf16.msra.mxu0 %v4634_v37  ;;  %v2365_v39 = vshrl.u32 %v2284_v28, 16  ;;  %v2368_v57 = vshll.u32 %v2284_v28, 16  ;;  %v1104_v6 = vor.u32 %v1103_v19, %v1100_v16  ;;  %v2359_v1 = vrot.slane %v2357_v14, 4  ;;  %v5593_v14 = vld [vmem:[#allocation8 + $0x70] sm:$0xff]  }
 0x1ff   : > { %4273 = vmatmul.mubr.msk.bf16.gmra.mrb[12].mxu1 %vm1218_vm5, %v5508_v41  ;;  %v1096_v21 = vsel %vm497_vm1, %v1087_v32, %v1095_v22  ;;  %v2374_v41 = vshrl.u32 %v5451_v33, 16  ;;  %v1112_v35 = vor.u32 %v1111_v59, %v1108_v31  ;;  %v2362_v37 = vrot.slane %v2360_v34, 5 }
 0x200   : > { %4280 = vmatprep.mubr.msk.bf16.mxu1 %vm1218_vm5, %v5537_v44  ;;  %v2367_v50 = vrot.slane %v2365_v39, 4  ;;  %v2370_v56 = vrot.slane %v2368_v57, 5  ;;  %v2377_v5 = vshll.u32 %v5451_v33, 16  ;;  %v2382_v36 = vshrl.u32 %v2285_v12, 16 }
 0x201   : > { %4205 = vmatmul.mubr.msk.bf16.gmra.mrb[24].mxu0 %vm1218_vm5, %v1079_v47  ;;  %v2376_v44 = vrot.slane %v2374_v41, 4  ;;  %v2385_v53 = vshll.u32 %v2285_v12, 16  ;;  %v1113_v55 = vsel %vm497_vm1, %v1104_v6, %v1112_v35  ;;  %v2363_v58 = vor.u32 %v2362_v37, %v2359_v1  ;;  %v2287_v6 = vld [vmem:[#allocation2 + $0x88] sm:$0x1f] }
 0x202   : > { %4208 = vmatprep.mubr.msk.bf16.mxu0 %vm1218_vm5, %v1096_v21  ;;  %v2371_v62 = vor.u32 %v2370_v56, %v2367_v50  ;;  %v1115_v7 = vshrl.u32 %v1008_v48, 16  ;;  %v2379_v26 = vrot.slane %v2377_v5, 5  ;;  %v2384_v23 = vrot.slane %v2382_v36, 4 }
 0x203   : > { %v2387_v47 = vrot.slane %v2385_v53, 5  ;;  %v1118_v54 = vshll.u32 %v1008_v48, 16  ;;  %v1123_v20 = vshrl.u32 %v5459_v42, 16  ;;  %v1126_v33 = vshll.u32 %v5459_v42, 16 }
 0x204   : > { %v2372_v46 = vsel %vm1481_vm7, %v2363_v58, %v2371_v62  ;;  %v1117_v13 = vrot.slane %v1115_v7, 3  ;;  %v2380_v28 = vor.u32 %v2379_v26, %v2376_v44  ;;  %v1132_v17 = vshrl.u32 %v1010_v2, 16  ;;  %v1473_v44 = vld [vmem:[#allocation2 + $0x8] sm:$0x1f] }
 0x205   : > { %v2388_v24 = vor.u32 %v2387_v47, %v2384_v23  ;;  %v1120_v38 = vrot.slane %v1118_v54, 4  ;;  %v1125_v32 = vrot.slane %v1123_v20, 3  ;;  %v1128_v16 = vrot.slane %v1126_v33, 4  ;;  %v5612_v33 = vld [vmem:[#allocation2 + $0x28] sm:$0xf] }
 0x206   : > { %v1135_v8 = vshll.u32 %v1010_v2, 16  ;;  %v1140_v22 = vshrl.u32 %v5463_v25, 16  ;;  %v1143_v31 = vshll.u32 %v5463_v25, 16  ;;  %v2391_v34 = vshrl.u32 %v5483_v60, 16 }
 0x207   : > { %4281 = vmatmul.mubr.msk.bf16.vlgmr.msra.gmra.mrb[0].mxu1 %vm1218_vm5, %v5546_v0  ;;  %v5590_v19 = vsel %vm1481_vm7, %v2380_v28, %v2388_v24  ;;  %v1121_v42 = vor.u32 %v1120_v38, %v1117_v13  ;;  %v1134_v0 = vrot.slane %v1132_v17, 3  ;;  %v2394_v57 = vshll.u32 %v5483_v60, 16  ;;  %v2581_v38 = vld [vmem:[#allocation2 + $0x30] sm:$0xf8]  ;;  %v5615_v17 = vld [vmem:[#allocation2 + $0x38] sm:$0xf] }
 0x208   : > { %4297 = vmatpush3.bf16.msra.mxu1 %v5518_v51  ;;  %4284 = vmatprep.mubr.msk.bf16.mxu1 %vm1218_vm5, %v2338_v11  ;;  %v1129_v51 = vor.u32 %v1128_v16, %v1125_v32  ;;  %v1137_v59 = vrot.slane %v1135_v8, 4  ;;  %v1142_v11 = vrot.slane %v1140_v22, 3  ;;  %v1145_v39 = vrot.slane %v1143_v31, 4 }
 0x209   : > { %4298 = vmatprep.subr.bf16.mxu1 %v4632_v10  ;;  %4209 = vmatmul.mubr.msk.bf16.gmra.mrb[28].mxu0 %vm1218_vm5, %v1113_v55  ;;  %v2399_v12 = vshrl.u32 %v2286_v30, 16  ;;  %v2402_v21 = vshll.u32 %v2286_v30, 16  ;;  %v2393_v25 = vrot.slane %v2391_v34, 4  ;;  %v2408_v48 = vshrl.u32 %v5485_v61, 16  ;;  %v1474_v55 = vld [vmem:[#allocation2 + $0x18] sm:$0x1f] }
 0x20a   : > { %v1130_v1 = vsel %vm497_vm1, %v1121_v42, %v1129_v51  ;;  %v1138_v41 = vor.u32 %v1137_v59, %v1134_v0  ;;  %v1146_v35 = vor.u32 %v1145_v39, %v1142_v11  ;;  %v2396_v37 = vrot.slane %v2394_v57, 5 }
 0x20b   : > { %4212 = vmatprep.mubr.msk.bf16.mxu0 %vm1218_vm5, %v1130_v1  ;;  %v2401_v50 = vrot.slane %v2399_v12, 4  ;;  %v2404_v56 = vrot.slane %v2402_v21, 5  ;;  %v2410_v60 = vrot.slane %v2408_v48, 4  ;;  %v2411_v5 = vshll.u32 %v5485_v61, 16 }
 0x20c   : > { %4299 = vmatpush3.bf16.msra.mxu1 %v4632_v10  ;;  %v2416_v36 = vshrl.u32 %v2287_v6, 16  ;;  %v2419_v53 = vshll.u32 %v2287_v6, 16  ;;  %v1147_v58 = vsel %vm497_vm1, %v1138_v41, %v1146_v35  ;;  %v2397_v62 = vor.u32 %v2396_v37, %v2393_v25  ;;  %v2579_v10 = vld [vmem:[#allocation2 + $0x20] sm:$0xf8]  ;;  %v1475_v41 = vld [vmem:[#allocation2 + $0x28] sm:$0x1f] }
 0x20d   : > { %4316 = vmatprep.subr.bf16.mxu1 %v5593_v14  ;;  %v2405_v7 = vor.u32 %v2404_v56, %v2401_v50  ;;  %v1485_v2 = vrot.slane %v1483_v40, 4  ;;  %v2413_v26 = vrot.slane %v2411_v5, 5  ;;  %v1488_v61 = vrot.slane %v1486_v4, 5 }
 0x20e   : > { %v2418_v23 = vrot.slane %v2416_v36, 4  ;;  %v2421_v47 = vrot.slane %v2419_v53, 5  ;;  %v1491_v13 = vshrl.u32 %v1473_v44, 16  ;;  %v1508_v20 = vshrl.u32 %v1474_v55, 16 }
 0x20f   : > { %4285 = vmatmul.mubr.msk.bf16.gmra.mrb[4].mxu1 %vm1218_vm5, %v5566_v29  ;;  %v2406_v54 = vsel %vm1481_vm7, %v2397_v62, %v2405_v7  ;;  %v1494_v29 = vshll.u32 %v1473_v44, 16  ;;  %v2414_v28 = vor.u32 %v2413_v26, %v2410_v60  ;;  %v1489_v24 = vor.u32 %v1488_v61, %v1485_v2  ;;  %v1476_v60 = vld [vmem:[#allocation2 + $0x38] sm:$0x1f]  ;;  %v5636_v7 = vld [vmem:[#allocation2 + $0x48] sm:$0xf] }
 0x210   : > { %4288 = vmatprep.mubr.msk.bf16.mxu1 %vm1218_vm5, %v2372_v46  ;;  %v2422_v40 = vor.u32 %v2421_v47, %v2418_v23  ;;  %v1511_v46 = vshll.u32 %v1474_v55, 16  ;;  %v1493_v30 = vrot.slane %v1491_v13, 4  ;;  %v1510_v4 = vrot.slane %v1508_v20, 4  ;;  %v2585_v47 = vld [vmem:[#allocation2 + $0x50] sm:$0xf8] }
 0x211   : > { %4213 = vmatmul.mubr.msk.bf16.gmra.mrb[32].mxu0 %vm1218_vm5, %v1147_v58  ;;  %v1496_v18 = vrot.slane %v1494_v29, 5  ;;  %v2596_v32 = vshrl.u32 %v2579_v10, 16  ;;  %v2599_v22 = vshll.u32 %v2579_v10, 16  ;;  %v2604_v42 = vshrl.u32 %v5612_v33, 16  ;;  %v5639_v29 = vld [vmem:[#allocation2 + $0x58] sm:$0xf] }
 0x212   : > { %v2423_v16 = vsel %vm1481_vm7, %v2414_v28, %v2422_v40  ;;  %v1513_v8 = vrot.slane %v1511_v46, 5  ;;  %v2607_v51 = vshll.u32 %v5612_v33, 16  ;;  %v2613_v59 = vshrl.u32 %v2581_v38, 16 }
 0x213   : > { %v1497_v0 = vor.u32 %v1496_v18, %v1493_v30  ;;  %v2598_v31 = vrot.slane %v2596_v32, 3  ;;  %v2601_v34 = vrot.slane %v2599_v22, 4  ;;  %v2606_v39 = vrot.slane %v2604_v42, 3 }
 0x214   : > { %v1514_v11 = vor.u32 %v1513_v8, %v1510_v4  ;;  %v2616_v57 = vshll.u32 %v2581_v38, 16  ;;  %v2609_v21 = vrot.slane %v2607_v51, 4  ;;  %v2615_v6 = vrot.slane %v2613_v59, 3 }
 0x215   : > { %v1498_v12 = vsel %vm1481_vm7, %v1489_v24, %v1497_v0  ;;  %v2621_v1 = vshrl.u32 %v5615_v17, 16  ;;  %v2602_v48 = vor.u32 %v2601_v34, %v2598_v31  ;;  %v1517_v56 = vshrl.u32 %v5399_v52, 16  ;;  %v1477_v34 = vld [vmem:[#allocation2 + $0x48] sm:$0x1f] }
 0x216   : > { %4220 = vmatprep.mubr.msk.bf16.mxu0 %vm1218_vm5, %v1498_v12  ;;  %v1515_v25 = vsel %vm1481_vm7, %v1506_v45, %v1514_v11  ;;  %v2618_v35 = vrot.slane %v2616_v57, 4  ;;  %v2610_v37 = vor.u32 %v2609_v21, %v2606_v39  ;;  %v1520_v44 = vshll.u32 %v5399_v52, 16 }
 0x217   : > { %4289 = vmatmul.mubr.msk.bf16.gmra.mrb[8].mxu1 %vm1218_vm5, %v5590_v19  ;;  %v2624_v19 = vshll.u32 %v5615_v17, 16  ;;  %v2623_v50 = vrot.slane %v2621_v1, 3  ;;  %v1525_v53 = vshrl.u32 %v1475_v41, 16  ;;  %v1528_v55 = vshll.u32 %v1475_v41, 16 }
 0x218   : > { %4292 = vmatprep.mubr.msk.bf16.mxu1 %vm1218_vm5, %v2406_v54  ;;  %v2619_v5 = vor.u32 %v2618_v35, %v2615_v6  ;;  %v2611_v9 = vsel %vm497_vm1, %v2602_v48, %v2610_v37  ;;  %v1519_v45 = vrot.slane %v1517_v56, 4  ;;  %v1522_v58 = vrot.slane %v1520_v44, 5  ;;  %v4636_v48 = vld [vmem:[#allocation8 + $0x78] sm:$0xff]  }
 0x219   : > { %4221 = vmatmul.mubr.msk.bf16.vlgmr.msra.gmra.mrb[20].mxu0 %vm1218_vm5, %v1515_v25  ;;  %v2626_v36 = vrot.slane %v2624_v19, 4  ;;  %v1534_v62 = vshrl.u32 %v5410_v63, 16  ;;  %v1527_v26 = vrot.slane %v1525_v53, 4  ;;  %v1530_v23 = vrot.slane %v1528_v55, 5  ;;  %v1478_v56 = vld [vmem:[#allocation2 + $0x58] sm:$0x1f] }
 0x21a   : > { %v1537_v52 = vshll.u32 %v5410_v63, 16  ;;  %v1523_v61 = vor.u32 %v1522_v58, %v1519_v45  ;;  %v1542_v54 = vshrl.u32 %v1476_v60, 16  ;;  %v1545_v13 = vshll.u32 %v1476_v60, 16  ;;  %v2587_v53 = vld [vmem:[#allocation2 + $0x60] sm:$0xf8] }
 0x21b   : > { %v2627_v2 = vor.u32 %v2626_v36, %v2623_v50  ;;  %v1536_v10 = vrot.slane %v1534_v62, 4  ;;  %v1531_v28 = vor.u32 %v1530_v23, %v1527_v26  ;;  %v2630_v24 = vshrl.u32 %v2583_v3, 16  ;;  %v5658_v58 = vld [vmem:[#allocation2 + $0x68] sm:$0xf] }
 0x21c   : > { %v1539_v40 = vrot.slane %v1537_v52, 5  ;;  %v1544_v46 = vrot.slane %v1542_v54, 4  ;;  %v1547_v38 = vrot.slane %v1545_v13, 5  ;;  %v2633_v30 = vshll.u32 %v2583_v3, 16  ;;  %v5663_v54 = vld [vmem:[#allocation8 + $0x80] sm:$0xff]  }
 0x21d   : > { %v2628_v20 = vsel %vm497_vm1, %v2619_v5, %v2627_v2  ;;  %v2638_v18 = vshrl.u32 %v5636_v7, 16  ;;  %v1532_v63 = vsel %vm1481_vm7, %v1523_v61, %v1531_v28  ;;  %v2632_v32 = vrot.slane %v2630_v24, 3  ;;  %v5666_v28 = vld [vmem:[#allocation2 + $0x78] sm:$0xf] }
 0x21e   : > { %v1540_v4 = vor.u32 %v1539_v40, %v1536_v10  ;;  %v2641_v8 = vshll.u32 %v5636_v7, 16  ;;  %4224 = vmatprep.mubr.msk.bf16.mxu0 %vm1218_vm5, %v1532_v63  ;;  %v1548_v22 = vor.u32 %v1547_v38, %v1544_v46  ;;  %v2635_v42 = vrot.slane %v2633_v30, 4  ;;  %v2589_v10 = vld [vmem:[#allocation2 + $0x70] sm:$0xf8] }
 0x21f   : > { %4293 = vmatmul.mubr.msk.bf16.gmra.mrb[12].mxu1 %vm1218_vm5, %v2423_v16  ;;  %v2640_v0 = vrot.slane %v2638_v18, 3  ;;  %v2647_v31 = vshrl.u32 %v2585_v47, 16  ;;  %v2650_v51 = vshll.u32 %v2585_v47, 16  ;;  %v2655_v59 = vshrl.u32 %v5639_v29, 16 }
 0x220   : > { %4300 = vmatprep.mubr.msk.bf16.mxu1 %vm1218_vm5, %v2611_v9  ;;  %v2643_v16 = vrot.slane %v2641_v8, 4  ;;  %v2658_v11 = vshll.u32 %v5639_v29, 16  ;;  %v1549_v39 = vsel %vm1481_vm7, %v1540_v4, %v1548_v22  ;;  %v2636_v57 = vor.u32 %v2635_v42, %v2632_v32 }
 0x221   : > { %v2649_v12 = vrot.slane %v2647_v31, 3  ;;  %v1551_v21 = vshrl.u32 %v5428_v15, 16  ;;  %4225 = vmatmul.mubr.msk.bf16.gmra.mrb[24].mxu0 %vm1218_vm5, %v1549_v39  ;;  %v2652_v1 = vrot.slane %v2650_v51, 4  ;;  %v2657_v41 = vrot.slane %v2655_v59, 3 }
 0x222   : > { %v2644_v6 = vor.u32 %v2643_v16, %v2640_v0  ;;  %v2660_v25 = vrot.slane %v2658_v11, 4  ;;  %v1554_v19 = vshll.u32 %v5428_v15, 16  ;;  %v1559_v37 = vshrl.u32 %v1477_v34, 16  ;;  %v1479_v0 = vld [vmem:[#allocation2 + $0x68] sm:$0x1f] }
 0x223   : > { %v1553_v35 = vrot.slane %v1551_v21, 4  ;;  %v1562_v50 = vshll.u32 %v1477_v34, 16  ;;  %v2653_v60 = vor.u32 %v2652_v1, %v2649_v12  ;;  %v1568_v36 = vshrl.u32 %v5443_v27, 16 }
 0x224   : > { %v2645_v44 = vsel %vm497_vm1, %v2636_v57, %v2644_v6  ;;  %v2661_v5 = vor.u32 %v2660_v25, %v2657_v41  ;;  %v1556_v55 = vrot.slane %v1554_v19, 5  ;;  %v1561_v3 = vrot.slane %v1559_v37, 4  ;;  %v1480_v41 = vld [vmem:[#allocation2 + $0x78] sm:$0x1f]  ;;  %v2591_v37 = vld [vmem:[#allocation2 + $0x80] sm:$0xf8] }
 0x225   : > { %v1564_v9 = vrot.slane %v1562_v50, 5  ;;  %v1571_v45 = vshll.u32 %v5443_v27, 16  ;;  %v1570_v62 = vrot.slane %v1568_v36, 4  ;;  %v1576_v2 = vshrl.u32 %v1478_v56, 16 }
 0x226   : > { %v2662_v15 = vsel %vm497_vm1, %v2653_v60, %v2661_v5  ;;  %v1579_v26 = vshll.u32 %v1478_v56, 16  ;;  %v1557_v23 = vor.u32 %v1556_v55, %v1553_v35  ;;  %v2664_v61 = vshrl.u32 %v2587_v53, 16  ;;  %v5683_v5 = vld [vmem:[#allocation2 + $0x88] sm:$0xf] }
 0x227   : > { %4301 = vmatmul.mubr.msk.bf16.vlgmr.msra.gmra.mrb[0].mxu1 %vm1218_vm5, %v2628_v20  ;;  %v1565_v52 = vor.u32 %v1564_v9, %v1561_v3  ;;  %v1573_v47 = vrot.slane %v1571_v45, 5  ;;  %v1578_v27 = vrot.slane %v1576_v2, 4  ;;  %v2667_v20 = vshll.u32 %v2587_v53, 16 }
 0x228   : > { %4317 = vmatpush3.bf16.msra.mxu1 %v5593_v14  ;;  %4304 = vmatprep.mubr.msk.bf16.mxu1 %vm1218_vm5, %v2645_v44  ;;  %v1581_v13 = vrot.slane %v1579_v26, 5  ;;  %v2672_v14 = vshrl.u32 %v5658_v58, 16  ;;  %v2666_v46 = vrot.slane %v2664_v61, 3  ;;  %v2675_v38 = vshll.u32 %v5658_v58, 16 }
 0x229   : > { %4318 = vmatprep.subr.bf16.mxu1 %v4636_v48  ;;  %v1566_v40 = vsel %vm1481_vm7, %v1557_v23, %v1565_v52  ;;  %v1574_v24 = vor.u32 %v1573_v47, %v1570_v62  ;;  %v2669_v18 = vrot.slane %v2667_v20, 4  ;;  %v2681_v4 = vshrl.u32 %v2589_v10, 16  ;;  %v2593_v62 = vld [vmem:[#allocation2 + $0x90] sm:$0xf8]  ;;  %v5687_v47 = vld [vmem:[#allocation2 + $0x98] sm:$0xf] }
 0x22a   : > { %4228 = vmatprep.mubr.msk.bf16.mxu0 %vm1218_vm5, %v1566_v40  ;;  %v1582_v30 = vor.u32 %v1581_v13, %v1578_v27  ;;  %v2674_v63 = vrot.slane %v2672_v14, 3  ;;  %v2677_v32 = vrot.slane %v2675_v38, 4  ;;  %v2684_v8 = vshll.u32 %v2589_v10, 16  ;;  %v5691_v13 = vld [vmem:[#allocation2 + $0x20] sm:$0xf0] }
 0x22b   : > { %v2689_v22 = vshrl.u32 %v5666_v28, 16  ;;  %v2692_v42 = vshll.u32 %v5666_v28, 16  ;;  %v2670_v16 = vor.u32 %v2669_v18, %v2666_v46  ;;  %v2683_v51 = vrot.slane %v2681_v4, 3 }
 0x22c   : > { %4319 = vmatpush3.bf16.msra.mxu1 %v4636_v48  ;;  %v1583_v31 = vsel %vm1481_vm7, %v1574_v24, %v1582_v30  ;;  %v1585_v59 = vshrl.u32 %v5461_v43, 16  ;;  %v2678_v11 = vor.u32 %v2677_v32, %v2674_v63  ;;  %v2686_v34 = vrot.slane %v2684_v8, 4 }
 0x22d   : > { %4336 = vmatprep.subr.bf16.mxu1 %v5663_v54  ;;  %4229 = vmatmul.mubr.msk.bf16.gmra.mrb[28].mxu0 %vm1218_vm5, %v1583_v31  ;;  %v2691_v39 = vrot.slane %v2689_v22, 3  ;;  %v2694_v57 = vrot.slane %v2692_v42, 4  ;;  %v1588_v21 = vshll.u32 %v5461_v43, 16  ;;  %v1593_v6 = vshrl.u32 %v1479_v0, 16 }
 0x22e   : > { %v1587_v12 = vrot.slane %v1585_v59, 4  ;;  %v1596_v1 = vshll.u32 %v1479_v0, 16  ;;  %v2679_v25 = vsel %vm497_vm1, %v2670_v16, %v2678_v11  ;;  %v2687_v48 = vor.u32 %v2686_v34, %v2683_v51 }
 0x22f   : > { %4305 = vmatmul.mubr.msk.bf16.gmra.mrb[4].mxu1 %vm1218_vm5, %v2662_v15  ;;  %v2695_v35 = vor.u32 %v2694_v57, %v2691_v39  ;;  %v1602_v19 = vshrl.u32 %v5471_v49, 16  ;;  %v1590_v50 = vrot.slane %v1588_v21, 5  ;;  %v1595_v56 = vrot.slane %v1593_v6, 4  ;;  %v2886_v39 = vld [vmem:[#allocation2 + $0x30] sm:$0xf0] }
 0x230   : > { %4308 = vmatprep.mubr.msk.bf16.mxu1 %vm1218_vm5, %v2679_v25  ;;  %v1598_v44 = vrot.slane %v1596_v1, 5  ;;  %v1605_v60 = vshll.u32 %v5471_v49, 16  ;;  %v1610_v53 = vshrl.u32 %v1480_v41, 16  ;;  %v1613_v55 = vshll.u32 %v1480_v41, 16 }
 0x231   : > { %v2696_v43 = vsel %vm497_vm1, %v2687_v48, %v2695_v35  ;;  %v1604_v36 = vrot.slane %v1602_v19, 4  ;;  %v1591_v3 = vor.u32 %v1590_v50, %v1587_v12  ;;  %v2698_v15 = vshrl.u32 %v2591_v37, 16  ;;  %v5705_v12 = vld [vmem:[#allocation2 + $0x40] sm:$0xf0]  ;;  %v5714_v48 = vld [vmem:[#allocation2 + $0x50] sm:$0xf0] }
 0x232   : > { %v1599_v9 = vor.u32 %v1598_v44, %v1595_v56  ;;  %v1607_v45 = vrot.slane %v1605_v60, 5  ;;  %v1612_v2 = vrot.slane %v1610_v53, 4  ;;  %v1615_v26 = vrot.slane %v1613_v55, 5  ;;  %v4638_v35 = vld [vmem:[#allocation8 + $0x88] sm:$0xff]   ;;  %v5716_v19 = vld [vmem:[#allocation2 + $0x60] sm:$0xf0] }
 0x233   : > { %v2701_v23 = vshll.u32 %v2591_v37, 16  ;;  %v2706_v52 = vshrl.u32 %v5683_v5, 16  ;;  %v2700_v10 = vrot.slane %v2698_v15, 3  ;;  %v2709_v27 = vshll.u32 %v5683_v5, 16  ;;  %v5727_v60 = vld [vmem:[#allocation2 + $0x70] sm:$0xf0] }
 0x234   : > { %v1600_v49 = vsel %vm1481_vm7, %v1591_v3, %v1599_v9  ;;  %v1608_v61 = vor.u32 %v1607_v45, %v1604_v36  ;;  %v1616_v20 = vor.u32 %v1615_v26, %v1612_v2  ;;  %v2715_v24 = vshrl.u32 %v2593_v62, 16  ;;  %v3088_v15 = vld [vmem:[#allocation2 + $0x38] sm:$0x1f] }
 0x235   : > { %4232 = vmatprep.mubr.msk.bf16.mxu0 %vm1218_vm5, %v1600_v49  ;;  %v2703_v14 = vrot.slane %v2701_v23, 4  ;;  %v2708_v40 = vrot.slane %v2706_v52, 3  ;;  %v2711_v46 = vrot.slane %v2709_v27, 4  ;;  %v2718_v38 = vshll.u32 %v2593_v62, 16  ;;  %v5741_v52 = vld [vmem:[#allocation2 + $0x90] sm:$0xf0] }
 0x236   : > { %v2723_v30 = vshrl.u32 %v5687_v47, 16  ;;  %v2726_v18 = vshll.u32 %v5687_v47, 16  ;;  %v1617_v63 = vsel %vm1481_vm7, %v1608_v61, %v1616_v20  ;;  %v2717_v32 = vrot.slane %v2715_v24, 3  ;;  %v3089_v20 = vld [vmem:[#allocation2 + $0x48] sm:$0x1f] }
 0x237   : > { %4309 = vmatmul.mubr.msk.bf16.gmra.mrb[8].mxu1 %vm1218_vm5, %v2696_v43  ;;  %v2704_v4 = vor.u32 %v2703_v14, %v2700_v10  ;;  %v2909_v8 = vrot.slane %v5691_v13, 4  ;;  %4233 = vmatmul.mubr.msk.bf16.gmra.mrb[32].mxu0 %vm1218_vm5, %v1617_v63  ;;  %v2712_v22 = vor.u32 %v2711_v46, %v2708_v40  ;;  %v2720_v42 = vrot.slane %v2718_v38, 4  ;;  %v5729_v43 = vld [vmem:[#allocation2 + $0x80] sm:$0xf0] }
 0x238   : > { %v2725_v0 = vrot.slane %v2723_v30, 3  ;;  %v2728_v31 = vrot.slane %v2726_v18, 4  ;;  %v2910_v16 = vrot.slane %v5612_v33, 4  ;;  %v2912_v21 = vrot.slane %v2886_v39, 4 }
 0x239   : > { %v2713_v51 = vsel %vm497_vm1, %v2704_v4, %v2712_v22  ;;  %v2721_v59 = vor.u32 %v2720_v42, %v2717_v32  ;;  %v2913_v33 = vrot.slane %v5615_v17, 4  ;;  %v2915_v6 = vrot.slane %v5705_v12, 4 }
 0x23a   : > { %v2729_v11 = vor.u32 %v2728_v31, %v2725_v0  ;;  %4312 = vmatprep.mubr.msk.bf16.mxu1 %vm1218_vm5, %v2713_v51  ;;  %v2911_v34 = vsel %vm1176_vm6, %v2909_v8, %v2910_v16  ;;  %v2916_v1 = vrot.slane %v5636_v7, 4  ;;  %v2918_v17 = vrot.slane %v5714_v48, 4  ;;  %v3090_v0 = vld [vmem:[#allocation2 + $0x58] sm:$0x1f] }
 0x23b   : > { %v2914_v41 = vsel %vm1176_vm6, %v2912_v21, %v2913_v33  ;;  %v2919_v37 = vrot.slane %v5639_v29, 4  ;;  %v2921_v7 = vrot.slane %v5716_v19, 4  ;;  %v2922_v50 = vrot.slane %v5658_v58, 4 }
 0x23c   : > { %v2730_v57 = vsel %vm497_vm1, %v2721_v59, %v2729_v11  ;;  %v2917_v25 = vsel %vm1176_vm6, %v2915_v6, %v2916_v1  ;;  %v2924_v29 = vrot.slane %v5727_v60, 4  ;;  %v2925_v36 = vrot.slane %v5666_v28, 4  ;;  %v3091_v59 = vld [vmem:[#allocation2 + $0x68] sm:$0x1f] }
 0x23d   : > { %v2920_v56 = vsel %vm1176_vm6, %v2918_v17, %v2919_v37  ;;  %v2923_v44 = vsel %vm1176_vm6, %v2921_v7, %v2922_v50  ;;  %v3096_v58 = vshrl.u32 %v5691_v13, 16  ;;  %v3099_v53 = vshll.u32 %v5691_v13, 16 }
 0x23e   : > { %v2927_v55 = vrot.slane %v5729_v43, 4  ;;  %v2928_v3 = vrot.slane %v5683_v5, 4  ;;  %v2926_v62 = vsel %vm1176_vm6, %v2924_v29, %v2925_v36  ;;  %v3113_v61 = vshrl.u32 %v2886_v39, 16  ;;  %v3092_v36 = vld [vmem:[#allocation2 + $0x78] sm:$0x1f] }
 0x23f   : > { %4313 = vmatmul.mubr.msk.bf16.gmra.mrb[12].mxu1 %vm1218_vm5, %v2730_v57  ;;  %v3098_v2 = vrot.slane %v3096_v58, 4  ;;  %v3101_v26 = vrot.slane %v3099_v53, 5  ;;  %v3116_v10 = vshll.u32 %v2886_v39, 16  ;;  %v3121_v27 = vshrl.u32 %v3088_v15, 16  ;;  %v3093_v53 = vld [vmem:[#allocation2 + $0x88] sm:$0x1f] }
 0x240   : > { %4320 = vmatprep.mubr.msk.bf16.mxu1 %vm1218_vm5, %v2911_v34  ;;  %v2929_v23 = vsel %vm1176_vm6, %v2927_v55, %v2928_v3  ;;  %v3124_v13 = vshll.u32 %v3088_v15, 16  ;;  %v2930_v5 = vrot.slane %v5741_v52, 4  ;;  %v2931_v14 = vrot.slane %v5687_v47, 4 }
 0x241   : > { %v3102_v40 = vor.u32 %v3101_v26, %v3098_v2  ;;  %v3130_v24 = vshrl.u32 %v5705_v12, 16  ;;  %v3133_v38 = vshll.u32 %v5705_v12, 16  ;;  %v3138_v30 = vshrl.u32 %v3089_v20, 16 }
 0x242   : > { %v3141_v18 = vshll.u32 %v3089_v20, 16  ;;  %v3115_v63 = vrot.slane %v3113_v61, 4  ;;  %v3118_v4 = vrot.slane %v3116_v10, 5  ;;  %v3123_v32 = vrot.slane %v3121_v27, 4 }
 0x243   : > { %v3126_v8 = vrot.slane %v3124_v13, 5  ;;  %v2932_v22 = vsel %vm1176_vm6, %v2930_v5, %v2931_v14  ;;  %v3132_v42 = vrot.slane %v3130_v24, 4  ;;  %v3135_v16 = vrot.slane %v3133_v38, 5 }
 0x244   : > { %v3140_v47 = vrot.slane %v3138_v30, 4  ;;  %v3143_v51 = vrot.slane %v3141_v18, 5  ;;  %v3119_v11 = vor.u32 %v3118_v4, %v3115_v63  ;;  %v3147_v39 = vshrl.u32 %v5714_v48, 16 }
 0x245   : > { %v3127_v34 = vor.u32 %v3126_v8, %v3123_v32  ;;  %v3150_v57 = vshll.u32 %v5714_v48, 16  ;;  %v3155_v12 = vshrl.u32 %v3090_v0, 16  ;;  %v3158_v21 = vshll.u32 %v3090_v0, 16 }
 0x246   : > { %v3164_v33 = vshrl.u32 %v5716_v19, 16  ;;  %v3167_v6 = vshll.u32 %v5716_v19, 16  ;;  %v3172_v1 = vshrl.u32 %v3091_v59, 16  ;;  %v3149_v37 = vrot.slane %v3147_v39, 4 }
 0x247   : > { %4321 = vmatmul.mubr.msk.bf16.vlgmr.msra.gmra.mrb[0].mxu1 %vm1218_vm5, %v2914_v41  ;;  %v3175_v41 = vshll.u32 %v3091_v59, 16  ;;  %v3128_v17 = vsel %vm1481_vm7, %v3119_v11, %v3127_v34  ;;  %v3152_v7 = vrot.slane %v3150_v57, 5  ;;  %v3157_v50 = vrot.slane %v3155_v12, 4  ;;  %v4639_v11 = vld [vmem:[%s6035_s21] sm:$0xff]   ;;  %v4640_v34 = vld [vmem:[%s6036_s30 + $0x8] sm:$0xff]   ;;  %s3992_s21 = sshll.u32 %s6041_s14, 5 }
 0x248   : > { %4337 = vmatpush3.bf16.msra.mxu1 %v5663_v54  ;;  %4324 = vmatprep.mubr.msk.bf16.mxu1 %vm1218_vm5, %v2917_v25  ;;  %v3087_v54 = vld [vmem:[#allocation2 + $0x28] sm:$0x1f]  ;;  %v3136_v25 = vor.u32 %v3135_v16, %v3132_v42  ;;  %v3169_v48 = vrot.slane %v3167_v6, 5  ;;  %v3181_v19 = vshrl.u32 %v5727_v60, 16  ;;  %v3184_v55 = vshll.u32 %v5727_v60, 16  ;;  %s3716_s20 = sadd.s32 %s3997_s12, %s3992_s21 }
 0x249   : > { %4338 = vmatprep.subr.bf16.mxu1 %v4638_v35  ;;  %v3104_v9 = vshrl.u32 %v3087_v54, 16  ;;  %v3107_v45 = vshll.u32 %v3087_v54, 16  ;;  %v3174_v54 = vrot.slane %v3172_v1, 4  ;;  %v3177_v29 = vrot.slane %v3175_v41, 5  ;;  %4356 = vmatprep.subr.bf16.mxu0 %v4639_v11  ;;  %s3993_s5 = sshll.u32 %s3716_s20, 7 }
 0x24a   : > { %v3189_v3 = vshrl.u32 %v3092_v36, 16  ;;  %v3198_v26 = vshrl.u32 %v5729_v43, 16  ;;  %v3183_v61 = vrot.slane %v3181_v19, 4  ;;  %v3186_v10 = vrot.slane %v3184_v55, 5  ;;  %4357 = vmatpush3.bf16.msra.mxu0 %v4639_v11  ;;  %s5922_s7 = scalar_lea.hbm %s6043_s16, %s3993_s5 }
 0x24b   : > { %v3106_v28 = vrot.slane %v3104_v9, 4  ;;  %v3109_v49 = vrot.slane %v3107_v45, 5  ;;  %v3192_v9 = vshll.u32 %v3092_v36, 16  ;;  %v3153_v45 = vor.u32 %v3152_v7, %v3149_v37  ;;  %4358 = vmatprep.subr.bf16.mxu0 %v4640_v34 }
 0x24c   : > { %4339 = vmatpush3.bf16.msra.mxu1 %v4638_v35  ;;  %v3144_v35 = vor.u32 %v3143_v51, %v3140_v47  ;;  %v3178_v2 = vor.u32 %v3177_v29, %v3174_v54  ;;  %v3191_v27 = vrot.slane %v3189_v3, 4  ;;  %v3200_v5 = vrot.slane %v3198_v26, 4  ;;  %v5794_v54 = vld [vmem:[%s6037_s9] ss:$0 sm:$0xff] }
 0x24d   : > { %v3110_v46 = vor.u32 %v3109_v49, %v3106_v28  ;;  %v3206_v28 = vshrl.u32 %v3093_v53, 16  ;;  %v3209_v49 = vshll.u32 %v3093_v53, 16  ;;  %v3194_v13 = vrot.slane %v3192_v9, 5 }
 0x24e   : > { %v3145_v58 = vsel %vm1481_vm7, %v3136_v25, %v3144_v35  ;;  %v3187_v38 = vor.u32 %v3186_v10, %v3183_v61  ;;  %v3218_v18 = vshll.u32 %v5741_v52, 16  ;;  %4359 = vmatpush3.bf16.msra.mxu0 %v4640_v34 }
 0x24f   : > { %4325 = vmatmul.mubr.msk.bf16.gmra.mrb[4].mxu1 %vm1218_vm5, %v2920_v56  ;;  %v3111_v31 = vsel %vm1481_vm7, %v3102_v40, %v3110_v46  ;;  %v3160_v56 = vrot.slane %v3158_v21, 5  ;;  %v3208_v40 = vrot.slane %v3206_v28, 4  ;;  %v3211_v24 = vrot.slane %v3209_v49, 5  ;;  %v3094_v46 = vld [vmem:[#allocation2 + $0x98] sm:$0x1f] }
 0x250   : > { %4328 = vmatprep.mubr.msk.bf16.mxu1 %vm1218_vm5, %v2923_v44  ;;  %v3166_v44 = vrot.slane %v3164_v33, 4  ;;  %v3195_v30 = vor.u32 %v3194_v13, %v3191_v27  ;;  %v3223_v63 = vshrl.u32 %v3094_v46, 16  ;;  %v3226_v4 = vshll.u32 %v3094_v46, 16 }
 0x251   : > { %v3161_v15 = vor.u32 %v3160_v56, %v3157_v50  ;;  %v3212_v8 = vor.u32 %v3211_v24, %v3208_v40  ;;  %v3220_v0 = vrot.slane %v3218_v18, 5 }
 0x252   : > { %v3228_v16 = vrot.slane %v3226_v4, 5 }
 0x253   : > { %v3162_v60 = vsel %vm1481_vm7, %v3153_v45, %v3161_v15 }
 0x257   : > { %4329 = vmatmul.mubr.msk.bf16.gmra.mrb[8].mxu1 %vm1218_vm5, %v2926_v62  ;;  %v3170_v62 = vor.u32 %v3169_v48, %v3166_v44 }
 0x258   : > { %4332 = vmatprep.mubr.msk.bf16.mxu1 %vm1218_vm5, %v2929_v23  ;;  %v3201_v23 = vshll.u32 %v5729_v43, 16  ;;  %v3215_v43 = vshrl.u32 %v5741_v52, 16 }
 0x259   : > { %v3179_v20 = vsel %vm1481_vm7, %v3170_v62, %v3178_v2 }
 0x25a   : > { %v3203_v14 = vrot.slane %v3201_v23, 5  ;;  %v3217_v42 = vrot.slane %v3215_v43, 4 }
 0x25c   : > { %v3204_v32 = vor.u32 %v3203_v14, %v3200_v5  ;;  %v3221_v51 = vor.u32 %v3220_v0, %v3217_v42 }
 0x25e   : > { %v3213_v47 = vsel %vm1481_vm7, %v3204_v32, %v3212_v8 }
 0x25f   : > { %4333 = vmatmul.mubr.msk.bf16.gmra.mrb[12].mxu1 %vm1218_vm5, %v2932_v22  ;;  %v3196_v22 = vsel %vm1481_vm7, %v3187_v38, %v3195_v30 }
 0x260   : > { %4340 = vmatprep.mubr.msk.bf16.mxu1 %vm1218_vm5, %v3111_v31  ;;  %v3225_v31 = vrot.slane %v3223_v63, 4 }
 0x262   : > { %v3229_v59 = vor.u32 %v3228_v16, %v3225_v31 }
 0x264   : > { %v3230_v52 = vsel %vm1481_vm7, %v3221_v51, %v3229_v59 }
 0x267   : > { %4341 = vmatmul.mubr.msk.bf16.vlgmr.msra.gmra.mrb[0].mxu1 %vm1218_vm5, %v3128_v17 }
 0x268   : > { %4344 = vmatprep.mubr.msk.bf16.mxu1 %vm1218_vm5, %v3145_v58  ;;  %v5799_v58 = vld [vmem:[%s6038_s13] ss:$0 sm:$0xff]  ;;  %s4729_s13 = scalar_lea.vmem %s5924_s26, 2048 }
 0x269   : > { %p4730_p2 = scmp.ne.s32.totalorder %s5924_s26, %s4729_s13 }
 0x26b   : > { %p4731_p4 = pnand %p4730_p2, %p5009_p11 }
 0x26d   : > { %p4732_p9 = pneg %p4731_p4 }
 0x26f   : > { %4345 = vmatmul.mubr.msk.bf16.gmra.mrb[4].mxu1 %vm1218_vm5, %v3162_v60 }
 0x270   : > { %4348 = vmatprep.mubr.msk.bf16.mxu1 %vm1218_vm5, %v3179_v20 }
 0x277   : > { %4349 = vmatmul.mubr.msk.bf16.gmra.mrb[8].mxu1 %vm1218_vm5, %v3196_v22 }
 0x278   : > { %4352 = vmatprep.mubr.msk.bf16.mxu1 %vm1218_vm5, %v3213_v47 }
 0x27f   : > { %4353 = vmatmul.mubr.msk.bf16.gmra.mrb[12].mxu1 %vm1218_vm5, %v3230_v52 }
 0x2ec   : > { %v4222_v39 = vpop.f32.mrb[20].mxu0 }
 0x2ed   : > { %v1693_v57 = vpop.f32.mrb[21].mxu0 }
 0x2ee   : > { %v4223_v12 = vpop.f32.mrb[22].mxu0 }
 0x2ef   : > { %v1696_v21 = vpop.f32.mrb[23].mxu0 }
 0x2f4   : > { %v4226_v33 = vpop.f32.mrb[24].mxu0 }
 0x2f5   : > { %v1709_v6 = vpop.f32.mrb[25].mxu0 }
 0x2f6   : > { %v4227_v1 = vpop.f32.mrb[26].mxu0 }
 0x2f7   : > { %v1712_v41 = vpop.f32.mrb[27].mxu0 }
 0x300   : > { %v4230_v25 = vpop.f32.mrb[28].mxu0 }
 0x301   : > { %v1725_v35 = vpop.f32.mrb[29].mxu0 }
 0x302   : > { %v4231_v17 = vpop.f32.mrb[30].mxu0 }
 0x303   : > { %v1728_v37 = vpop.f32.mrb[31].mxu0 }
 0x30a   : > { %v5783_v7 = vpop.f32.mrb[32].mxu0 }
 0x30b   : > { %v5785_v50 = vpop.f32.mrb[33].mxu0 }
 0x30c   : > { %v5787_v56 = vpop.f32.mrb[34].mxu0 }
 0x30d   : > { %v5789_v44 = vpop.f32.mrb[35].mxu0 }
 0x33a   : > { %v4342_v48 = vpop.f32.mrb[0].mxu1 }
 0x33b   : > { %v4376_v29 = vadd.f32 %v4342_v48, %v4222_v39  ;;  %v3306_v36 = vpop.f32.mrb[1].mxu1 }
 0x33c   : > { %v4377_v53 = vadd.f32 %v3306_v36, %v1693_v57  ;;  %v4343_v19 = vpop.f32.mrb[2].mxu1 }
 0x33d   : > { %v3394_v55 = vmul.f32 %v4376_v29, %v5794_v54  ;;  %v4378_v3 = vadd.f32 %v4343_v19, %v4223_v12  ;;  %v3309_v9 = vpop.f32.mrb[3].mxu1 }
 0x33e   : > { %v3392_v45 = vmul.f32 %v4377_v53, %v5794_v54  ;;  %v4379_v15 = vadd.f32 %v3309_v9, %v1696_v21 }
 0x33f   : > { %v3417_v62 = vadd.f32 %v5799_v58, %v3394_v55  ;;  %v3395_v2 = vmul.f32 %v4378_v3, %v5794_v54 }
 0x340   : > { %v3415_v26 = vadd.f32 %v5799_v58, %v3392_v45  ;;  %v3393_v23 = vmul.f32 %v4379_v15, %v5794_v54 }
 0x341   : > { %v3418_v28 = vadd.f32 %v5799_v58, %v3395_v2  ;;  %v3433_v10 = vmax.f32 %v3417_v62, 0.0 }
 0x342   : > { %v3416_v49 = vadd.f32 %v5799_v58, %v3393_v23  ;;  %v4346_v61 = vpop.f32.mrb[4].mxu1  ;;  %v3431_v20 = vmax.f32 %v3415_v26, 0.0 }
 0x343   : > { %v3434_v27 = vmax.f32 %v3418_v28, 0.0  ;;  %v4380_v13 = vadd.f32 %v4346_v61, %v4226_v33  ;;  %v3322_v60 = vpop.f32.mrb[5].mxu1 }
 0x344   : > { %v3432_v5 = vmax.f32 %v3416_v49, 0.0  ;;  %v4381_v14 = vadd.f32 %v3322_v60, %v1709_v6  ;;  %v4347_v40 = vpop.f32.mrb[6].mxu1 }
 0x345   : > { %v3448_v24 = vpack.c.bf16 %v3434_v27, %v3433_v10  ;;  %v3398_v46 = vmul.f32 %v4380_v13, %v5794_v54  ;;  %v4382_v38 = vadd.f32 %v4347_v40, %v4227_v1  ;;  %v3325_v30 = vpop.f32.mrb[7].mxu1 }
 0x346   : > { %v3447_v43 = vpack.c.bf16 %v3432_v5, %v3431_v20  ;;  %v3396_v18 = vmul.f32 %v4381_v14, %v5794_v54  ;;  %v4383_v63 = vadd.f32 %v3325_v30, %v1712_v41 }
 0x347   : > { %v3421_v4 = vadd.f32 %v5799_v58, %v3398_v46  ;;  %v3399_v32 = vmul.f32 %v4382_v38, %v5794_v54 }
 0x348   : > { %v3419_v8 = vadd.f32 %v5799_v58, %v3396_v18  ;;  %v3397_v22 = vmul.f32 %v4383_v63, %v5794_v54  ;;  %4360 = vmatprep.mubr.msk.bf16.mxu0 %vm1218_vm5, %v3447_v43  ;;  %v3640_v43 = vld [vmem:[%s5126_s6 + $0x10] sm:$0xff] }
 0x349   : > { %v3422_v42 = vadd.f32 %v5799_v58, %v3399_v32  ;;  %4361 = vmatmul.mubr.msk.bf16.vlgmr.msra.gmra.mrb[36].mxu0 %vm1218_vm5, %v3448_v24  ;;  %v3437_v16 = vmax.f32 %v3421_v4, 0.0  ;;  %v3638_v32 = vld [vmem:[%s5126_s6] sm:$0xff] }
 0x34a   : > { %v3420_v0 = vadd.f32 %v5799_v58, %v3397_v22  ;;  %v4350_v31 = vpop.f32.mrb[8].mxu1  ;;  %v3435_v52 = vmax.f32 %v3419_v8, 0.0 }
 0x34b   : > { %v3438_v47 = vmax.f32 %v3422_v42, 0.0  ;;  %v4384_v51 = vadd.f32 %v4350_v31, %v4230_v25  ;;  %v3338_v59 = vpop.f32.mrb[9].mxu1 }
 0x34c   : > { %v3436_v11 = vmax.f32 %v3420_v0, 0.0  ;;  %v4385_v34 = vadd.f32 %v3338_v59, %v1725_v35  ;;  %v4351_v39 = vpop.f32.mrb[10].mxu1  ;;  %v3641_v0 = vld [vmem:[%s5126_s6 + $0x18] sm:$0xff] }
 0x34d   : > { %v3450_v57 = vpack.c.bf16 %v3438_v47, %v3437_v16  ;;  %v3402_v12 = vmul.f32 %v4384_v51, %v5794_v54  ;;  %v4386_v21 = vadd.f32 %v4351_v39, %v4231_v17  ;;  %v3341_v33 = vpop.f32.mrb[11].mxu1  ;;  %v3639_v51 = vld [vmem:[%s5126_s6 + $0x8] sm:$0xff] }
 0x34e   : > { %v3449_v6 = vpack.c.bf16 %v3436_v11, %v3435_v52  ;;  %v3400_v1 = vmul.f32 %v4385_v34, %v5794_v54  ;;  %v4387_v41 = vadd.f32 %v3341_v33, %v1728_v37 }
 0x34f   : > { %v3425_v48 = vadd.f32 %v5799_v58, %v3402_v12  ;;  %v3403_v29 = vmul.f32 %v4386_v21, %v5794_v54 }
 0x350   : > { %v3423_v25 = vadd.f32 %v5799_v58, %v3400_v1  ;;  %v3401_v36 = vmul.f32 %v4387_v41, %v5794_v54  ;;  %4364 = vmatprep.mubr.msk.bf16.mxu0 %vm1218_vm5, %v3449_v6  ;;  %v3644_v41 = vld [vmem:[%s5126_s6 + $0x30] sm:$0xff] }
 0x351   : > { %v3426_v35 = vadd.f32 %v5799_v58, %v3403_v29  ;;  %4365 = vmatmul.mubr.msk.bf16.gmra.mrb[40].mxu0 %vm1218_vm5, %v3450_v57  ;;  %v3441_v19 = vmax.f32 %v3425_v48, 0.0 }
 0x352   : > { %v3424_v17 = vadd.f32 %v5799_v58, %v3401_v36  ;;  %v4354_v53 = vpop.f32.mrb[12].mxu1  ;;  %v3439_v9 = vmax.f32 %v3423_v25, 0.0  ;;  %v3642_v36 = vld [vmem:[%s5126_s6 + $0x20] sm:$0xff] }
 0x353   : > { %v3442_v55 = vmax.f32 %v3426_v35, 0.0  ;;  %v4388_v37 = vadd.f32 %v4354_v53, %v5783_v7  ;;  %v3354_v3 = vpop.f32.mrb[13].mxu1 }
 0x354   : > { %v3440_v45 = vmax.f32 %v3424_v17, 0.0  ;;  %v4389_v15 = vadd.f32 %v3354_v3, %v5785_v50  ;;  %v4355_v62 = vpop.f32.mrb[14].mxu1 }
 0x355   : > { %v3452_v2 = vpack.c.bf16 %v3442_v55, %v3441_v19  ;;  %v3406_v26 = vmul.f32 %v4388_v37, %v5794_v54  ;;  %v4390_v23 = vadd.f32 %v4355_v62, %v5787_v56  ;;  %v3357_v28 = vpop.f32.mrb[15].mxu1  ;;  %v3645_v19 = vld [vmem:[%s5126_s6 + $0x38] sm:$0xff] }
 0x356   : > { %v3451_v49 = vpack.c.bf16 %v3440_v45, %v3439_v9  ;;  %v3404_v61 = vmul.f32 %v4389_v15, %v5794_v54  ;;  %v4391_v10 = vadd.f32 %v3357_v28, %v5789_v44  ;;  %v3643_v9 = vld [vmem:[%s5126_s6 + $0x28] sm:$0xff] }
 0x357   : > { %v3429_v27 = vadd.f32 %v5799_v58, %v3406_v26  ;;  %v3407_v7 = vmul.f32 %v4390_v23, %v5794_v54 }
 0x358   : > { %v3427_v13 = vadd.f32 %v5799_v58, %v3404_v61  ;;  %v3405_v50 = vmul.f32 %v4391_v10, %v5794_v54  ;;  %4368 = vmatprep.mubr.msk.bf16.mxu0 %vm1218_vm5, %v3451_v49  ;;  %v5848_v54 = vld [vmem:[%s6039_s11] ss:$0 sm:$0xff]  ;;  %s4735_s11 = scalar_lea.vmem %s4734_s10, 4096 }
 0x359   : > { %v3430_v60 = vadd.f32 %v5799_v58, %v3407_v7  ;;  %4369 = vmatmul.mubr.msk.bf16.gmra.mrb[44].mxu0 %vm1218_vm5, %v3452_v2  ;;  %v3445_v20 = vmax.f32 %v3429_v27, 0.0  ;;  %v3648_v7 = vld [vmem:[%s5126_s6 + $0x50] sm:$0xff]  ;;  %p4737_p10 = scmp.lt.s32.totalorder %s4735_s11, %s4729_s13 }
 0x35a   : > { %v3428_v56 = vadd.f32 %v5799_v58, %v3405_v50  ;;  %v3443_v44 = vmax.f32 %v3427_v13, 0.0  ;;  %v5853_v58 = vld [vmem:[%s6040_s25] ss:$0 sm:$0xff] }
 0x35b   : > { %v3446_v5 = vmax.f32 %v3430_v60, 0.0  ;;  %p4738_p12 = por %p4737_p10, %p4736_p6 }
 0x35c   : > { %v3444_v14 = vmax.f32 %v3428_v56, 0.0  ;;  %v3646_v56 = vld [vmem:[%s5126_s6 + $0x40] sm:$0xff] }
 0x35d   : > { %v3454_v40 = vpack.c.bf16 %v3446_v5, %v3445_v20  ;;  %p4739_p13 = pnand %p4738_p12, %p4732_p9 }
 0x35e   : > { %v3453_v24 = vpack.c.bf16 %v3444_v14, %v3443_v44  ;;  %v3649_v14 = vld [vmem:[%s5126_s6 + $0x58] sm:$0xff] }
 0x360   : > { %4372 = vmatprep.mubr.msk.bf16.mxu0 %vm1218_vm5, %v3453_v24 }
 0x361   : > { %4373 = vmatmul.mubr.msk.bf16.gmra.mrb[48].mxu0 %vm1218_vm5, %v3454_v40 }
 0x41c   : > { %v4362_v46 = vpop.f32.mrb[36].mxu0 }
 0x41d   : > { %v3601_v38 = vmul.f32 %v4362_v46, %v5848_v54  ;;  %v3529_v30 = vpop.f32.mrb[37].mxu0 }
 0x41e   : > { %v3599_v18 = vmul.f32 %v5848_v54, %v3529_v30  ;;  %v4363_v63 = vpop.f32.mrb[38].mxu0 }
 0x41f   : > { %v3624_v4 = vadd.f32 %v5853_v58, %v3601_v38  ;;  %v3602_v8 = vmul.f32 %v4363_v63, %v5848_v54  ;;  %v3532_v22 = vpop.f32.mrb[39].mxu0  ;;  %v3647_v38 = vld [vmem:[%s5126_s6 + $0x48] sm:$0xff] }
 0x420   : > { %v3622_v42 = vadd.f32 %v5853_v58, %v3599_v18  ;;  %v3600_v31 = vmul.f32 %v5848_v54, %v3532_v22 }
 0x421   : > { %v3656_v16 = vadd.f32 %v3640_v43, %v3624_v4  ;;  %v3625_v47 = vadd.f32 %v5853_v58, %v3602_v8 }
 0x422   : > { %v3654_v59 = vadd.f32 %v3638_v32, %v3622_v42  ;;  %v3623_v52 = vadd.f32 %v5853_v58, %v3600_v31 }
 0x423   : > { %v3672_v11 = vmax.f32 %v3656_v16, 0.0  ;;  %v3657_v34 = vadd.f32 %v3641_v0, %v3625_v47  ;;  %v3652_v16 = vld [vmem:[%s5126_s6 + $0x70] sm:$0xff] }
 0x424   : > { %v3670_v39 = vmax.f32 %v3654_v59, 0.0  ;;  %v3655_v57 = vadd.f32 %v3639_v51, %v3623_v52  ;;  %v4366_v12 = vpop.f32.mrb[40].mxu0  ;;  %v3650_v52 = vld [vmem:[%s5126_s6 + $0x60] sm:$0xff] }
 0x425   : > { %3688 = vst [vmem:[%s5319_s27 + $0x10] sm:$0xff] %v3672_v11  ;;  %v3673_v21 = vmax.f32 %v3657_v34, 0.0  ;;  %v3605_v33 = vmul.f32 %v4366_v12, %v5848_v54  ;;  %v3545_v6 = vpop.f32.mrb[41].mxu0 }
 0x426   : > { %3686 = vst [vmem:[%s5319_s27] sm:$0xff] %v3670_v39  ;;  %v3671_v1 = vmax.f32 %v3655_v57, 0.0  ;;  %v3603_v48 = vmul.f32 %v5848_v54, %v3545_v6  ;;  %v4367_v29 = vpop.f32.mrb[42].mxu0  ;;  %v3653_v57 = vld [vmem:[%s5126_s6 + $0x78] sm:$0xff]  ;;  %v3651_v6 = vld [vmem:[%s5126_s6 + $0x68] sm:$0xff]  ;;  %s3703_s6 = scalar_lea.sflag [#allocation5], %s5120_s17 }
 0x427   : > { %3689 = vst [vmem:[%s5319_s27 + $0x18] sm:$0xff] %v3673_v21  ;;  %v3628_v25 = vadd.f32 %v5853_v58, %v3605_v33  ;;  %v3606_v35 = vmul.f32 %v4367_v29, %v5848_v54  ;;  %v3548_v17 = vpop.f32.mrb[43].mxu0 }
 0x428   : > { %3687 = vst [vmem:[%s5319_s27 + $0x8] sm:$0xff] %v3671_v1  ;;  %v3626_v53 = vadd.f32 %v5853_v58, %v3603_v48  ;;  %v3604_v55 = vmul.f32 %v5848_v54, %v3548_v17 }
 0x429   : > { %v3660_v37 = vadd.f32 %v3644_v41, %v3628_v25  ;;  %v3629_v3 = vadd.f32 %v5853_v58, %v3606_v35 }
 0x42a   : > { %v3658_v45 = vadd.f32 %v3642_v36, %v3626_v53  ;;  %v3627_v15 = vadd.f32 %v5853_v58, %v3604_v55 }
 0x42b   : > { %v3676_v62 = vmax.f32 %v3660_v37, 0.0  ;;  %v3661_v2 = vadd.f32 %v3645_v19, %v3629_v3 }
 0x42c   : > { %v3674_v26 = vmax.f32 %v3658_v45, 0.0  ;;  %v3659_v23 = vadd.f32 %v3643_v9, %v3627_v15  ;;  %v4370_v28 = vpop.f32.mrb[44].mxu0 }
 0x42d   : > { %3692 = vst [vmem:[%s5319_s27 + $0x30] sm:$0xff] %v3676_v62  ;;  %v3677_v49 = vmax.f32 %v3661_v2, 0.0  ;;  %v3609_v61 = vmul.f32 %v4370_v28, %v5848_v54  ;;  %v3561_v10 = vpop.f32.mrb[45].mxu0 }
 0x42e   : > { %3690 = vst [vmem:[%s5319_s27 + $0x20] sm:$0xff] %v3674_v26  ;;  %v3675_v27 = vmax.f32 %v3659_v23, 0.0  ;;  %v3607_v13 = vmul.f32 %v5848_v54, %v3561_v10  ;;  %v4371_v50 = vpop.f32.mrb[46].mxu0 }
 0x42f   : > { %3693 = vst [vmem:[%s5319_s27 + $0x38] sm:$0xff] %v3677_v49  ;;  %v3632_v60 = vadd.f32 %v5853_v58, %v3609_v61  ;;  %v3610_v20 = vmul.f32 %v4371_v50, %v5848_v54  ;;  %v3564_v5 = vpop.f32.mrb[47].mxu0 }
 0x430   : > { %3691 = vst [vmem:[%s5319_s27 + $0x28] sm:$0xff] %v3675_v27  ;;  %v3630_v44 = vadd.f32 %v5853_v58, %v3607_v13  ;;  %v3608_v40 = vmul.f32 %v5848_v54, %v3564_v5 }
 0x431   : > { %v3664_v24 = vadd.f32 %v3648_v7, %v3632_v60  ;;  %v3633_v46 = vadd.f32 %v5853_v58, %v3610_v20 }
 0x432   : > { %v3662_v30 = vadd.f32 %v3646_v56, %v3630_v44  ;;  %v3631_v43 = vadd.f32 %v5853_v58, %v3608_v40 }
 0x433   : > { %v3680_v18 = vmax.f32 %v3664_v24, 0.0  ;;  %v3665_v63 = vadd.f32 %v3649_v14, %v3633_v46 }
 0x434   : > { %v3678_v4 = vmax.f32 %v3662_v30, 0.0  ;;  %v3663_v32 = vadd.f32 %v3647_v38, %v3631_v43  ;;  %v4374_v8 = vpop.f32.mrb[48].mxu0 }
 0x435   : > { %3696 = vst [vmem:[%s5319_s27 + $0x50] sm:$0xff] %v3680_v18  ;;  %v3681_v22 = vmax.f32 %v3665_v63, 0.0  ;;  %v3613_v42 = vmul.f32 %v4374_v8, %v5848_v54  ;;  %v3577_v0 = vpop.f32.mrb[49].mxu0 }
 0x436   : > { %3694 = vst [vmem:[%s5319_s27 + $0x40] sm:$0xff] %v3678_v4  ;;  %v3679_v31 = vmax.f32 %v3663_v32, 0.0  ;;  %v3611_v47 = vmul.f32 %v5848_v54, %v3577_v0  ;;  %v4375_v51 = vpop.f32.mrb[50].mxu0 }
 0x437   : > { %3697 = vst [vmem:[%s5319_s27 + $0x58] sm:$0xff] %v3681_v22  ;;  %v3636_v59 = vadd.f32 %v5853_v58, %v3613_v42  ;;  %v3614_v11 = vmul.f32 %v4375_v51, %v5848_v54  ;;  %v3580_v34 = vpop.f32.mrb[51].mxu0 }
 0x438   : > { %3695 = vst [vmem:[%s5319_s27 + $0x48] sm:$0xff] %v3679_v31  ;;  %v3634_v39 = vadd.f32 %v5853_v58, %v3611_v47  ;;  %v3612_v12 = vmul.f32 %v5848_v54, %v3580_v34 }
 0x439   : > { %v3668_v21 = vadd.f32 %v3652_v16, %v3636_v59  ;;  %v3637_v33 = vadd.f32 %v5853_v58, %v3614_v11 }
 0x43a   : > { %v3666_v1 = vadd.f32 %v3650_v52, %v3634_v39  ;;  %v3635_v41 = vadd.f32 %v5853_v58, %v3612_v12 }
 0x43b   : > { %v3684_v48 = vmax.f32 %v3668_v21, 0.0  ;;  %v3669_v29 = vadd.f32 %v3653_v57, %v3637_v33 }
 0x43c   : > { %v3682_v25 = vmax.f32 %v3666_v1, 0.0  ;;  %v3667_v36 = vadd.f32 %v3651_v6, %v3635_v41 }
 0x43d   : > { %3700 = vst [vmem:[%s5319_s27 + $0x70] sm:$0xff] %v3684_v48  ;;  %v3685_v54 = vmax.f32 %v3669_v29, 0.0 }
 0x43e   : > { %3698 = vst [vmem:[%s5319_s27 + $0x60] sm:$0xff] %v3682_v25  ;;  %v3683_v58 = vmax.f32 %v3667_v36, 0.0 }
 0x43f   : > { %3701 = vst [vmem:[%s5319_s27 + $0x78] sm:$0xff] %v3685_v54 }
 0x440   : > { %3699 = vst [vmem:[%s5319_s27 + $0x68] sm:$0xff] %v3683_v58 }
 0x441   : > { %4742 = shalt.err (!%p4739_p13)
}
 0x442   : > { %s4743_s27 = scalar_lea.hbm %s5922_s7, 2048  ;;  %s4747_s25 = scalar_lea.hbm %s6043_s16, 8192 }
 0x443   : > { %p4744_p5 = scmp.ne.s32.totalorder %s5922_s7, %s4743_s27  ;;  %p4748_p3 = scmp.lt.u32.totalorder %s5922_s7, %s6043_s16 }
 0x444   : > { %p4749_p7 = scmp.lt.u32.totalorder %s4747_s25, %s4743_s27  ;;  %p4751_p2 = scmp.lt.u32.totalorder %s4743_s27, %s5922_s7 }
 0x445   : > { %p4745_p8 = pnand %p4744_p5, %p5009_p11 }
 0x446   : > { %p4750_p1 = por %p4749_p7, %p4748_p3 }
 0x447   : > { %p4746_p0 = pneg %p4745_p8 }
 0x448   : > { %p4752_p4 = por %p4751_p2, %p4750_p1 }
 0x44a   : > { %p4753_p9 = pnand %p4752_p4, %p4746_p0 }
 0x44c   : > { %4756 = shalt.err (!%p4753_p9)
}
 0x44d   : > { %s4846_s21 = smov 128   ;;  %s4847_s20 = smov 8  }
 0x44e   : > { %4512 = dma.vmem_to_hbm [thread:$0]  (%p5009_p11), %s5924_s26, 2048, %s5922_s7, %s3703_s6, %s4846_s21, %s4846_s21, %s4847_s20  }
 0x44f PF: > { %s6044_s5 = sld [smem:[#allocation14_spill]]  ;;  %s6045_s0 = sld [smem:[#allocation16_spill]] }
 0x450   : > { %p4532_p6 = scmp.ge.s32.totalorder %s4835_s24, 2 }
 0x455   : > { %s3734_s9 = sand.u32 1, %s6044_s5   ;;  %p6046_p10 = scmp.ne.s32.totalorder %s6045_s0, 0 }
 0x456   : > { %s3735_s13 = scalar_lea.sflag [#allocation5], %s3734_s9 }
 0x457   : > { %p4526_p12 = pnand %p4532_p6, %p6046_p10 }
 0x459   : > { %4802 = dma.done.wait (!%p4526_p12), %s3735_s13, 2048  }
 0x45a   : > { %4804 = vsyncadd (!%p4526_p12), %s3735_s13, 4294965248  ;;  %s30_s24 = sadd.s32 1, %s4835_s24   ;;  %s6047_s28 = sld [smem:[#allocation20_spill]] }
 0x45b   : > { %p27_p13 = scmp.ge.s32.totalorder %s30_s24, 6   ;;  %s6048_s26 = sld [smem:[#allocation17_spill]] }
 0x45c   : > { %s6049_s8 = sld [smem:[#allocation19_spill]]  ;;  %s6050_s17 = smov %s4811_s18 }
 0x45d   : > { %s6051_s18 = smov %s4815_s19  ;;  %s6053_s20 = smov %s4827_s22 }
 0x45e   : > { %s6054_s21 = smov %s4831_s23  ;;  %29 = sbr.rel (!%p27_p13) target bundleno = 18 (0x12), region = 145 }
 0x460   : > { %s6052_s19 = smov %s6047_s28 }
 0x461   : > { %s6055_s22 = smov %s6048_s26 }
 0x462   : > { %s6056_s23 = smov %s6049_s8 }
 0x465   :  { %3740 = vsyncpa [#allocation4], 1 }
 0x466   :  { %3742 = vsyncpa [#allocation4 + $0x1], 1 }
 0x467   :  { %3743 = vsyncpa [#allocation7], 1 }
 0x468   :  { %3745 = vsyncpa [#allocation7 + $0x1], 1 }
 0x469   :  { %3746 = vsyncpa [#allocation5], 1 }
 0x46a   :  { %3748 = vsyncpa [#allocation5 + $0x1], 1 }

// kernel: tpu_custom_call.1
= control target key start
LH: loop header
LB: loop body
LE: loop exit
PB: predicated region body
PF: predicated region fallthrough
CT: control target
= control target key end

     0   :  { %s5981_s0 = inlined_call_operand.hbm [shape: f32[2,16,16,128], index: 0, kind: input, shape index: {}]   ;;  %s5982_s1 = inlined_call_operand.hbm [shape: f32[2,2,2,16,128], index: 1, kind: input, shape index: {}]   ;;  %s5983_s2 = inlined_call_operand.vmem [shape: bf16[128,32], index: 2, kind: input, shape index: {}]   ;;  %s5984_s3 = inlined_call_operand.vmem [shape: f32[1,32], index: 3, kind: input, shape index: {}]   ;;  %s5985_s4 = inlined_call_operand.vmem [shape: f32[1,32], index: 4, kind: input, shape index: {}]   ;;  %s5986_s5 = inlined_call_operand.hbm [shape: bf16[9,32,32], index: 5, kind: input, shape index: {}]   ;;  %s5987_s6 = inlined_call_operand.vmem [shape: f32[1,32], index: 6, kind: input, shape index: {}]   ;;  %s5988_s7 = inlined_call_operand.vmem [shape: f32[1,32], index: 7, kind: input, shape index: {}]   ;;  %s5989_s8 = inlined_call_operand.vmem [shape: bf16[32,128], index: 8, kind: input, shape index: {}]   ;;  %s5990_s9 = inlined_call_operand.vmem [shape: f32[1,128], index: 9, kind: input, shape index: {}]   ;;  %s5991_s10 = inlined_call_operand.vmem [shape: f32[1,128], index: 10, kind: input, shape index: {}]   ;;  %s5992_s11 = inlined_call_operand.hbm [shape: f32[2,16,16,128], index: 11, kind: output, shape index: {}]  }
   0x1   :  { %6004 = sst [smem:[#allocation21_spill]] %s5981_s0 }
   0x2   :  { %6005 = sst [smem:[#allocation22_spill]] %s5986_s5 }
   0x3   :  { %6006 = sst [smem:[#allocation23_spill]] %s5987_s6 }
   0x4   :  { %6007 = sst [smem:[#allocation24_spill]] %s5988_s7 }
   0x5   :  { %6008 = sst [smem:[#allocation25_spill]] %s5989_s8 }
   0x6   :  { %6009 = sst [smem:[#allocation26_spill]] %s5990_s9 }
   0x7   :  { %6010 = sst [smem:[#allocation27_spill]] %s5991_s10 }
   0x8   :  { %6011 = sst [smem:[#allocation28_spill]] %s5992_s11 }
   0x9   :  { %16 = vsyncpa [#allocation4], 0 }
   0xa   :  { %18 = vsyncpa [#allocation4 + $0x1], 0 }
   0xb   :  { %19 = vsyncpa [#allocation7], 0 }
   0xc   :  { %21 = vsyncpa [#allocation7 + $0x1], 0 }
   0xd   :  { %22 = vsyncpa [#allocation5], 0 }
   0xe   :  { %24 = vsyncpa [#allocation5 + $0x1], 0  ;;  %s4908_s17 = smov 0   ;;  %s4910_s18 = smov 0  }
   0xf   :  { %s4912_s19 = smov 0   ;;  %s4914_s20 = smov 0  }
  0x10   :  { %s4916_s21 = smov 0   ;;  %s4918_s22 = smov 0  }
  0x11   :  { %s4920_s23 = smov 0   ;;  %s4922_s24 = smov 0  }
  0x12 LB: > { %6012 = sst [smem:[#allocation14_spill]] %s4807_s17  ;;  %s4949_s25 = sadd.s32 4294967295, %s4835_s24   ;;  %s4835_s24 = sphi %s4922_s24, %s30_s24   ;;  %s4831_s23 = sphi %s4920_s23, %s6056_s23   ;;  %s4827_s22 = sphi %s4918_s22, %s6055_s22   ;;  %s4823_s21 = sphi %s4916_s21, %s6054_s21   ;;  %s4819_s20 = sphi %s4914_s20, %s6053_s20   ;;  %s4815_s19 = sphi %s4912_s19, %s6052_s19   ;;  %s4811_s18 = sphi %s4910_s18, %s6051_s18   ;;  %s4807_s17 = sphi %s4908_s17, %s6050_s17  }
  0x13   : > { %6013 = sst [smem:[#allocation15_spill]] %s4823_s21  ;;  %s3845_s26 = sadd.s32 4294967294, %s4835_s24  }
  0x14   : > { %p64_p0 = scmp.ne.s32.totalorder %s4811_s18, %s4807_s17  ;;  %p5996_p1 = scmp.eq.s32.totalorder %s4949_s25, 0 }
  0x15   : > { %p313_p3 = scmp.eq.s32.totalorder %s3845_s26, 3  ;;  %p3846_p5 = scmp.ge.s32.totalorder %s4835_s24, 1 }
  0x16   : > { %p4958_p4 = por %p5996_p1, %p64_p0  ;;  %p320_p7 = scmp.lt.s32.totalorder %s4835_s24, 5 }
  0x17   : > { %p4963_p6 = por %p313_p3, %p64_p0  ;;  %s4837_s30 = smov [#allocation8]  }
  0x18   : > { %s6014_s27 = scalar_select %p4958_p4, 1, 0 }
  0x19   : > { %s6015_s28 = scalar_select %p4963_p6, 1, 0 }
  0x1a   : > { %p4968_p8 = pnand %p3846_p5, %p320_p7  ;;  %s341_s12 = sshll.u32 %s4837_s30, 4  ;;  %s342_s12 = int_to_ptr.vmem [resolvable:$true] %s341_s12 }
  0x1b   : > { %6016 = sst [smem:[#allocation16_spill]] %s6015_s28  ;;  %s6019_s5 = sld [smem:[#allocation22_spill]] }
  0x1c   : > { %s6017_s29 = scalar_select %p4968_p8, 1, 0 }
  0x1d   : > { %p4514_p9 = pneg %p4968_p8 }
  0x1f   : > { %p4976_p10 = pnand %p4514_p9, %p5996_p1 }
  0x21   : > { %s4641_s16 = scalar_lea.hbm %s6019_s5, 2304  ;;  %p4643_p12 = pneg %p4976_p10 }
  0x22   : > { %p4642_p11 = scmp.ne.s32.totalorder %s6019_s5, %s4641_s16  ;;  %p4648_p3 = scmp.lt.u32.totalorder %s4641_s16, %s6019_s5 }
  0x24   : > { %p4644_p13 = pnand %p4643_p12, %p4642_p11 }
  0x26   : > { %p4645_p0 = pneg %p4644_p13 }
  0x28   : > { %p4650_p5 = pnand %p4648_p3, %p4645_p0 }
  0x2a   : > { %4653 = shalt.err (!%p4650_p5)
}
  0x2b   : > { %s4654_s11 = scalar_lea.vmem %s342_s12, 2304  ;;  %p4662_p2 = scmp.lt.s32.totalorder %s342_s12, %s342_s12 }
  0x2c   : > { %p4655_p7 = scmp.ne.s32.totalorder %s342_s12, %s4654_s11  ;;  %p4663_p6 = scmp.lt.s32.totalorder %s4654_s11, %s4654_s11 }
  0x2e   : > { %p4657_p9 = pnand %p4655_p7, %p4643_p12  ;;  %p4664_p4 = por %p4663_p6, %p4662_p2 }
  0x30   : > { %p4658_p1 = pneg %p4657_p9 }
  0x32   : > { %p4665_p8 = pnand %p4664_p4, %p4658_p1 }
  0x34   : > { %4668 = shalt.err (!%p4665_p8)
}
  0x35   : > { %s4838_s28 = smov 64   ;;  %s4839_s17 = smov 4  }
  0x36   : > { %4517 = dma.hbm_to_vmem [thread:$0]  (!%p4976_p10), %s6019_s5, 2304, %s342_s12, [#allocation7], %s4838_s28, %s4838_s28, %s4839_s17  }
  0x37   : > { %s39_s11 = sadd.s32 1, %s4827_s22  ;;  %s42_s16 = sadd.s32 1, %s4831_s23 }
  0x38   : > { %p40_p1 = scmp.ge.s32.totalorder %s39_s11, 2  ;;  %s51_s26 = sadd.s32 1, %s4815_s19 }
  0x39   : > { %p58_p2 = scmp.ne.s32.totalorder %s4815_s19, %s4811_s18  ;;  %p59_p4 = scmp.eq.s32.totalorder %s4835_s24, 0 }
  0x3a   : > { %s6058_s11 = smov (%p40_p1, %s39_s11), 0  ;;  %s6060_s16 = smov (!%p40_p1, %s42_s16), %s4831_s23 }
  0x3b   : > { %6020 = sst [smem:[#allocation17_spill]] %s6058_s11  ;;  %s47_s30 = ssub.s32 %s4827_s22, %s6058_s11 }
  0x3c   : > { %p44_p6 = scmp.ge.s32.totalorder %s6060_s16, 2  ;;  %p6021_p8 = scmp.eq.s32.totalorder %s4949_s25, 3 }
  0x3d   : > { %p5013_p10 = por %p59_p4, %p58_p2  ;;  %p4530_p12 = scmp.lt.s32.totalorder %s4835_s24, 4 }
  0x3e   : > { %p5009_p11 = por %p6021_p8, %p58_p2  ;;  %s6062_s16 = smov (%p44_p6, %s6060_s16), 0 }
  0x3f   : > { %6025 = sst [smem:[#allocation19_spill]] %s6062_s16  ;;  %s5021_s28 = sand.u32 1, %s4815_s19  }
  0x40   : > { %s6022_s13 = scalar_select %p5009_p11, 1, 0 }
  0x41   : > { %s3996_s17 = sshll.u32 %s4827_s22, 4  ;;  %s46_s14 = ssub.s32 %s4831_s23, %s6062_s16 }
  0x42   : > { %6023 = sst [smem:[#allocation18_spill]] %s6022_s13  ;;  %s48_s15 = sor.u32 %s47_s30, %s46_s14 }
  0x43   : > { %s3849_s5 = sshll.u32 %s5021_s28, 7  ;;  %p49_p13 = scmp.eq.s32.totalorder %s48_s15, 0 }
  0x44   : > { %s3852_s11 = sshll.u32 %s4831_s23, 5  ;;  %s374_s13 = scalar_lea.vmem [#allocation3], %s3849_s5 }
  0x45   : > { %s384_s21 = sshll.u32 %s374_s13, 4  ;;  %s381_s9 = sadd.s32 %s3996_s17, %s3852_s11  ;;  %s5031_s21 = int_to_ptr.vmem [resolvable:$true] %s384_s21 }
  0x46   : > { %s5029_s10 = scalar_select %p49_p13, %s4815_s19, %s51_s26  }
  0x47   : > { %s3853_s7 = sshll.u32 %s381_s9, 7  ;;  %p5037_p0 = pnand %p4530_p12, %p5013_p10 }
  0x48   : > { %6026 = sst [smem:[#allocation20_spill]] %s5029_s10  ;;  %s6028_s0 = sld [smem:[#allocation21_spill]] }
  0x49   : > { %s371_s5 = scalar_lea.sflag [#allocation4], %s5021_s28  ;;  %p4671_p5 = pneg %p5037_p0 }
  0x4e   : > { %s5044_s30 = scalar_lea.hbm %s6028_s0, %s3853_s7  ;;  %s4674_s8 = scalar_lea.hbm %s6028_s0, 8192 }
  0x4f   : > { %s4669_s11 = scalar_lea.hbm %s5044_s30, 2048  ;;  %p4675_p1 = scmp.lt.u32.totalorder %s5044_s30, %s6028_s0 }
  0x50   : > { %p4670_p3 = scmp.ne.s32.totalorder %s5044_s30, %s4669_s11  ;;  %p4676_p2 = scmp.lt.u32.totalorder %s4674_s8, %s4669_s11 }
  0x51   : > { %p4678_p6 = scmp.lt.u32.totalorder %s4669_s11, %s5044_s30 }
  0x52   : > { %p4672_p7 = pnand %p4671_p5, %p4670_p3  ;;  %p4677_p4 = por %p4676_p2, %p4675_p1 }
  0x54   : > { %p4673_p9 = pneg %p4672_p7  ;;  %p4679_p8 = por %p4678_p6, %p4677_p4 }
  0x56   : > { %p4680_p10 = pnand %p4679_p8, %p4673_p9 }
  0x58   : > { %4683 = shalt.err (!%p4680_p10)
}
  0x59   : > { %s4684_s13 = scalar_lea.vmem %s5031_s21, 2048  ;;  %s4840_s12 = smov [#allocation3]  }
  0x5a   : > { %p4685_p12 = scmp.ne.s32.totalorder %s5031_s21, %s4684_s13  ;;  %s4689_s17 = sshll.u32 %s4840_s12, 4  ;;  %s4690_s17 = int_to_ptr.vmem [resolvable:$false] %s4689_s17 }
  0x5b   : > { %s4691_s14 = scalar_lea.vmem %s4690_s17, 4096  ;;  %p4692_p7 = scmp.lt.s32.totalorder %s5031_s21, %s4690_s17 }
  0x5c   : > { %p4687_p13 = pnand %p4685_p12, %p4671_p5  ;;  %p4693_p1 = scmp.lt.s32.totalorder %s4691_s14, %s4684_s13 }
  0x5e   : > { %p4688_p3 = pneg %p4687_p13  ;;  %p4694_p2 = por %p4693_p1, %p4692_p7 }
  0x60   : > { %p4695_p4 = pnand %p4694_p2, %p4688_p3 }
  0x62   : > { %4698 = shalt.err (!%p4695_p4)
}
  0x63   : > { %s4841_s15 = smov 128   ;;  %s4842_s11 = smov 8  }
  0x64   : > { %4521 = dma.hbm_to_vmem [thread:$0]  (!%p5037_p0), %s5044_s30, 2048, %s5031_s21, %s371_s5, %s4841_s15, %s4841_s15, %s4842_s11  }
  0x65   : > { %s394_s9 = sand.u32 1, %s4835_s24   ;;  %s3854_s26 = sshll.u32 %s5021_s28, 5 }
  0x66   : > { %s3855_s8 = sshll.u32 %s4827_s22, 2  ;;  %s3856_s16 = sshll.u32 %s4831_s23, 3 }
  0x67   : > { %s404_s7 = sadd.s32 %s3856_s16, %s3855_s8  ;;  %s398_s13 = scalar_lea.vmem [#allocation6], %s3854_s26 }
  0x68   : > { %s407_s12 = sshll.u32 %s398_s13, 4  ;;  %s3857_s17 = sshll.u32 %s404_s7, 7  ;;  %s5081_s12 = int_to_ptr.vmem [resolvable:$true] %s407_s12 }
  0x69   : > { %s5086_s10 = scalar_lea.hbm %s5982_s1, %s3857_s17  ;;  %s5088_s21 = scalar_lea.sflag [#allocation7], %s394_s9 }
  0x6a   : > { %s4699_s28 = scalar_lea.hbm %s5086_s10, 512  ;;  %s4704_s26 = scalar_lea.hbm %s5982_s1, 2048 }
  0x6b   : > { %p4700_p9 = scmp.ne.s32.totalorder %s5086_s10, %s4699_s28  ;;  %p4705_p10 = scmp.lt.u32.totalorder %s5086_s10, %s5982_s1 }
  0x6c   : > { %p4706_p12 = scmp.lt.u32.totalorder %s4704_s26, %s4699_s28  ;;  %p4708_p3 = scmp.lt.u32.totalorder %s4699_s28, %s5086_s10 }
  0x6d   : > { %p4702_p6 = pnand %p4700_p9, %p4671_p5 }
  0x6e   : > { %p4707_p13 = por %p4706_p12, %p4705_p10 }
  0x6f   : > { %p4703_p8 = pneg %p4702_p6 }
  0x70   : > { %p4709_p7 = por %p4708_p3, %p4707_p13 }
  0x72   : > { %p4710_p1 = pnand %p4709_p7, %p4703_p8 }
  0x74   : > { %4713 = shalt.err (!%p4710_p1)
}
  0x75   : > { %s4714_s9 = scalar_lea.vmem %s5081_s12, 512  ;;  %s4843_s16 = smov [#allocation6]  }
  0x76   : > { %p4715_p2 = scmp.ne.s32.totalorder %s5081_s12, %s4714_s9  ;;  %s4719_s7 = sshll.u32 %s4843_s16, 4  ;;  %s4720_s7 = int_to_ptr.vmem [resolvable:$false] %s4719_s7 }
  0x77   : > { %s4721_s13 = scalar_lea.vmem %s4720_s7, 1024  ;;  %p4722_p6 = scmp.lt.s32.totalorder %s5081_s12, %s4720_s7 }
  0x78   : > { %p4717_p4 = pnand %p4715_p2, %p4671_p5  ;;  %p4723_p10 = scmp.lt.s32.totalorder %s4721_s13, %s4714_s9 }
  0x7a   : > { %p4718_p9 = pneg %p4717_p4  ;;  %p4724_p12 = por %p4723_p10, %p4722_p6 }
  0x7c   : > { %p4725_p13 = pnand %p4724_p12, %p4718_p9 }
  0x7e   : > { %4728 = shalt.err (!%p4725_p13)
}
  0x7f   : > { %4524 = dma.hbm_to_vmem [thread:$0]  (!%p5037_p0), %s5086_s10, 512, %s5081_s12, %s5088_s21, %s4841_s15, %s4841_s15, %s4842_s11  }
  0x80   : > { %p6029_p5 = scmp.ne.s32.totalorder %s6017_s29, 0 }
  0x81   : > { %s5120_s17 = sand.u32 (!%p6029_p5), 1, %s4811_s18   ;;  %p6030_p8 = scmp.ne.s32.totalorder (!%p6029_p5), %s6014_s27, 0 }
  0x82   : > { %419 = sbr.rel (%p6029_p5) target bundleno = 1103 (0x44f), region = 64  ;;  %s3859_s14 = sshll.u32 (!%p6029_p5), %s5120_s17, 7 }
  0x83   : > { %s422_s28 = scalar_lea.sflag (!%p6029_p5), [#allocation4], %s5120_s17  ;;  %s5126_s6 = scalar_lea.vmem (!%p6029_p5), [#allocation3], %s3859_s14 }
  0x89   : > { %4790 = dma.done.wait (%p6030_p8), %s422_s28, 2048  }
  0x8a   : > { %4792 = vsyncadd (%p6030_p8), %s422_s28, 4294965248  ;;  %s430_s10 = sand.u32 1, %s4949_s25   ;;  %s3860_s29 = sshll.u32 %s5120_s17, 5 }
  0x8b   : > { %s431_s15 = scalar_lea.sflag [#allocation7], %s430_s10  ;;  %s5134_s11 = scalar_lea.vmem [#allocation6], %s3860_s29 }
  0x8c   : > { %4794 = dma.done.wait (%p6030_p8), %s431_s15, 512  }
  0x8d   : > { %4796 = vsyncadd (%p6030_p8), %s431_s15, 4294966784  ;;  %p6031_p0 = scmp.eq.s32.totalorder %s4949_s25, 0 }
  0x8f   : > { %4798 = dma.done.wait (%p6031_p0), [#allocation7], 2304   ;;  %p6032_p3 = pmov %p6031_p0 }
  0x90   : > { %vm496_vm0 = vcmask 258052   ;;  %vm497_vm1 = vsmask.f32 4352  ;;  %v499_v1 = vld [vmem:[#allocation2 + $0x8] sm:$0x10]  ;;  %v4605_v8 = vld [vmem:[%s5983_s2] sm:$0xff]  }
  0x91   : > { %4800 = vsyncadd (%p6032_p3), [#allocation7], 4294964992  ;;  %v502_v2 = vld [vmem:[#allocation2 + $0x18] sm:$0x10]  ;;  %v505_v3 = vld [vmem:[#allocation2 + $0x28] sm:$0x10]  ;;  %4124 = vmatprep.subr.bf16.mxu0 %v4605_v8 }
  0x92   : > { %vm5145_vm2 = vmand %vm496_vm0, %vm497_vm1  ;;  %v508_v7 = vld [vmem:[#allocation2 + $0x38] sm:$0x10]  ;;  %v511_v10 = vld [vmem:[#allocation2 + $0x48] sm:$0x10]  ;;  %4125 = vmatpush3.bf16.msra.mxu0 %v4605_v8  ;;  %vm485_vm3 = vcmask 257024   ;;  %vm529_vm4 = vcmask 261124  }
  0x93   : > { %v500_v4 = vsel %vm5145_vm2, 0, %v499_v1  ;;  %v503_v5 = vsel %vm5145_vm2, 0, %v502_v2  ;;  %v506_v6 = vsel %vm5145_vm2, 0, %v505_v3  ;;  %v509_v9 = vsel %vm5145_vm2, 0, %v508_v7  ;;  %v514_v11 = vld [vmem:[#allocation2 + $0x58] sm:$0x10] }
  0x94   : > { %501 = vst [vmem:[#allocation2 + $0x8] sm:$0x10] %v500_v4  ;;  %504 = vst [vmem:[#allocation2 + $0x18] sm:$0x10] %v503_v5  ;;  %v4606_v12 = vld [vmem:[%s5983_s2 + $0x8] sm:$0xff]   ;;  %v512_v13 = vsel %vm5145_vm2, 0, %v511_v10 }
  0x95   : > { %507 = vst [vmem:[#allocation2 + $0x28] sm:$0x10] %v506_v6  ;;  %510 = vst [vmem:[#allocation2 + $0x38] sm:$0x10] %v509_v9  ;;  %v515_v14 = vsel %vm5145_vm2, 0, %v514_v11  ;;  %4126 = vmatprep.subr.bf16.mxu0 %v4606_v12  ;;  %v4607_v23 = vld [vmem:[%s5983_s2 + $0x10] sm:$0xff]  }
  0x96   : > { %v517_v15 = vld [vmem:[#allocation2 + $0x68] sm:$0x10]  ;;  %v520_v16 = vld [vmem:[#allocation2 + $0x78] sm:$0x10]  ;;  %513 = vst [vmem:[#allocation2 + $0x48] sm:$0x10] %v512_v13  ;;  %4127 = vmatpush3.bf16.msra.mxu0 %v4606_v12 }
  0x97   : > { %516 = vst [vmem:[#allocation2 + $0x58] sm:$0x10] %v515_v14  ;;  %v518_v17 = vsel %vm5145_vm2, 0, %v517_v15  ;;  %v521_v18 = vsel %vm5145_vm2, 0, %v520_v16  ;;  %v523_v19 = vld [vmem:[#allocation2 + $0x88] sm:$0x10]  ;;  %4128 = vmatprep.subr.bf16.mxu0 %v4607_v23 }
  0x98   : > { %v526_v20 = vld [vmem:[#allocation2 + $0x98] sm:$0x10]  ;;  %519 = vst [vmem:[#allocation2 + $0x68] sm:$0x10] %v518_v17  ;;  %522 = vst [vmem:[#allocation2 + $0x78] sm:$0x10] %v521_v18 }
  0x99   : > { %v524_v21 = vsel %vm5145_vm2, 0, %v523_v19  ;;  %v527_v22 = vsel %vm5145_vm2, 0, %v526_v20  ;;  %v4608_v24 = vld [vmem:[%s5983_s2 + $0x18] sm:$0xff]   ;;  %v535_v25 = vld [vmem:[%s5126_s6] sm:$0xff]  ;;  %v536_v27 = vld [vmem:[%s5126_s6 + $0x8] sm:$0xff]  ;;  %v4844_v3 = vmov 0  }
  0x9a   : > { %525 = vst [vmem:[#allocation2 + $0x88] sm:$0x10] %v524_v21  ;;  %528 = vst [vmem:[#allocation2 + $0x98] sm:$0x10] %v527_v22  ;;  %4129 = vmatpush3.bf16.msra.mxu0 %v4607_v23  ;;  %v4609_v26 = vld [vmem:[%s5983_s2 + $0x20] sm:$0xff]   ;;  %v551_v28 = vpack.c.bf16 %v536_v27, %v535_v25  ;;  %v4610_v29 = vld [vmem:[%s5983_s2 + $0x28] sm:$0xff]  }
  0x9b   : > { %4130 = vmatprep.subr.bf16.mxu0 %v4608_v24  ;;  %v4611_v30 = vld [vmem:[%s5983_s2 + $0x30] sm:$0xff]   ;;  %v4612_v31 = vld [vmem:[%s5983_s2 + $0x38] sm:$0xff]   ;;  %v4613_v34 = vld [vmem:[%s5983_s2] sm:$0xff]   ;;  %486 = vst.msk [vmem:[#allocation2] sm:$0xf] %vm485_vm3, %v4844_v3  ;;  %s5319_s27 = scalar_lea.vmem [#allocation9], %s3859_s14 }
  0x9c   : > { %4140 = vmatprep.mubr.bf16.mxu0 %v551_v28  ;;  %v537_v32 = vld [vmem:[%s5126_s6 + $0x10] sm:$0xff]  ;;  %v538_v33 = vld [vmem:[%s5126_s6 + $0x18] sm:$0xff]  ;;  %v539_v35 = vld [vmem:[%s5126_s6 + $0x20] sm:$0xff]  ;;  %487 = vst.msk [vmem:[#allocation2 + $0x10] sm:$0xf] %vm485_vm3, %v4844_v3  ;;  %p3883_p7 = scmp.le.s32.totalorder %s4819_s20, 0 }
  0x9d   : > { %v540_v36 = vld [vmem:[%s5126_s6 + $0x28] sm:$0xff]  ;;  %v552_v37 = vpack.c.bf16 %v538_v33, %v537_v32  ;;  %v541_v40 = vld [vmem:[%s5126_s6 + $0x30] sm:$0xff]  ;;  %v542_v41 = vld [vmem:[%s5126_s6 + $0x38] sm:$0xff]  ;;  %488 = vst.msk [vmem:[#allocation2 + $0x20] sm:$0xf] %vm485_vm3, %v4844_v3 }
  0x9e   : > { %4131 = vmatpush3.bf16.msra.mxu0 %v4608_v24  ;;  %v553_v38 = vpack.c.bf16 %v540_v36, %v539_v35  ;;  %v4614_v39 = vld [vmem:[%s5983_s2 + $0x8] sm:$0xff]   ;;  %v4615_v42 = vld [vmem:[%s5983_s2 + $0x10] sm:$0xff]   ;;  %v543_v43 = vld [vmem:[%s5126_s6 + $0x40] sm:$0xff]  ;;  %v554_v45 = vpack.c.bf16 %v542_v41, %v541_v40  ;;  %489 = vst.msk [vmem:[#allocation2 + $0x30] sm:$0xf] %vm485_vm3, %v4844_v3 }
  0x9f   : > { %4132 = vmatprep.subr.bf16.mxu0 %v4609_v26  ;;  %v544_v44 = vld [vmem:[%s5126_s6 + $0x48] sm:$0xff]  ;;  %v4616_v47 = vld [vmem:[%s5983_s2 + $0x18] sm:$0xff]   ;;  %v545_v48 = vld [vmem:[%s5126_s6 + $0x50] sm:$0xff]  ;;  %490 = vst.msk [vmem:[#allocation2 + $0x40] sm:$0xf] %vm485_vm3, %v4844_v3 }
  0xa0   : > { %v555_v46 = vpack.c.bf16 %v544_v44, %v543_v43  ;;  %v546_v49 = vld [vmem:[%s5126_s6 + $0x58] sm:$0xff]  ;;  %v4617_v50 = vld [vmem:[%s5983_s2 + $0x20] sm:$0xff]   ;;  %v548_v52 = vld [vmem:[%s5126_s6 + $0x68] sm:$0xff]  ;;  %491 = vst.msk [vmem:[#allocation2 + $0x50] sm:$0xf] %vm485_vm3, %v4844_v3 }
  0xa1   : > { %v547_v51 = vld [vmem:[%s5126_s6 + $0x60] sm:$0xff]  ;;  %v556_v53 = vpack.c.bf16 %v546_v49, %v545_v48  ;;  %v4618_v55 = vld [vmem:[%s5983_s2 + $0x28] sm:$0xff]   ;;  %v549_v56 = vld [vmem:[%s5126_s6 + $0x70] sm:$0xff]  ;;  %492 = vst.msk [vmem:[#allocation2 + $0x60] sm:$0xf] %vm485_vm3, %v4844_v3 }
  0xa2   : > { %4133 = vmatpush3.bf16.msra.mxu0 %v4609_v26  ;;  %v557_v54 = vpack.c.bf16 %v548_v52, %v547_v51  ;;  %v550_v57 = vld [vmem:[%s5126_s6 + $0x78] sm:$0xff]  ;;  %v4619_v58 = vld [vmem:[%s5983_s2 + $0x30] sm:$0xff]   ;;  %v831_v59 = vld [vmem:[%s5134_s11] sm:$0xff]  ;;  %493 = vst.msk [vmem:[#allocation2 + $0x70] sm:$0xf] %vm485_vm3, %v4844_v3 }
  0xa3   : > { %4134 = vmatprep.subr.bf16.mxu0 %v4610_v29  ;;  %v832_v60 = vld [vmem:[%s5134_s11 + $0x8] sm:$0xff]  ;;  %v558_v61 = vpack.c.bf16 %v550_v57, %v549_v56  ;;  %v4620_v63 = vld [vmem:[%s5983_s2 + $0x38] sm:$0xff]   ;;  %v833_v0 = vld [vmem:[%s5134_s11 + $0x10] sm:$0xff]  ;;  %494 = vst.msk [vmem:[#allocation2 + $0x80] sm:$0xf] %vm485_vm3, %v4844_v3 }
  0xa4   : > { %v835_v62 = vpack.c.bf16 %v832_v60, %v831_v59  ;;  %v834_v1 = vld [vmem:[%s5134_s11 + $0x18] sm:$0xff]  ;;  %495 = vst.msk [vmem:[#allocation2 + $0x90] sm:$0xf] %vm485_vm3, %v4844_v3  ;;  %531 = vst.msk [vmem:[#allocation2 + $0x8] sm:$0xf] %vm485_vm3, %v4844_v3 }
  0xa5   : > { %v836_v2 = vpack.c.bf16 %v834_v1, %v833_v0  ;;  %530 = vst.msk [vmem:[#allocation2] sm:$0xf0] %vm529_vm4, %v4844_v3  ;;  %533 = vst.msk [vmem:[#allocation2 + $0x90] sm:$0xf0] %vm529_vm4, %v4844_v3  ;;  %v5254_v4 = vld [vmem:[%s5984_s3] ss:$0 sm:$0xff] }
  0xa6   : > { %4135 = vmatpush3.bf16.msra.mxu0 %v4610_v29  ;;  %534 = vst.msk [vmem:[#allocation2 + $0x98] sm:$0xf] %vm485_vm3, %v4844_v3  ;;  %v5259_v6 = vld [vmem:[%s5985_s4] ss:$0 sm:$0xff] }
  0xa7   : > { %4136 = vmatprep.subr.bf16.mxu0 %v4611_v30 }
  0xaa   : > { %4137 = vmatpush3.bf16.msra.mxu0 %v4611_v30 }
  0xab   : > { %4138 = vmatprep.subr.bf16.mxu0 %v4612_v31 }
  0xae   : > { %4139 = vmatpush3.bf16.msra.mxu0 %v4612_v31 }
  0xaf   : > { %4156 = vmatprep.subr.bf16.mxu0 %v4613_v34 }
  0xb1   : > { %4141 = vmatmul.mubr.bf16.vlgmr.msra.gmra.mrb[0].mxu0 %v552_v37 }
  0xb2   : > { %4157 = vmatpush3.bf16.msra.mxu0 %v4613_v34  ;;  %4144 = vmatprep.mubr.bf16.mxu0 %v553_v38 }
  0xb3   : > { %4158 = vmatprep.subr.bf16.mxu0 %v4614_v39 }
  0xb6   : > { %4159 = vmatpush3.bf16.msra.mxu0 %v4614_v39 }
  0xb7   : > { %4160 = vmatprep.subr.bf16.mxu0 %v4615_v42 }
  0xb9   : > { %4145 = vmatmul.mubr.bf16.gmra.mrb[4].mxu0 %v554_v45 }
  0xba   : > { %4161 = vmatpush3.bf16.msra.mxu0 %v4615_v42  ;;  %4148 = vmatprep.mubr.bf16.mxu0 %v555_v46 }
  0xbb   : > { %4162 = vmatprep.subr.bf16.mxu0 %v4616_v47 }
  0xbe   : > { %4163 = vmatpush3.bf16.msra.mxu0 %v4616_v47 }
  0xbf   : > { %4164 = vmatprep.subr.bf16.mxu0 %v4617_v50 }
  0xc1   : > { %4149 = vmatmul.mubr.bf16.gmra.mrb[8].mxu0 %v556_v53 }
  0xc2   : > { %4165 = vmatpush3.bf16.msra.mxu0 %v4617_v50  ;;  %4152 = vmatprep.mubr.bf16.mxu0 %v557_v54 }
  0xc3   : > { %4166 = vmatprep.subr.bf16.mxu0 %v4618_v55 }
  0xc6   : > { %4167 = vmatpush3.bf16.msra.mxu0 %v4618_v55 }
  0xc7   : > { %4168 = vmatprep.subr.bf16.mxu0 %v4619_v58 }
  0xc9   : > { %4153 = vmatmul.mubr.bf16.gmra.mrb[12].mxu0 %v558_v61 }
  0xca   : > { %4169 = vmatpush3.bf16.msra.mxu0 %v4619_v58  ;;  %4172 = vmatprep.mubr.bf16.mxu0 %v835_v62 }
  0xcb   : > { %4170 = vmatprep.subr.bf16.mxu0 %v4620_v63 }
  0xce   : > { %4171 = vmatpush3.bf16.msra.mxu0 %v4620_v63 }
  0xd1   : > { %4173 = vmatmul.mubr.bf16.vlgmr.msra.gmra.mrb[16].mxu0 %v836_v2 }
 0x184   : > { %v4142_v5 = vpop.f32.mrb[0].mxu0 }
 0x185   : > { %v729_v7 = vmul.f32 %v4142_v5, %v5254_v4  ;;  %v657_v8 = vpop.f32.mrb[1].mxu0 }
 0x186   : > { %v727_v9 = vmul.f32 %v5254_v4, %v657_v8  ;;  %v4143_v10 = vpop.f32.mrb[2].mxu0 }
 0x187   : > { %v752_v11 = vadd.f32 %v5259_v6, %v729_v7  ;;  %v730_v12 = vmul.f32 %v4143_v10, %v5254_v4  ;;  %v660_v13 = vpop.f32.mrb[3].mxu0 }
 0x188   : > { %v750_v14 = vadd.f32 %v5259_v6, %v727_v9  ;;  %v728_v15 = vmul.f32 %v5254_v4, %v660_v13 }
 0x189   : > { %v753_v16 = vadd.f32 %v5259_v6, %v730_v12  ;;  %v768_v18 = vmax.f32 %v752_v11, 0.0 }
 0x18a   : > { %v751_v17 = vadd.f32 %v5259_v6, %v728_v15  ;;  %v766_v20 = vmax.f32 %v750_v14, 0.0 }
 0x18b   : > { %v769_v19 = vmax.f32 %v753_v16, 0.0 }
 0x18c   : > { %v767_v21 = vmax.f32 %v751_v17, 0.0  ;;  %v4146_v22 = vpop.f32.mrb[4].mxu0 }
 0x18d   : > { %v783_v23 = vpack.c.bf16 %v769_v19, %v768_v18  ;;  %v733_v24 = vmul.f32 %v4146_v22, %v5254_v4  ;;  %v673_v25 = vpop.f32.mrb[5].mxu0 }
 0x18e   : > { %v782_v26 = vpack.c.bf16 %v767_v21, %v766_v20  ;;  %v731_v27 = vmul.f32 %v5254_v4, %v673_v25  ;;  %v4147_v28 = vpop.f32.mrb[6].mxu0 }
 0x18f   : > { %v799_v29 = vrot.slane %v783_v23, 4  ;;  %v756_v30 = vadd.f32 %v5259_v6, %v733_v24  ;;  %v734_v31 = vmul.f32 %v4147_v28, %v5254_v4  ;;  %v676_v32 = vpop.f32.mrb[7].mxu0 }
 0x190   : > { %v798_v33 = vrot.slane %v782_v26, 4  ;;  %v754_v34 = vadd.f32 %v5259_v6, %v731_v27  ;;  %v732_v35 = vmul.f32 %v5254_v4, %v676_v32 }
 0x191   : > { %817 = vst.msk [vmem:[#allocation2 + $0x20] sm:$0xf0] %vm529_vm4, %v799_v29  ;;  %v757_v36 = vadd.f32 %v5259_v6, %v734_v31  ;;  %v772_v38 = vmax.f32 %v756_v30, 0.0 }
 0x192   : > { %818 = vst.msk [vmem:[#allocation2 + $0x28] sm:$0xf] %vm485_vm3, %v799_v29  ;;  %816 = vst.msk [vmem:[#allocation2 + $0x18] sm:$0xf] %vm485_vm3, %v798_v33  ;;  %v755_v37 = vadd.f32 %v5259_v6, %v732_v35  ;;  %v770_v40 = vmax.f32 %v754_v34, 0.0 }
 0x193   : > { %815 = vst.msk [vmem:[#allocation2 + $0x10] sm:$0xf0] %vm529_vm4, %v798_v33  ;;  %v773_v39 = vmax.f32 %v757_v36, 0.0 }
 0x194   : > { %v771_v41 = vmax.f32 %v755_v37, 0.0  ;;  %v4150_v42 = vpop.f32.mrb[8].mxu0 }
 0x195   : > { %v785_v43 = vpack.c.bf16 %v773_v39, %v772_v38  ;;  %v737_v44 = vmul.f32 %v4150_v42, %v5254_v4  ;;  %v689_v45 = vpop.f32.mrb[9].mxu0 }
 0x196   : > { %v784_v46 = vpack.c.bf16 %v771_v41, %v770_v40  ;;  %v735_v47 = vmul.f32 %v5254_v4, %v689_v45  ;;  %v4151_v48 = vpop.f32.mrb[10].mxu0 }
 0x197   : > { %v801_v49 = vrot.slane %v785_v43, 4  ;;  %v760_v50 = vadd.f32 %v5259_v6, %v737_v44  ;;  %v738_v51 = vmul.f32 %v4151_v48, %v5254_v4  ;;  %v692_v52 = vpop.f32.mrb[11].mxu0 }
 0x198   : > { %v800_v53 = vrot.slane %v784_v46, 4  ;;  %v758_v54 = vadd.f32 %v5259_v6, %v735_v47  ;;  %v736_v55 = vmul.f32 %v5254_v4, %v692_v52 }
 0x199   : > { %821 = vst.msk [vmem:[#allocation2 + $0x40] sm:$0xf0] %vm529_vm4, %v801_v49  ;;  %v761_v56 = vadd.f32 %v5259_v6, %v738_v51  ;;  %v776_v58 = vmax.f32 %v760_v50, 0.0 }
 0x19a   : > { %822 = vst.msk [vmem:[#allocation2 + $0x48] sm:$0xf] %vm485_vm3, %v801_v49  ;;  %820 = vst.msk [vmem:[#allocation2 + $0x38] sm:$0xf] %vm485_vm3, %v800_v53  ;;  %v759_v57 = vadd.f32 %v5259_v6, %v736_v55  ;;  %v774_v60 = vmax.f32 %v758_v54, 0.0 }
 0x19b   : > { %819 = vst.msk [vmem:[#allocation2 + $0x30] sm:$0xf0] %vm529_vm4, %v800_v53  ;;  %v777_v59 = vmax.f32 %v761_v56, 0.0 }
 0x19c   : > { %v775_v61 = vmax.f32 %v759_v57, 0.0  ;;  %v4154_v62 = vpop.f32.mrb[12].mxu0 }
 0x19d   : > { %v787_v63 = vpack.c.bf16 %v777_v59, %v776_v58  ;;  %v741_v0 = vmul.f32 %v4154_v62, %v5254_v4  ;;  %v705_v1 = vpop.f32.mrb[13].mxu0 }
 0x19e   : > { %v786_v2 = vpack.c.bf16 %v775_v61, %v774_v60  ;;  %v739_v3 = vmul.f32 %v5254_v4, %v705_v1  ;;  %v4155_v5 = vpop.f32.mrb[14].mxu0 }
 0x19f   : > { %v803_v7 = vrot.slane %v787_v63, 4  ;;  %v764_v8 = vadd.f32 %v5259_v6, %v741_v0  ;;  %v742_v9 = vmul.f32 %v4155_v5, %v5254_v4  ;;  %v708_v10 = vpop.f32.mrb[15].mxu0 }
 0x1a0   : > { %v802_v11 = vrot.slane %v786_v2, 4  ;;  %v762_v12 = vadd.f32 %v5259_v6, %v739_v3  ;;  %v740_v13 = vmul.f32 %v5254_v4, %v708_v10 }
 0x1a1   : > { %825 = vst.msk [vmem:[#allocation2 + $0x60] sm:$0xf0] %vm529_vm4, %v803_v7  ;;  %v765_v14 = vadd.f32 %v5259_v6, %v742_v9  ;;  %v780_v16 = vmax.f32 %v764_v8, 0.0 }
 0x1a2   : > { %826 = vst.msk [vmem:[#allocation2 + $0x68] sm:$0xf] %vm485_vm3, %v803_v7  ;;  %824 = vst.msk [vmem:[#allocation2 + $0x58] sm:$0xf] %vm485_vm3, %v802_v11  ;;  %v763_v15 = vadd.f32 %v5259_v6, %v740_v13  ;;  %v778_v18 = vmax.f32 %v762_v12, 0.0 }
 0x1a3   : > { %823 = vst.msk [vmem:[#allocation2 + $0x50] sm:$0xf0] %vm529_vm4, %v802_v11  ;;  %v781_v17 = vmax.f32 %v765_v14, 0.0 }
 0x1a4   : > { %v779_v19 = vmax.f32 %v763_v15, 0.0  ;;  %v4174_v20 = vpop.f32.mrb[16].mxu0 }
 0x1a5   : > { %v789_v21 = vpack.c.bf16 %v781_v17, %v780_v16  ;;  %v959_v22 = vmul.f32 %v4174_v20, %v5254_v4  ;;  %v935_v23 = vpop.f32.mrb[17].mxu0 }
 0x1a6   : > { %v788_v24 = vpack.c.bf16 %v779_v19, %v778_v18  ;;  %v957_v25 = vmul.f32 %v5254_v4, %v935_v23  ;;  %v4175_v26 = vpop.f32.mrb[18].mxu0 }
 0x1a7   : > { %v805_v27 = vrot.slane %v789_v21, 4  ;;  %v970_v28 = vadd.f32 %v5259_v6, %v959_v22  ;;  %v960_v29 = vmul.f32 %v4175_v26, %v5254_v4  ;;  %v938_v30 = vpop.f32.mrb[19].mxu0 }
 0x1a8   : > { %v804_v31 = vrot.slane %v788_v24, 4  ;;  %v968_v32 = vadd.f32 %v5259_v6, %v957_v25  ;;  %v958_v33 = vmul.f32 %v5254_v4, %v938_v30  ;;  %981 = sbr.rel (%p3883_p7) target bundleno = 436 (0x1b4), region = 80 }
 0x1a9   : > { %829 = vst.msk [vmem:[#allocation2 + $0x80] sm:$0xf0] %vm529_vm4, %v805_v27  ;;  %v971_v34 = vadd.f32 %v5259_v6, %v960_v29  ;;  %v974_v36 = vmax.f32 %v970_v28, 0.0 }
 0x1aa   : > { %830 = vst.msk [vmem:[#allocation2 + $0x88] sm:$0xf] %vm485_vm3, %v805_v27  ;;  %828 = vst.msk [vmem:[#allocation2 + $0x78] sm:$0xf] %vm485_vm3, %v804_v31  ;;  %v969_v35 = vadd.f32 %v5259_v6, %v958_v33  ;;  %v972_v38 = vmax.f32 %v968_v32, 0.0 }
 0x1ab   : > { %827 = vst.msk [vmem:[#allocation2 + $0x70] sm:$0xf0] %vm529_vm4, %v804_v31  ;;  %v975_v37 = vmax.f32 %v971_v34, 0.0 }
 0x1ac   : > { %v973_v39 = vmax.f32 %v969_v35, 0.0 }
 0x1ad   : > { %v977_v40 = vpack.c.bf16 %v975_v37, %v974_v36 }
 0x1ae   : > { %v976_v41 = vpack.c.bf16 %v973_v39, %v972_v38 }
 0x1b0   : > { %v983_v4 = vrot.slane %v976_v41, 4 }
 0x1b2   : > { %985 = vst.msk [vmem:[#allocation2] sm:$0xf0] %vm529_vm4, %v983_v4 }
 0x1b3   : > { %986 = vst.msk [vmem:[#allocation2 + $0x8] sm:$0xf] %vm485_vm3, %v983_v4 }
 0x1b4 PF: > { %p3884_p1 = scmp.ge.s32.totalorder %s4819_s20, 1 }
 0x1b5   : > { %v992_v6 = vrot.slane (!%p3884_p1), %v977_v40, 4 }
 0x1b6   : > { %990 = sbr.rel (%p3884_p1) target bundleno = 445 (0x1bd), region = 84 }
 0x1b7   : > { %994 = vst.msk [vmem:[#allocation2 + $0x90] sm:$0xf0] (!%p3884_p1), %vm529_vm4, %v992_v6 }
 0x1b8   : > { %995 = vst.msk [vmem:[#allocation2 + $0x98] sm:$0xf] (!%p3884_p1), %vm485_vm3, %v992_v6 }
 0x1bd PF: > { %v4621_v42 = vld [vmem:[#allocation8 + $0x30] sm:$0xff]   ;;  %v4622_v43 = vld [vmem:[#allocation8 + $0x38] sm:$0xff]   ;;  %v1774_v46 = vld [vmem:[#allocation2 + $0x20] sm:$0xf8]  ;;  %vm1218_vm5 = vcmask 261120   ;;  %vm1176_vm6 = vcmask 1043456  }
 0x1be   : > { %4236 = vmatprep.subr.bf16.mxu1 %v4621_v42  ;;  %v1772_v44 = vld [vmem:[#allocation2 + $0x10] sm:$0xf8]  ;;  %v5327_v45 = vld [vmem:[#allocation2 + $0x18] sm:$0xf]  ;;  %v5331_v51 = vld [vmem:[#allocation2 + $0x28] sm:$0xf] }
 0x1bf   : > { %4237 = vmatpush3.bf16.msra.mxu1 %v4621_v42  ;;  %v1789_v47 = vshrl.u32 %v1772_v44, 16  ;;  %v1792_v48 = vshll.u32 %v1772_v44, 16  ;;  %v1797_v49 = vshrl.u32 %v5327_v45, 16  ;;  %v1800_v50 = vshll.u32 %v5327_v45, 16  ;;  %v4623_v0 = vld [vmem:[#allocation8 + $0x40] sm:$0xff]   ;;  %v4624_v7 = vld [vmem:[#allocation8 + $0x48] sm:$0xff]  }
 0x1c0   : > { %4238 = vmatprep.subr.bf16.mxu1 %v4622_v43  ;;  %v1806_v52 = vshrl.u32 %v1774_v46, 16  ;;  %v1809_v53 = vshll.u32 %v1774_v46, 16  ;;  %v1814_v54 = vshrl.u32 %v5331_v51, 16  ;;  %v1817_v55 = vshll.u32 %v5331_v51, 16  ;;  %v1776_v3 = vld [vmem:[#allocation2 + $0x30] sm:$0xf8] }
 0x1c1   : > { %v1791_v56 = vrot.slane %v1789_v47, 3  ;;  %v1794_v57 = vrot.slane %v1792_v48, 4  ;;  %v1799_v58 = vrot.slane %v1797_v49, 3  ;;  %v1802_v59 = vrot.slane %v1800_v50, 4  ;;  %v5335_v5 = vld [vmem:[#allocation2 + $0x38] sm:$0xf] }
 0x1c2   : > { %v1808_v60 = vrot.slane %v1806_v52, 3  ;;  %v1811_v61 = vrot.slane %v1809_v53, 4  ;;  %v1816_v62 = vrot.slane %v1814_v54, 3  ;;  %v1819_v63 = vrot.slane %v1817_v55, 4  ;;  %v4625_v8 = vld [vmem:[#allocation8 + $0x10] sm:$0xff]   ;;  %v4626_v20 = vld [vmem:[#allocation8 + $0x18] sm:$0xff]  }
 0x1c3   : > { %4239 = vmatpush3.bf16.msra.mxu1 %v4622_v43  ;;  %v1795_v1 = vor.u32 %v1794_v57, %v1791_v56  ;;  %v1803_v2 = vor.u32 %v1802_v59, %v1799_v58  ;;  %v1823_v11 = vshrl.u32 %v1776_v3, 16  ;;  %v1826_v12 = vshll.u32 %v1776_v3, 16  ;;  %v1778_v13 = vld [vmem:[#allocation2 + $0x40] sm:$0xf8]  ;;  %v5337_v14 = vld [vmem:[#allocation2 + $0x48] sm:$0xf]  ;;  %4176 = vmatprep.subr.bf16.mxu0 %v4625_v8 }
 0x1c4   : > { %v1812_v9 = vor.u32 %v1811_v61, %v1808_v60  ;;  %v1820_v10 = vor.u32 %v1819_v63, %v1816_v62  ;;  %4256 = vmatprep.subr.bf16.mxu1 %v4623_v0  ;;  %v1831_v16 = vshrl.u32 %v5335_v5, 16  ;;  %v1834_v17 = vshll.u32 %v5335_v5, 16  ;;  %v1780_v19 = vld [vmem:[#allocation2 + $0x50] sm:$0xf8]  ;;  %v5344_v25 = vld [vmem:[#allocation2 + $0x58] sm:$0xf]  ;;  %4177 = vmatpush3.bf16.msra.mxu0 %v4625_v8 }
 0x1c5   : > { %v1804_v15 = vsel %vm497_vm1, %v1795_v1, %v1803_v2  ;;  %v1840_v18 = vshrl.u32 %v1778_v13, 16  ;;  %v1825_v22 = vrot.slane %v1823_v11, 3  ;;  %v1828_v23 = vrot.slane %v1826_v12, 4  ;;  %v1782_v30 = vld [vmem:[#allocation2 + $0x60] sm:$0xf8]  ;;  %4178 = vmatprep.subr.bf16.mxu0 %v4626_v20  ;;  %v5351_v36 = vld [vmem:[#allocation8 + $0x50] sm:$0xff]  }
 0x1c6   : > { %4240 = vmatprep.mubr.msk.bf16.mxu1 %vm1218_vm5, %v1804_v15  ;;  %v1821_v21 = vsel %vm497_vm1, %v1812_v9, %v1820_v10  ;;  %v1843_v24 = vshll.u32 %v1778_v13, 16  ;;  %v1833_v26 = vrot.slane %v1831_v16, 3  ;;  %v1836_v27 = vrot.slane %v1834_v17, 4  ;;  %v5349_v35 = vld [vmem:[#allocation2 + $0x68] sm:$0xf]  ;;  %v5354_v41 = vld [vmem:[#allocation8] sm:$0xff]  }
 0x1c7   : > { %4241 = vmatmul.mubr.msk.bf16.vlgmr.msra.gmra.mrb[0].mxu1 %vm1218_vm5, %v1821_v21  ;;  %v1842_v28 = vrot.slane %v1840_v18, 3  ;;  %v1848_v29 = vshrl.u32 %v5337_v14, 16  ;;  %v1829_v31 = vor.u32 %v1828_v23, %v1825_v22  ;;  %v1851_v33 = vshll.u32 %v5337_v14, 16  ;;  %v1784_v57 = vld [vmem:[#allocation2 + $0x70] sm:$0xf8]  ;;  %s6035_s21 = sld [smem:[#allocation25_spill]] }
 0x1c8   : > { %4257 = vmatpush3.bf16.msra.mxu1 %v4623_v0  ;;  %v1845_v32 = vrot.slane %v1843_v24, 4  ;;  %v1857_v34 = vshrl.u32 %v1780_v19, 16  ;;  %v1837_v37 = vor.u32 %v1836_v27, %v1833_v26  ;;  %v1860_v39 = vshll.u32 %v1780_v19, 16  ;;  %4179 = vmatpush3.bf16.msra.mxu0 %v4626_v20  ;;  %v5362_v58 = vld [vmem:[#allocation2 + $0x78] sm:$0xf]  ;;  %s6037_s9 = sld [smem:[#allocation23_spill]] }
 0x1c9   : > { %v1850_v38 = vrot.slane %v1848_v29, 3  ;;  %v1865_v40 = vshrl.u32 %v5344_v25, 16  ;;  %4258 = vmatprep.subr.bf16.mxu1 %v4624_v7  ;;  %v1853_v6 = vrot.slane %v1851_v33, 4  ;;  %v1868_v43 = vshll.u32 %v5344_v25, 16  ;;  %4196 = vmatprep.subr.bf16.mxu0 %v5354_v41  ;;  %v1786_v63 = vld [vmem:[#allocation2 + $0x80] sm:$0xf8] }
 0x1ca   : > { %v1846_v4 = vor.u32 %v1845_v32, %v1842_v28  ;;  %v1859_v42 = vrot.slane %v1857_v34, 3  ;;  %v1838_v44 = vsel %vm497_vm1, %v1829_v31, %v1837_v37  ;;  %v1862_v46 = vrot.slane %v1860_v39, 4  ;;  %v5366_v0 = vld [vmem:[#allocation2 + $0x88] sm:$0xf]  ;;  %v5375_v18 = vld [vmem:[#allocation2] sm:$0xf0] }
 0x1cb   : > { %v1867_v47 = vrot.slane %v1865_v40, 3  ;;  %v1874_v48 = vshrl.u32 %v1782_v30, 16  ;;  %4244 = vmatprep.mubr.msk.bf16.mxu1 %vm1218_vm5, %v1838_v44  ;;  %v1854_v49 = vor.u32 %v1853_v6, %v1850_v38  ;;  %v1870_v50 = vrot.slane %v1868_v43, 4  ;;  %v5372_v12 = vld [vmem:[#allocation2 + $0x8] sm:$0xf]  ;;  %s6038_s13 = sld [smem:[#allocation24_spill]] }
 0x1cc   : > { %v1877_v52 = vshll.u32 %v1782_v30, 16  ;;  %v1882_v53 = vshrl.u32 %v5349_v35, 16  ;;  %4259 = vmatpush3.bf16.msra.mxu1 %v4624_v7  ;;  %v1863_v54 = vor.u32 %v1862_v46, %v1859_v42  ;;  %v1885_v56 = vshll.u32 %v5349_v35, 16  ;;  %v5378_v23 = vld [vmem:[#allocation2 + $0x18] sm:$0xf]  ;;  %s6039_s11 = sld [smem:[#allocation26_spill]] }
 0x1cd   : > { %v1876_v55 = vrot.slane %v1874_v48, 3  ;;  %4276 = vmatprep.subr.bf16.mxu1 %v5351_v36  ;;  %v1855_v59 = vsel %vm497_vm1, %v1846_v4, %v1854_v49  ;;  %v1871_v60 = vor.u32 %v1870_v50, %v1867_v47  ;;  %v1891_v2 = vshrl.u32 %v1784_v57, 16  ;;  %v1153_v29 = vld [vmem:[#allocation2 + $0x10] sm:$0xf0]  ;;  %v5386_v37 = vld [vmem:[#allocation2 + $0x20] sm:$0xf0]  ;;  %s6036_s30 = smov %s6035_s21 }
 0x1ce   : > { %v1879_v61 = vrot.slane %v1877_v52, 4  ;;  %v1884_v62 = vrot.slane %v1882_v53, 3  ;;  %v1887_v1 = vrot.slane %v1885_v56, 4  ;;  %v1894_v3 = vshll.u32 %v1784_v57, 16  ;;  %v5383_v30 = vld [vmem:[#allocation2 + $0x10] sm:$0xf0] }
 0x1cf   : > { %4245 = vmatmul.mubr.msk.bf16.gmra.mrb[4].mxu1 %vm1218_vm5, %v1855_v59  ;;  %v1899_v7 = vshrl.u32 %v5362_v58, 16  ;;  %v1872_v8 = vsel %vm497_vm1, %v1863_v54, %v1871_v60  ;;  %v1902_v10 = vshll.u32 %v5362_v58, 16  ;;  %v1908_v11 = vshrl.u32 %v1786_v63, 16  ;;  %v5394_v46 = vld [vmem:[#allocation2 + $0x28] sm:$0xf]  ;;  %s6040_s25 = sld [smem:[#allocation27_spill]] }
 0x1d0   : > { %v1880_v9 = vor.u32 %v1879_v61, %v1876_v55  ;;  %4248 = vmatprep.mubr.msk.bf16.mxu1 %vm1218_vm5, %v1872_v8  ;;  %v1888_v13 = vor.u32 %v1887_v1, %v1884_v62  ;;  %v1893_v15 = vrot.slane %v1891_v2, 3  ;;  %v1896_v16 = vrot.slane %v1894_v3, 4  ;;  %v5399_v52 = vld [vmem:[#allocation2 + $0x20] sm:$0xf0]  ;;  %v4630_v53 = vld [vmem:[#allocation8 + $0x8] sm:$0xff]   ;;  %s6041_s14 = sld [smem:[#allocation15_spill]] }
 0x1d1   : > { %v1901_v17 = vrot.slane %v1899_v7, 3  ;;  %v1904_v19 = vrot.slane %v1902_v10, 4  ;;  %v1910_v20 = vrot.slane %v1908_v11, 3  ;;  %v1911_v21 = vshll.u32 %v1786_v63, 16  ;;  %v5405_v59 = vld [vmem:[#allocation2 + $0x38] sm:$0xf] }
 0x1d2   : > { %v1916_v22 = vshrl.u32 %v5366_v0, 16  ;;  %v1889_v24 = vsel %vm497_vm1, %v1880_v9, %v1888_v13  ;;  %v1897_v26 = vor.u32 %v1896_v16, %v1893_v15  ;;  %v1919_v27 = vshll.u32 %v5366_v0, 16  ;;  %v5410_v63 = vld [vmem:[#allocation2 + $0x30] sm:$0xf0]  ;;  %v5419_v7 = vld [vmem:[#allocation2 + $0x40] sm:$0xf0] }
 0x1d3   : > { %v1177_v28 = vrot.slane %v5375_v18, 4  ;;  %v1905_v31 = vor.u32 %v1904_v19, %v1901_v17  ;;  %v1913_v32 = vrot.slane %v1911_v21, 4  ;;  %v1178_v34 = vrot.slane %v5372_v12, 4  ;;  %v5412_v1 = vld [vmem:[#allocation2 + $0x30] sm:$0xf0]  ;;  %s3997_s12 = sshll.u32 %s4819_s20, 4 }
 0x1d4   : > { %v1918_v33 = vrot.slane %v1916_v22, 3  ;;  %v2106_v38 = vrot.slane %v5331_v51, 4  ;;  %v1921_v39 = vrot.slane %v1919_v27, 4  ;;  %v1483_v40 = vshrl.u32 %v5375_v18, 16  ;;  %v5421_v8 = vld [vmem:[#allocation2 + $0x48] sm:$0xf] }
 0x1d5   : > { %v1486_v4 = vshll.u32 %v5375_v18, 16  ;;  %v1906_v6 = vsel %vm497_vm1, %v1897_v26, %v1905_v31  ;;  %v1914_v42 = vor.u32 %v1913_v32, %v1910_v20  ;;  %v1179_v43 = vsel %vm1176_vm6, %v1177_v28, %v1178_v34  ;;  %v5428_v15 = vld [vmem:[#allocation2 + $0x40] sm:$0xf0]  ;;  %v5435_v21 = vld [vmem:[#allocation2 + $0x58] sm:$0xf]  ;;  %s3719_s26 = sshll.u32 %s5319_s27, 4  ;;  %s5924_s26 = int_to_ptr.vmem [resolvable:$true] %s3719_s26 }
 0x1d6   : > { %v1038_v44 = vshrl.u32 %v5378_v23, 16  ;;  %v1922_v47 = vor.u32 %v1921_v39, %v1918_v33  ;;  %4180 = vmatprep.mubr.msk.bf16.mxu0 %vm1218_vm5, %v1179_v43  ;;  %v1180_v48 = vrot.slane %v1153_v29, 4  ;;  %v1181_v49 = vrot.slane %v5378_v23, 4  ;;  %v5437_v22 = vld [vmem:[#allocation8 + $0x20] sm:$0xff]   ;;  %v5443_v27 = vld [vmem:[#allocation2 + $0x50] sm:$0xf0] }
 0x1d7   : > { %4249 = vmatmul.mubr.msk.bf16.gmra.mrb[8].mxu1 %vm1218_vm5, %v1889_v24  ;;  %v1500_v50 = vshrl.u32 %v1153_v29, 16  ;;  %v1041_v54 = vshll.u32 %v5378_v23, 16  ;;  %v1503_v55 = vshll.u32 %v1153_v29, 16  ;;  %v2102_v56 = vrot.slane %v5383_v30, 4  ;;  %v5451_v33 = vld [vmem:[#allocation2 + $0x60] sm:$0xf0] }
 0x1d8   : > { %4252 = vmatprep.mubr.msk.bf16.mxu1 %vm1218_vm5, %v1906_v6  ;;  %v2103_v57 = vrot.slane %v5327_v45, 4  ;;  %v1182_v60 = vsel %vm1176_vm6, %v1180_v48, %v1181_v49  ;;  %v2105_v61 = vrot.slane %v5386_v37, 4  ;;  %v1183_v62 = vrot.slane %v5399_v52, 4  ;;  %v5461_v43 = vld [vmem:[#allocation2 + $0x60] sm:$0xf0]  ;;  %s6043_s16 = sld [smem:[#allocation28_spill]] }
 0x1d9   : > { %v1923_v2 = vsel %vm497_vm1, %v1914_v42, %v1922_v47  ;;  %4181 = vmatmul.mubr.msk.bf16.vlgmr.msra.gmra.mrb[20].mxu0 %vm1218_vm5, %v1182_v60  ;;  %v5416_v3 = vrot.slane %v1500_v50, 4  ;;  %v1184_v45 = vrot.slane %v5394_v46, 4  ;;  %v5423_v9 = vrot.slane %v1503_v55, 5  ;;  %v5459_v42 = vld [vmem:[#allocation2 + $0x68] sm:$0xf]  ;;  %s4845_s28 = smov [#allocation9]  }
 0x1da   : > { %v1186_v10 = vrot.slane %v5410_v63, 4  ;;  %v1187_v11 = vrot.slane %v5405_v59, 4  ;;  %v2108_v13 = vrot.slane %v5412_v1, 4  ;;  %4197 = vmatpush3.bf16.msra.mxu0 %v5354_v41  ;;  %v2109_v17 = vrot.slane %v5335_v5, 4  ;;  %v5445_v5 = vld [vmem:[#allocation2 + $0x50] sm:$0xf0] }
 0x1db   : > { %v1185_v16 = vsel %vm1176_vm6, %v1183_v62, %v1184_v45  ;;  %v2111_v19 = vrot.slane %v5419_v7, 4  ;;  %v1189_v20 = vrot.slane %v5428_v15, 4  ;;  %4198 = vmatprep.subr.bf16.mxu0 %v4630_v53  ;;  %v2104_v24 = vsel %vm1176_vm6, %v2102_v56, %v2103_v57  ;;  %v5471_v49 = vld [vmem:[#allocation2 + $0x70] sm:$0xf0]  ;;  %v4628_v57 = vld [vmem:[#allocation8 + $0x58] sm:$0xff]   ;;  %s4733_s10 = sshll.u32 %s4845_s28, 4  ;;  %s4734_s10 = int_to_ptr.vmem [resolvable:$false] %s4733_s10 }
 0x1dc   : > { %4184 = vmatprep.mubr.msk.bf16.mxu0 %vm1218_vm5, %v1185_v16  ;;  %v2112_v26 = vrot.slane %v5337_v14, 4  ;;  %v1190_v41 = vrot.slane %v5421_v8, 4  ;;  %v1192_v28 = vrot.slane %v5443_v27, 4  ;;  %v1193_v29 = vrot.slane %v5435_v21, 4  ;;  %v5483_v60 = vld [vmem:[#allocation2 + $0x70] sm:$0xf0]  ;;  %p4736_p6 = scmp.lt.s32.totalorder %s5924_s26, %s4734_s10 }
 0x1dd   : > { %v2114_v31 = vrot.slane %v5445_v5, 4  ;;  %v2115_v32 = vrot.slane %v5344_v25, 4  ;;  %v1188_v14 = vsel %vm1176_vm6, %v1186_v10, %v1187_v11  ;;  %v2117_v34 = vrot.slane %v5451_v33, 4  ;;  %v5463_v25 = vld [vmem:[#allocation2 + $0x78] sm:$0xf] }
 0x1de   : > { %v2118_v39 = vrot.slane %v5349_v35, 4  ;;  %4199 = vmatpush3.bf16.msra.mxu0 %v4630_v53  ;;  %v1191_v6 = vsel %vm1176_vm6, %v1189_v20, %v1190_v41  ;;  %v2107_v47 = vsel %vm1176_vm6, %v2105_v61, %v2106_v38  ;;  %v1195_v48 = vrot.slane %v5461_v43, 4  ;;  %v5485_v61 = vld [vmem:[#allocation2 + $0x80] sm:$0xf0] }
 0x1df   : > { %4253 = vmatmul.mubr.msk.bf16.gmra.mrb[12].mxu1 %vm1218_vm5, %v1923_v2  ;;  %4216 = vmatprep.subr.bf16.mxu0 %v5437_v22  ;;  %v1196_v35 = vrot.slane %v5459_v42, 4  ;;  %v1199_v50 = vrot.slane %v5463_v25, 4  ;;  %v2110_v53 = vsel %vm1176_vm6, %v2108_v13, %v2109_v17  ;;  %v5477_v55 = vsel %vm1176_vm6, %v2111_v19, %v2112_v26 }
 0x1e0   : > { %4260 = vmatprep.mubr.msk.bf16.mxu1 %vm1218_vm5, %v2104_v24  ;;  %v1198_v56 = vrot.slane %v5471_v49, 4  ;;  %v2121_v51 = vrot.slane %v5362_v58, 4  ;;  %v1194_v38 = vsel %vm1176_vm6, %v1192_v28, %v1193_v29  ;;  %v2124_v62 = vrot.slane %v5366_v0, 4  ;;  %v996_v0 = vld [vmem:[#allocation2] sm:$0xf8] }
 0x1e1   : > { %4185 = vmatmul.mubr.msk.bf16.gmra.mrb[24].mxu0 %vm1218_vm5, %v1188_v14  ;;  %v1021_v2 = vshrl.u32 %v5372_v12, 16  ;;  %v1506_v45 = vor.u32 %v5423_v9, %v5416_v3  ;;  %v5492_v10 = vsel %vm1176_vm6, %v2114_v31, %v2115_v32  ;;  %v5495_v58 = vsel %vm1176_vm6, %v2117_v34, %v2118_v39  ;;  %v998_v24 = vld [vmem:[#allocation2 + $0x10] sm:$0xf8]  ;;  %v2280_v31 = vld [vmem:[#allocation2 + $0x18] sm:$0x1f] }
 0x1e2   : > { %4188 = vmatprep.mubr.msk.bf16.mxu0 %vm1218_vm5, %v1191_v6  ;;  %v2120_v11 = vrot.slane %v5483_v60, 4  ;;  %v2123_v13 = vrot.slane %v5485_v61, 4  ;;  %v1197_v16 = vsel %vm1176_vm6, %v1195_v48, %v1196_v35  ;;  %v5501_v17 = vsel %vm1176_vm6, %v1198_v56, %v1199_v50  ;;  %v2583_v3 = vld [vmem:[#allocation2 + $0x40] sm:$0xf8] }
 0x1e3   : > { %v1023_v19 = vrot.slane %v1021_v2, 3  ;;  %v1024_v20 = vshll.u32 %v5372_v12, 16  ;;  %v1013_v28 = vshrl.u32 %v996_v0, 16  ;;  %v1016_v29 = vshll.u32 %v996_v0, 16  ;;  %v2281_v2 = vld [vmem:[#allocation2 + $0x28] sm:$0x1f] }
 0x1e4   : > { %v5505_v26 = vsel %vm1176_vm6, %v2120_v11, %v2121_v51  ;;  %v5508_v41 = vsel %vm1176_vm6, %v2123_v13, %v2124_v62  ;;  %v1030_v14 = vshrl.u32 %v998_v24, 16  ;;  %v1033_v34 = vshll.u32 %v998_v24, 16  ;;  %v5518_v51 = vld [vmem:[#allocation8 + $0x60] sm:$0xff]  }
 0x1e5   : > { %v1026_v32 = vrot.slane %v1024_v20, 4  ;;  %v1040_v39 = vrot.slane %v1038_v44, 3  ;;  %v1015_v12 = vrot.slane %v1013_v28, 3  ;;  %v1018_v6 = vrot.slane %v1016_v29, 4  ;;  %v1000_v0 = vld [vmem:[#allocation2 + $0x20] sm:$0xf8] }
 0x1e6   : > { %v1043_v48 = vrot.slane %v1041_v54, 4  ;;  %vm1481_vm7 = vsmask.f32 3328  ;;  %v1032_v50 = vrot.slane %v1030_v14, 3  ;;  %v2289_v56 = vshrl.u32 %v5383_v30, 16 }
 0x1e7   : > { %4261 = vmatmul.mubr.msk.bf16.vlgmr.msra.gmra.mrb[0].mxu1 %vm1218_vm5, %v2107_v47  ;;  %v1027_v35 = vor.u32 %v1026_v32, %v1023_v19  ;;  %v1035_v47 = vrot.slane %v1033_v34, 4  ;;  %v1019_v44 = vor.u32 %v1018_v6, %v1015_v12  ;;  %v2297_v62 = vshrl.u32 %v2280_v31, 16 }
 0x1e8   : > { %4277 = vmatpush3.bf16.msra.mxu1 %v5351_v36  ;;  %4264 = vmatprep.mubr.msk.bf16.mxu1 %vm1218_vm5, %v2110_v53  ;;  %v1044_v36 = vor.u32 %v1043_v48, %v1040_v39  ;;  %v2292_v53 = vshll.u32 %v5383_v30, 16  ;;  %v2291_v54 = vrot.slane %v2289_v56, 4  ;;  %v2300_v11 = vshll.u32 %v2280_v31, 16  ;;  %v1002_v39 = vld [vmem:[#allocation2 + $0x30] sm:$0xf8] }
 0x1e9   : > { %4278 = vmatprep.subr.bf16.mxu1 %v4628_v57  ;;  %4189 = vmatmul.mubr.msk.bf16.gmra.mrb[28].mxu0 %vm1218_vm5, %v1194_v38  ;;  %v1036_v23 = vor.u32 %v1035_v47, %v1032_v50  ;;  %v2306_v13 = vshrl.u32 %v5386_v37, 16  ;;  %v1028_v19 = vsel %vm497_vm1, %v1019_v44, %v1027_v35  ;;  %v2299_v24 = vrot.slane %v2297_v62, 4  ;;  %v2282_v56 = vld [vmem:[#allocation2 + $0x38] sm:$0x1f] }
 0x1ea   : > { %4192 = vmatprep.mubr.msk.bf16.mxu0 %vm1218_vm5, %v1197_v16  ;;  %v2294_v20 = vrot.slane %v2292_v53, 5  ;;  %v2309_v38 = vshll.u32 %v5386_v37, 16  ;;  %v2302_v30 = vrot.slane %v2300_v11, 5  ;;  %v2314_v32 = vshrl.u32 %v2281_v2, 16 }
 0x1eb   : > { %v5527_v28 = vsel %vm497_vm1, %v1036_v23, %v1044_v36  ;;  %v2308_v29 = vrot.slane %v2306_v13, 4  ;;  %v2317_v14 = vshll.u32 %v2281_v2, 16  ;;  %v1047_v34 = vshrl.u32 %v1000_v0, 16 }
 0x1ec   : > { %4279 = vmatpush3.bf16.msra.mxu1 %v4628_v57  ;;  %v2295_v16 = vor.u32 %v2294_v20, %v2291_v54  ;;  %v2311_v31 = vrot.slane %v2309_v38, 5  ;;  %v2303_v57 = vor.u32 %v2302_v30, %v2299_v24  ;;  %v2316_v12 = vrot.slane %v2314_v32, 4 }
 0x1ed   : > { %4296 = vmatprep.subr.bf16.mxu1 %v5518_v51  ;;  %v1050_v6 = vshll.u32 %v1000_v0, 16  ;;  %v1055_v37 = vshrl.u32 %v5394_v46, 16  ;;  %v2319_v35 = vrot.slane %v2317_v14, 5  ;;  %v1049_v50 = vrot.slane %v1047_v34, 3  ;;  %v1004_v34 = vld [vmem:[#allocation2 + $0x40] sm:$0xf8] }
 0x1ee   : > { %v2312_v48 = vor.u32 %v2311_v31, %v2308_v29  ;;  %v1058_v47 = vshll.u32 %v5394_v46, 16  ;;  %v5537_v44 = vsel %vm1481_vm7, %v2295_v16, %v2303_v57  ;;  %v1067_v23 = vshll.u32 %v1002_v39, 16 }
 0x1ef   : > { %4265 = vmatmul.mubr.msk.bf16.gmra.mrb[4].mxu1 %vm1218_vm5, %v5477_v55  ;;  %v1052_v36 = vrot.slane %v1050_v6, 4  ;;  %v1057_v53 = vrot.slane %v1055_v37, 3  ;;  %v1064_v55 = vshrl.u32 %v1002_v39, 16  ;;  %v2320_v62 = vor.u32 %v2319_v35, %v2316_v12  ;;  %v4634_v37 = vld [vmem:[#allocation8 + $0x28] sm:$0xff]  }
 0x1f0   : > { %4268 = vmatprep.mubr.msk.bf16.mxu1 %vm1218_vm5, %v5492_v10  ;;  %v1060_v2 = vrot.slane %v1058_v47, 4  ;;  %v1072_v10 = vshrl.u32 %v5405_v59, 16  ;;  %v1075_v46 = vshll.u32 %v5405_v59, 16  ;;  %v2323_v13 = vshrl.u32 %v5412_v1, 16 }
 0x1f1   : > { %4193 = vmatmul.mubr.msk.bf16.gmra.mrb[32].mxu0 %vm1218_vm5, %v5501_v17  ;;  %v1053_v54 = vor.u32 %v1052_v36, %v1049_v50  ;;  %v1066_v11 = vrot.slane %v1064_v55, 3  ;;  %v5546_v0 = vsel %vm1481_vm7, %v2312_v48, %v2320_v62  ;;  %v1069_v24 = vrot.slane %v1067_v23, 4  ;;  %v2283_v17 = vld [vmem:[#allocation2 + $0x48] sm:$0x1f]  ;;  %v1006_v55 = vld [vmem:[#allocation2 + $0x50] sm:$0xf8] }
 0x1f2   : > { %4200 = vmatprep.mubr.msk.bf16.mxu0 %vm1218_vm5, %v1028_v19  ;;  %v1061_v20 = vor.u32 %v1060_v2, %v1057_v53  ;;  %v1074_v38 = vrot.slane %v1072_v10, 3  ;;  %v1077_v30 = vrot.slane %v1075_v46, 4  ;;  %v2325_v29 = vrot.slane %v2323_v13, 4 }
 0x1f3   : > { %v2326_v32 = vshll.u32 %v5412_v1, 16  ;;  %v2331_v16 = vshrl.u32 %v2282_v56, 16  ;;  %v1070_v31 = vor.u32 %v1069_v24, %v1066_v11  ;;  %v2334_v14 = vshll.u32 %v2282_v56, 16 }
 0x1f4   : > { %v1062_v19 = vsel %vm497_vm1, %v1053_v54, %v1061_v20  ;;  %v2340_v59 = vshrl.u32 %v5419_v7, 16  ;;  %v1078_v39 = vor.u32 %v1077_v30, %v1074_v38  ;;  %v2343_v6 = vshll.u32 %v5419_v7, 16 }
 0x1f5   : > { %v2328_v57 = vrot.slane %v2326_v32, 5  ;;  %v2333_v12 = vrot.slane %v2331_v16, 4  ;;  %v2336_v1 = vrot.slane %v2334_v14, 5  ;;  %v2348_v35 = vshrl.u32 %v2283_v17, 16 }
 0x1f6   : > { %v2342_v48 = vrot.slane %v2340_v59, 4  ;;  %v2351_v50 = vshll.u32 %v2283_v17, 16  ;;  %v1079_v47 = vsel %vm497_vm1, %v1070_v31, %v1078_v39  ;;  %v2345_v36 = vrot.slane %v2343_v6, 5 }
 0x1f7   : > { %4269 = vmatmul.mubr.msk.bf16.gmra.mrb[8].mxu1 %vm1218_vm5, %v5495_v58  ;;  %v2329_v56 = vor.u32 %v2328_v57, %v2325_v29  ;;  %v1081_v53 = vshrl.u32 %v1004_v34, 16  ;;  %v2337_v58 = vor.u32 %v2336_v1, %v2333_v12  ;;  %v2350_v62 = vrot.slane %v2348_v35, 4  ;;  %v2285_v12 = vld [vmem:[#allocation2 + $0x68] sm:$0x1f] }
 0x1f8   : > { %4272 = vmatprep.mubr.msk.bf16.mxu1 %vm1218_vm5, %v5505_v26  ;;  %v2353_v7 = vrot.slane %v2351_v50, 5  ;;  %v1084_v2 = vshll.u32 %v1004_v34, 16  ;;  %v2346_v26 = vor.u32 %v2345_v36, %v2342_v48  ;;  %v1089_v10 = vshrl.u32 %v5421_v8, 16  ;;  %v1008_v48 = vld [vmem:[#allocation2 + $0x60] sm:$0xf8] }
 0x1f9   : > { %4201 = vmatmul.mubr.msk.bf16.vlgmr.msra.gmra.mrb[20].mxu0 %vm1218_vm5, %v5527_v28  ;;  %v1083_v23 = vrot.slane %v1081_v53, 3  ;;  %v1092_v54 = vshll.u32 %v5421_v8, 16  ;;  %v2338_v11 = vsel %vm1481_vm7, %v2329_v56, %v2337_v58  ;;  %v1098_v20 = vshrl.u32 %v1006_v55, 16  ;;  %v2284_v28 = vld [vmem:[#allocation2 + $0x58] sm:$0x1f] }
 0x1fa   : > { %4204 = vmatprep.mubr.msk.bf16.mxu0 %vm1218_vm5, %v1062_v19  ;;  %4217 = vmatpush3.bf16.msra.mxu0 %v5437_v22  ;;  %v2354_v46 = vor.u32 %v2353_v7, %v2350_v62  ;;  %v1086_v13 = vrot.slane %v1084_v2, 4  ;;  %v1091_v24 = vrot.slane %v1089_v10, 3  ;;  %v1101_v17 = vshll.u32 %v1006_v55, 16  ;;  %v1010_v2 = vld [vmem:[#allocation2 + $0x70] sm:$0xf8]  ;;  %v4632_v10 = vld [vmem:[#allocation8 + $0x68] sm:$0xff]  }
 0x1fb   : > { %4218 = vmatprep.subr.bf16.mxu0 %v4634_v37  ;;  %v1094_v38 = vrot.slane %v1092_v54, 4  ;;  %v1106_v30 = vshrl.u32 %v5435_v21, 16  ;;  %v1100_v16 = vrot.slane %v1098_v20, 3  ;;  %v1109_v8 = vshll.u32 %v5435_v21, 16 }
 0x1fc   : > { %v5566_v29 = vsel %vm1481_vm7, %v2346_v26, %v2354_v46  ;;  %v1087_v32 = vor.u32 %v1086_v13, %v1083_v23  ;;  %v1103_v19 = vrot.slane %v1101_v17, 4  ;;  %v2357_v14 = vshrl.u32 %v5445_v5, 16 }
 0x1fd   : > { %v1095_v22 = vor.u32 %v1094_v38, %v1091_v24  ;;  %v1108_v31 = vrot.slane %v1106_v30, 3  ;;  %v1111_v59 = vrot.slane %v1109_v8, 4  ;;  %v2360_v34 = vshll.u32 %v5445_v5, 16  ;;  %v2286_v30 = vld [vmem:[#allocation2 + $0x78] sm:$0x1f] }
 0x1fe   : > { %4219 = vmatpush3.bf16.msra.mxu0 %v4634_v37  ;;  %v2365_v39 = vshrl.u32 %v2284_v28, 16  ;;  %v2368_v57 = vshll.u32 %v2284_v28, 16  ;;  %v1104_v6 = vor.u32 %v1103_v19, %v1100_v16  ;;  %v2359_v1 = vrot.slane %v2357_v14, 4  ;;  %v5593_v14 = vld [vmem:[#allocation8 + $0x70] sm:$0xff]  }
 0x1ff   : > { %4273 = vmatmul.mubr.msk.bf16.gmra.mrb[12].mxu1 %vm1218_vm5, %v5508_v41  ;;  %v1096_v21 = vsel %vm497_vm1, %v1087_v32, %v1095_v22  ;;  %v2374_v41 = vshrl.u32 %v5451_v33, 16  ;;  %v1112_v35 = vor.u32 %v1111_v59, %v1108_v31  ;;  %v2362_v37 = vrot.slane %v2360_v34, 5 }
 0x200   : > { %4280 = vmatprep.mubr.msk.bf16.mxu1 %vm1218_vm5, %v5537_v44  ;;  %v2367_v50 = vrot.slane %v2365_v39, 4  ;;  %v2370_v56 = vrot.slane %v2368_v57, 5  ;;  %v2377_v5 = vshll.u32 %v5451_v33, 16  ;;  %v2382_v36 = vshrl.u32 %v2285_v12, 16 }
 0x201   : > { %4205 = vmatmul.mubr.msk.bf16.gmra.mrb[24].mxu0 %vm1218_vm5, %v1079_v47  ;;  %v2376_v44 = vrot.slane %v2374_v41, 4  ;;  %v2385_v53 = vshll.u32 %v2285_v12, 16  ;;  %v1113_v55 = vsel %vm497_vm1, %v1104_v6, %v1112_v35  ;;  %v2363_v58 = vor.u32 %v2362_v37, %v2359_v1  ;;  %v2287_v6 = vld [vmem:[#allocation2 + $0x88] sm:$0x1f] }
 0x202   : > { %4208 = vmatprep.mubr.msk.bf16.mxu0 %vm1218_vm5, %v1096_v21  ;;  %v2371_v62 = vor.u32 %v2370_v56, %v2367_v50  ;;  %v1115_v7 = vshrl.u32 %v1008_v48, 16  ;;  %v2379_v26 = vrot.slane %v2377_v5, 5  ;;  %v2384_v23 = vrot.slane %v2382_v36, 4 }
 0x203   : > { %v2387_v47 = vrot.slane %v2385_v53, 5  ;;  %v1118_v54 = vshll.u32 %v1008_v48, 16  ;;  %v1123_v20 = vshrl.u32 %v5459_v42, 16  ;;  %v1126_v33 = vshll.u32 %v5459_v42, 16 }
 0x204   : > { %v2372_v46 = vsel %vm1481_vm7, %v2363_v58, %v2371_v62  ;;  %v1117_v13 = vrot.slane %v1115_v7, 3  ;;  %v2380_v28 = vor.u32 %v2379_v26, %v2376_v44  ;;  %v1132_v17 = vshrl.u32 %v1010_v2, 16  ;;  %v1473_v44 = vld [vmem:[#allocation2 + $0x8] sm:$0x1f] }
 0x205   : > { %v2388_v24 = vor.u32 %v2387_v47, %v2384_v23  ;;  %v1120_v38 = vrot.slane %v1118_v54, 4  ;;  %v1125_v32 = vrot.slane %v1123_v20, 3  ;;  %v1128_v16 = vrot.slane %v1126_v33, 4  ;;  %v5612_v33 = vld [vmem:[#allocation2 + $0x28] sm:$0xf] }
 0x206   : > { %v1135_v8 = vshll.u32 %v1010_v2, 16  ;;  %v1140_v22 = vshrl.u32 %v5463_v25, 16  ;;  %v1143_v31 = vshll.u32 %v5463_v25, 16  ;;  %v2391_v34 = vshrl.u32 %v5483_v60, 16 }
 0x207   : > { %4281 = vmatmul.mubr.msk.bf16.vlgmr.msra.gmra.mrb[0].mxu1 %vm1218_vm5, %v5546_v0  ;;  %v5590_v19 = vsel %vm1481_vm7, %v2380_v28, %v2388_v24  ;;  %v1121_v42 = vor.u32 %v1120_v38, %v1117_v13  ;;  %v1134_v0 = vrot.slane %v1132_v17, 3  ;;  %v2394_v57 = vshll.u32 %v5483_v60, 16  ;;  %v2581_v38 = vld [vmem:[#allocation2 + $0x30] sm:$0xf8]  ;;  %v5615_v17 = vld [vmem:[#allocation2 + $0x38] sm:$0xf] }
 0x208   : > { %4297 = vmatpush3.bf16.msra.mxu1 %v5518_v51  ;;  %4284 = vmatprep.mubr.msk.bf16.mxu1 %vm1218_vm5, %v2338_v11  ;;  %v1129_v51 = vor.u32 %v1128_v16, %v1125_v32  ;;  %v1137_v59 = vrot.slane %v1135_v8, 4  ;;  %v1142_v11 = vrot.slane %v1140_v22, 3  ;;  %v1145_v39 = vrot.slane %v1143_v31, 4 }
 0x209   : > { %4298 = vmatprep.subr.bf16.mxu1 %v4632_v10  ;;  %4209 = vmatmul.mubr.msk.bf16.gmra.mrb[28].mxu0 %vm1218_vm5, %v1113_v55  ;;  %v2399_v12 = vshrl.u32 %v2286_v30, 16  ;;  %v2402_v21 = vshll.u32 %v2286_v30, 16  ;;  %v2393_v25 = vrot.slane %v2391_v34, 4  ;;  %v2408_v48 = vshrl.u32 %v5485_v61, 16  ;;  %v1474_v55 = vld [vmem:[#allocation2 + $0x18] sm:$0x1f] }
 0x20a   : > { %v1130_v1 = vsel %vm497_vm1, %v1121_v42, %v1129_v51  ;;  %v1138_v41 = vor.u32 %v1137_v59, %v1134_v0  ;;  %v1146_v35 = vor.u32 %v1145_v39, %v1142_v11  ;;  %v2396_v37 = vrot.slane %v2394_v57, 5 }
 0x20b   : > { %4212 = vmatprep.mubr.msk.bf16.mxu0 %vm1218_vm5, %v1130_v1  ;;  %v2401_v50 = vrot.slane %v2399_v12, 4  ;;  %v2404_v56 = vrot.slane %v2402_v21, 5  ;;  %v2410_v60 = vrot.slane %v2408_v48, 4  ;;  %v2411_v5 = vshll.u32 %v5485_v61, 16 }
 0x20c   : > { %4299 = vmatpush3.bf16.msra.mxu1 %v4632_v10  ;;  %v2416_v36 = vshrl.u32 %v2287_v6, 16  ;;  %v2419_v53 = vshll.u32 %v2287_v6, 16  ;;  %v1147_v58 = vsel %vm497_vm1, %v1138_v41, %v1146_v35  ;;  %v2397_v62 = vor.u32 %v2396_v37, %v2393_v25  ;;  %v2579_v10 = vld [vmem:[#allocation2 + $0x20] sm:$0xf8]  ;;  %v1475_v41 = vld [vmem:[#allocation2 + $0x28] sm:$0x1f] }
 0x20d   : > { %4316 = vmatprep.subr.bf16.mxu1 %v5593_v14  ;;  %v2405_v7 = vor.u32 %v2404_v56, %v2401_v50  ;;  %v1485_v2 = vrot.slane %v1483_v40, 4  ;;  %v2413_v26 = vrot.slane %v2411_v5, 5  ;;  %v1488_v61 = vrot.slane %v1486_v4, 5 }
 0x20e   : > { %v2418_v23 = vrot.slane %v2416_v36, 4  ;;  %v2421_v47 = vrot.slane %v2419_v53, 5  ;;  %v1491_v13 = vshrl.u32 %v1473_v44, 16  ;;  %v1508_v20 = vshrl.u32 %v1474_v55, 16 }
 0x20f   : > { %4285 = vmatmul.mubr.msk.bf16.gmra.mrb[4].mxu1 %vm1218_vm5, %v5566_v29  ;;  %v2406_v54 = vsel %vm1481_vm7, %v2397_v62, %v2405_v7  ;;  %v1494_v29 = vshll.u32 %v1473_v44, 16  ;;  %v2414_v28 = vor.u32 %v2413_v26, %v2410_v60  ;;  %v1489_v24 = vor.u32 %v1488_v61, %v1485_v2  ;;  %v1476_v60 = vld [vmem:[#allocation2 + $0x38] sm:$0x1f]  ;;  %v5636_v7 = vld [vmem:[#allocation2 + $0x48] sm:$0xf] }
 0x210   : > { %4288 = vmatprep.mubr.msk.bf16.mxu1 %vm1218_vm5, %v2372_v46  ;;  %v2422_v40 = vor.u32 %v2421_v47, %v2418_v23  ;;  %v1511_v46 = vshll.u32 %v1474_v55, 16  ;;  %v1493_v30 = vrot.slane %v1491_v13, 4  ;;  %v1510_v4 = vrot.slane %v1508_v20, 4  ;;  %v2585_v47 = vld [vmem:[#allocation2 + $0x50] sm:$0xf8] }
 0x211   : > { %4213 = vmatmul.mubr.msk.bf16.gmra.mrb[32].mxu0 %vm1218_vm5, %v1147_v58  ;;  %v1496_v18 = vrot.slane %v1494_v29, 5  ;;  %v2596_v32 = vshrl.u32 %v2579_v10, 16  ;;  %v2599_v22 = vshll.u32 %v2579_v10, 16  ;;  %v2604_v42 = vshrl.u32 %v5612_v33, 16  ;;  %v5639_v29 = vld [vmem:[#allocation2 + $0x58] sm:$0xf] }
 0x212   : > { %v2423_v16 = vsel %vm1481_vm7, %v2414_v28, %v2422_v40  ;;  %v1513_v8 = vrot.slane %v1511_v46, 5  ;;  %v2607_v51 = vshll.u32 %v5612_v33, 16  ;;  %v2613_v59 = vshrl.u32 %v2581_v38, 16 }
 0x213   : > { %v1497_v0 = vor.u32 %v1496_v18, %v1493_v30  ;;  %v2598_v31 = vrot.slane %v2596_v32, 3  ;;  %v2601_v34 = vrot.slane %v2599_v22, 4  ;;  %v2606_v39 = vrot.slane %v2604_v42, 3 }
 0x214   : > { %v1514_v11 = vor.u32 %v1513_v8, %v1510_v4  ;;  %v2616_v57 = vshll.u32 %v2581_v38, 16  ;;  %v2609_v21 = vrot.slane %v2607_v51, 4  ;;  %v2615_v6 = vrot.slane %v2613_v59, 3 }
 0x215   : > { %v1498_v12 = vsel %vm1481_vm7, %v1489_v24, %v1497_v0  ;;  %v2621_v1 = vshrl.u32 %v5615_v17, 16  ;;  %v2602_v48 = vor.u32 %v2601_v34, %v2598_v31  ;;  %v1517_v56 = vshrl.u32 %v5399_v52, 16  ;;  %v1477_v34 = vld [vmem:[#allocation2 + $0x48] sm:$0x1f] }
 0x216   : > { %4220 = vmatprep.mubr.msk.bf16.mxu0 %vm1218_vm5, %v1498_v12  ;;  %v1515_v25 = vsel %vm1481_vm7, %v1506_v45, %v1514_v11  ;;  %v2618_v35 = vrot.slane %v2616_v57, 4  ;;  %v2610_v37 = vor.u32 %v2609_v21, %v2606_v39  ;;  %v1520_v44 = vshll.u32 %v5399_v52, 16 }
 0x217   : > { %4289 = vmatmul.mubr.msk.bf16.gmra.mrb[8].mxu1 %vm1218_vm5, %v5590_v19  ;;  %v2624_v19 = vshll.u32 %v5615_v17, 16  ;;  %v2623_v50 = vrot.slane %v2621_v1, 3  ;;  %v1525_v53 = vshrl.u32 %v1475_v41, 16  ;;  %v1528_v55 = vshll.u32 %v1475_v41, 16 }
 0x218   : > { %4292 = vmatprep.mubr.msk.bf16.mxu1 %vm1218_vm5, %v2406_v54  ;;  %v2619_v5 = vor.u32 %v2618_v35, %v2615_v6  ;;  %v2611_v9 = vsel %vm497_vm1, %v2602_v48, %v2610_v37  ;;  %v1519_v45 = vrot.slane %v1517_v56, 4  ;;  %v1522_v58 = vrot.slane %v1520_v44, 5  ;;  %v4636_v48 = vld [vmem:[#allocation8 + $0x78] sm:$0xff]  }
 0x219   : > { %4221 = vmatmul.mubr.msk.bf16.vlgmr.msra.gmra.mrb[20].mxu0 %vm1218_vm5, %v1515_v25  ;;  %v2626_v36 = vrot.slane %v2624_v19, 4  ;;  %v1534_v62 = vshrl.u32 %v5410_v63, 16  ;;  %v1527_v26 = vrot.slane %v1525_v53, 4  ;;  %v1530_v23 = vrot.slane %v1528_v55, 5  ;;  %v1478_v56 = vld [vmem:[#allocation2 + $0x58] sm:$0x1f] }
 0x21a   : > { %v1537_v52 = vshll.u32 %v5410_v63, 16  ;;  %v1523_v61 = vor.u32 %v1522_v58, %v1519_v45  ;;  %v1542_v54 = vshrl.u32 %v1476_v60, 16  ;;  %v1545_v13 = vshll.u32 %v1476_v60, 16  ;;  %v2587_v53 = vld [vmem:[#allocation2 + $0x60] sm:$0xf8] }
 0x21b   : > { %v2627_v2 = vor.u32 %v2626_v36, %v2623_v50  ;;  %v1536_v10 = vrot.slane %v1534_v62, 4  ;;  %v1531_v28 = vor.u32 %v1530_v23, %v1527_v26  ;;  %v2630_v24 = vshrl.u32 %v2583_v3, 16  ;;  %v5658_v58 = vld [vmem:[#allocation2 + $0x68] sm:$0xf] }
 0x21c   : > { %v1539_v40 = vrot.slane %v1537_v52, 5  ;;  %v1544_v46 = vrot.slane %v1542_v54, 4  ;;  %v1547_v38 = vrot.slane %v1545_v13, 5  ;;  %v2633_v30 = vshll.u32 %v2583_v3, 16  ;;  %v5663_v54 = vld [vmem:[#allocation8 + $0x80] sm:$0xff]  }
 0x21d   : > { %v2628_v20 = vsel %vm497_vm1, %v2619_v5, %v2627_v2  ;;  %v2638_v18 = vshrl.u32 %v5636_v7, 16  ;;  %v1532_v63 = vsel %vm1481_vm7, %v1523_v61, %v1531_v28  ;;  %v2632_v32 = vrot.slane %v2630_v24, 3  ;;  %v5666_v28 = vld [vmem:[#allocation2 + $0x78] sm:$0xf] }
 0x21e   : > { %v1540_v4 = vor.u32 %v1539_v40, %v1536_v10  ;;  %v2641_v8 = vshll.u32 %v5636_v7, 16  ;;  %4224 = vmatprep.mubr.msk.bf16.mxu0 %vm1218_vm5, %v1532_v63  ;;  %v1548_v22 = vor.u32 %v1547_v38, %v1544_v46  ;;  %v2635_v42 = vrot.slane %v2633_v30, 4  ;;  %v2589_v10 = vld [vmem:[#allocation2 + $0x70] sm:$0xf8] }
 0x21f   : > { %4293 = vmatmul.mubr.msk.bf16.gmra.mrb[12].mxu1 %vm1218_vm5, %v2423_v16  ;;  %v2640_v0 = vrot.slane %v2638_v18, 3  ;;  %v2647_v31 = vshrl.u32 %v2585_v47, 16  ;;  %v2650_v51 = vshll.u32 %v2585_v47, 16  ;;  %v2655_v59 = vshrl.u32 %v5639_v29, 16 }
 0x220   : > { %4300 = vmatprep.mubr.msk.bf16.mxu1 %vm1218_vm5, %v2611_v9  ;;  %v2643_v16 = vrot.slane %v2641_v8, 4  ;;  %v2658_v11 = vshll.u32 %v5639_v29, 16  ;;  %v1549_v39 = vsel %vm1481_vm7, %v1540_v4, %v1548_v22  ;;  %v2636_v57 = vor.u32 %v2635_v42, %v2632_v32 }
 0x221   : > { %v2649_v12 = vrot.slane %v2647_v31, 3  ;;  %v1551_v21 = vshrl.u32 %v5428_v15, 16  ;;  %4225 = vmatmul.mubr.msk.bf16.gmra.mrb[24].mxu0 %vm1218_vm5, %v1549_v39  ;;  %v2652_v1 = vrot.slane %v2650_v51, 4  ;;  %v2657_v41 = vrot.slane %v2655_v59, 3 }
 0x222   : > { %v2644_v6 = vor.u32 %v2643_v16, %v2640_v0  ;;  %v2660_v25 = vrot.slane %v2658_v11, 4  ;;  %v1554_v19 = vshll.u32 %v5428_v15, 16  ;;  %v1559_v37 = vshrl.u32 %v1477_v34, 16  ;;  %v1479_v0 = vld [vmem:[#allocation2 + $0x68] sm:$0x1f] }
 0x223   : > { %v1553_v35 = vrot.slane %v1551_v21, 4  ;;  %v1562_v50 = vshll.u32 %v1477_v34, 16  ;;  %v2653_v60 = vor.u32 %v2652_v1, %v2649_v12  ;;  %v1568_v36 = vshrl.u32 %v5443_v27, 16 }
 0x224   : > { %v2645_v44 = vsel %vm497_vm1, %v2636_v57, %v2644_v6  ;;  %v2661_v5 = vor.u32 %v2660_v25, %v2657_v41  ;;  %v1556_v55 = vrot.slane %v1554_v19, 5  ;;  %v1561_v3 = vrot.slane %v1559_v37, 4  ;;  %v1480_v41 = vld [vmem:[#allocation2 + $0x78] sm:$0x1f]  ;;  %v2591_v37 = vld [vmem:[#allocation2 + $0x80] sm:$0xf8] }
 0x225   : > { %v1564_v9 = vrot.slane %v1562_v50, 5  ;;  %v1571_v45 = vshll.u32 %v5443_v27, 16  ;;  %v1570_v62 = vrot.slane %v1568_v36, 4  ;;  %v1576_v2 = vshrl.u32 %v1478_v56, 16 }
 0x226   : > { %v2662_v15 = vsel %vm497_vm1, %v2653_v60, %v2661_v5  ;;  %v1579_v26 = vshll.u32 %v1478_v56, 16  ;;  %v1557_v23 = vor.u32 %v1556_v55, %v1553_v35  ;;  %v2664_v61 = vshrl.u32 %v2587_v53, 16  ;;  %v5683_v5 = vld [vmem:[#allocation2 + $0x88] sm:$0xf] }
 0x227   : > { %4301 = vmatmul.mubr.msk.bf16.vlgmr.msra.gmra.mrb[0].mxu1 %vm1218_vm5, %v2628_v20  ;;  %v1565_v52 = vor.u32 %v1564_v9, %v1561_v3  ;;  %v1573_v47 = vrot.slane %v1571_v45, 5  ;;  %v1578_v27 = vrot.slane %v1576_v2, 4  ;;  %v2667_v20 = vshll.u32 %v2587_v53, 16 }
 0x228   : > { %4317 = vmatpush3.bf16.msra.mxu1 %v5593_v14  ;;  %4304 = vmatprep.mubr.msk.bf16.mxu1 %vm1218_vm5, %v2645_v44  ;;  %v1581_v13 = vrot.slane %v1579_v26, 5  ;;  %v2672_v14 = vshrl.u32 %v5658_v58, 16  ;;  %v2666_v46 = vrot.slane %v2664_v61, 3  ;;  %v2675_v38 = vshll.u32 %v5658_v58, 16 }
 0x229   : > { %4318 = vmatprep.subr.bf16.mxu1 %v4636_v48  ;;  %v1566_v40 = vsel %vm1481_vm7, %v1557_v23, %v1565_v52  ;;  %v1574_v24 = vor.u32 %v1573_v47, %v1570_v62  ;;  %v2669_v18 = vrot.slane %v2667_v20, 4  ;;  %v2681_v4 = vshrl.u32 %v2589_v10, 16  ;;  %v2593_v62 = vld [vmem:[#allocation2 + $0x90] sm:$0xf8]  ;;  %v5687_v47 = vld [vmem:[#allocation2 + $0x98] sm:$0xf] }
 0x22a   : > { %4228 = vmatprep.mubr.msk.bf16.mxu0 %vm1218_vm5, %v1566_v40  ;;  %v1582_v30 = vor.u32 %v1581_v13, %v1578_v27  ;;  %v2674_v63 = vrot.slane %v2672_v14, 3  ;;  %v2677_v32 = vrot.slane %v2675_v38, 4  ;;  %v2684_v8 = vshll.u32 %v2589_v10, 16  ;;  %v5691_v13 = vld [vmem:[#allocation2 + $0x20] sm:$0xf0] }
 0x22b   : > { %v2689_v22 = vshrl.u32 %v5666_v28, 16  ;;  %v2692_v42 = vshll.u32 %v5666_v28, 16  ;;  %v2670_v16 = vor.u32 %v2669_v18, %v2666_v46  ;;  %v2683_v51 = vrot.slane %v2681_v4, 3 }
 0x22c   : > { %4319 = vmatpush3.bf16.msra.mxu1 %v4636_v48  ;;  %v1583_v31 = vsel %vm1481_vm7, %v1574_v24, %v1582_v30  ;;  %v1585_v59 = vshrl.u32 %v5461_v43, 16  ;;  %v2678_v11 = vor.u32 %v2677_v32, %v2674_v63  ;;  %v2686_v34 = vrot.slane %v2684_v8, 4 }
 0x22d   : > { %4336 = vmatprep.subr.bf16.mxu1 %v5663_v54  ;;  %4229 = vmatmul.mubr.msk.bf16.gmra.mrb[28].mxu0 %vm1218_vm5, %v1583_v31  ;;  %v2691_v39 = vrot.slane %v2689_v22, 3  ;;  %v2694_v57 = vrot.slane %v2692_v42, 4  ;;  %v1588_v21 = vshll.u32 %v5461_v43, 16  ;;  %v1593_v6 = vshrl.u32 %v1479_v0, 16 }
 0x22e   : > { %v1587_v12 = vrot.slane %v1585_v59, 4  ;;  %v1596_v1 = vshll.u32 %v1479_v0, 16  ;;  %v2679_v25 = vsel %vm497_vm1, %v2670_v16, %v2678_v11  ;;  %v2687_v48 = vor.u32 %v2686_v34, %v2683_v51 }
 0x22f   : > { %4305 = vmatmul.mubr.msk.bf16.gmra.mrb[4].mxu1 %vm1218_vm5, %v2662_v15  ;;  %v2695_v35 = vor.u32 %v2694_v57, %v2691_v39  ;;  %v1602_v19 = vshrl.u32 %v5471_v49, 16  ;;  %v1590_v50 = vrot.slane %v1588_v21, 5  ;;  %v1595_v56 = vrot.slane %v1593_v6, 4  ;;  %v2886_v39 = vld [vmem:[#allocation2 + $0x30] sm:$0xf0] }
 0x230   : > { %4308 = vmatprep.mubr.msk.bf16.mxu1 %vm1218_vm5, %v2679_v25  ;;  %v1598_v44 = vrot.slane %v1596_v1, 5  ;;  %v1605_v60 = vshll.u32 %v5471_v49, 16  ;;  %v1610_v53 = vshrl.u32 %v1480_v41, 16  ;;  %v1613_v55 = vshll.u32 %v1480_v41, 16 }
 0x231   : > { %v2696_v43 = vsel %vm497_vm1, %v2687_v48, %v2695_v35  ;;  %v1604_v36 = vrot.slane %v1602_v19, 4  ;;  %v1591_v3 = vor.u32 %v1590_v50, %v1587_v12  ;;  %v2698_v15 = vshrl.u32 %v2591_v37, 16  ;;  %v5705_v12 = vld [vmem:[#allocation2 + $0x40] sm:$0xf0]  ;;  %v5714_v48 = vld [vmem:[#allocation2 + $0x50] sm:$0xf0] }
 0x232   : > { %v1599_v9 = vor.u32 %v1598_v44, %v1595_v56  ;;  %v1607_v45 = vrot.slane %v1605_v60, 5  ;;  %v1612_v2 = vrot.slane %v1610_v53, 4  ;;  %v1615_v26 = vrot.slane %v1613_v55, 5  ;;  %v4638_v35 = vld [vmem:[#allocation8 + $0x88] sm:$0xff]   ;;  %v5716_v19 = vld [vmem:[#allocation2 + $0x60] sm:$0xf0] }
 0x233   : > { %v2701_v23 = vshll.u32 %v2591_v37, 16  ;;  %v2706_v52 = vshrl.u32 %v5683_v5, 16  ;;  %v2700_v10 = vrot.slane %v2698_v15, 3  ;;  %v2709_v27 = vshll.u32 %v5683_v5, 16  ;;  %v5727_v60 = vld [vmem:[#allocation2 + $0x70] sm:$0xf0] }
 0x234   : > { %v1600_v49 = vsel %vm1481_vm7, %v1591_v3, %v1599_v9  ;;  %v1608_v61 = vor.u32 %v1607_v45, %v1604_v36  ;;  %v1616_v20 = vor.u32 %v1615_v26, %v1612_v2  ;;  %v2715_v24 = vshrl.u32 %v2593_v62, 16  ;;  %v3088_v15 = vld [vmem:[#allocation2 + $0x38] sm:$0x1f] }
 0x235   : > { %4232 = vmatprep.mubr.msk.bf16.mxu0 %vm1218_vm5, %v1600_v49  ;;  %v2703_v14 = vrot.slane %v2701_v23, 4  ;;  %v2708_v40 = vrot.slane %v2706_v52, 3  ;;  %v2711_v46 = vrot.slane %v2709_v27, 4  ;;  %v2718_v38 = vshll.u32 %v2593_v62, 16  ;;  %v5741_v52 = vld [vmem:[#allocation2 + $0x90] sm:$0xf0] }
 0x236   : > { %v2723_v30 = vshrl.u32 %v5687_v47, 16  ;;  %v2726_v18 = vshll.u32 %v5687_v47, 16  ;;  %v1617_v63 = vsel %vm1481_vm7, %v1608_v61, %v1616_v20  ;;  %v2717_v32 = vrot.slane %v2715_v24, 3  ;;  %v3089_v20 = vld [vmem:[#allocation2 + $0x48] sm:$0x1f] }
 0x237   : > { %4309 = vmatmul.mubr.msk.bf16.gmra.mrb[8].mxu1 %vm1218_vm5, %v2696_v43  ;;  %v2704_v4 = vor.u32 %v2703_v14, %v2700_v10  ;;  %v2909_v8 = vrot.slane %v5691_v13, 4  ;;  %4233 = vmatmul.mubr.msk.bf16.gmra.mrb[32].mxu0 %vm1218_vm5, %v1617_v63  ;;  %v2712_v22 = vor.u32 %v2711_v46, %v2708_v40  ;;  %v2720_v42 = vrot.slane %v2718_v38, 4  ;;  %v5729_v43 = vld [vmem:[#allocation2 + $0x80] sm:$0xf0] }
 0x238   : > { %v2725_v0 = vrot.slane %v2723_v30, 3  ;;  %v2728_v31 = vrot.slane %v2726_v18, 4  ;;  %v2910_v16 = vrot.slane %v5612_v33, 4  ;;  %v2912_v21 = vrot.slane %v2886_v39, 4 }
 0x239   : > { %v2713_v51 = vsel %vm497_vm1, %v2704_v4, %v2712_v22  ;;  %v2721_v59 = vor.u32 %v2720_v42, %v2717_v32  ;;  %v2913_v33 = vrot.slane %v5615_v17, 4  ;;  %v2915_v6 = vrot.slane %v5705_v12, 4 }
 0x23a   : > { %v2729_v11 = vor.u32 %v2728_v31, %v2725_v0  ;;  %4312 = vmatprep.mubr.msk.bf16.mxu1 %vm1218_vm5, %v2713_v51  ;;  %v2911_v34 = vsel %vm1176_vm6, %v2909_v8, %v2910_v16  ;;  %v2916_v1 = vrot.slane %v5636_v7, 4  ;;  %v2918_v17 = vrot.slane %v5714_v48, 4  ;;  %v3090_v0 = vld [vmem:[#allocation2 + $0x58] sm:$0x1f] }
 0x23b   : > { %v2914_v41 = vsel %vm1176_vm6, %v2912_v21, %v2913_v33  ;;  %v2919_v37 = vrot.slane %v5639_v29, 4  ;;  %v2921_v7 = vrot.slane %v5716_v19, 4  ;;  %v2922_v50 = vrot.slane %v5658_v58, 4 }
 0x23c   : > { %v2730_v57 = vsel %vm497_vm1, %v2721_v59, %v2729_v11  ;;  %v2917_v25 = vsel %vm1176_vm6, %v2915_v6, %v2916_v1  ;;  %v2924_v29 = vrot.slane %v5727_v60, 4  ;;  %v2925_v36 = vrot.slane %v5666_v28, 4  ;;  %v3091_v59 = vld [vmem:[#allocation2 + $0x68] sm:$0x1f] }
 0x23d   : > { %v2920_v56 = vsel %vm1176_vm6, %v2918_v17, %v2919_v37  ;;  %v2923_v44 = vsel %vm1176_vm6, %v2921_v7, %v2922_v50  ;;  %v3096_v58 = vshrl.u32 %v5691_v13, 16  ;;  %v3099_v53 = vshll.u32 %v5691_v13, 16 }
 0x23e   : > { %v2927_v55 = vrot.slane %v5729_v43, 4  ;;  %v2928_v3 = vrot.slane %v5683_v5, 4  ;;  %v2926_v62 = vsel %vm1176_vm6, %v2924_v29, %v2925_v36  ;;  %v3113_v61 = vshrl.u32 %v2886_v39, 16  ;;  %v3092_v36 = vld [vmem:[#allocation2 + $0x78] sm:$0x1f] }
 0x23f   : > { %4313 = vmatmul.mubr.msk.bf16.gmra.mrb[12].mxu1 %vm1218_vm5, %v2730_v57  ;;  %v3098_v2 = vrot.slane %v3096_v58, 4  ;;  %v3101_v26 = vrot.slane %v3099_v53, 5  ;;  %v3116_v10 = vshll.u32 %v2886_v39, 16  ;;  %v3121_v27 = vshrl.u32 %v3088_v15, 16  ;;  %v3093_v53 = vld [vmem:[#allocation2 + $0x88] sm:$0x1f] }
 0x240   : > { %4320 = vmatprep.mubr.msk.bf16.mxu1 %vm1218_vm5, %v2911_v34  ;;  %v2929_v23 = vsel %vm1176_vm6, %v2927_v55, %v2928_v3  ;;  %v3124_v13 = vshll.u32 %v3088_v15, 16  ;;  %v2930_v5 = vrot.slane %v5741_v52, 4  ;;  %v2931_v14 = vrot.slane %v5687_v47, 4 }
 0x241   : > { %v3102_v40 = vor.u32 %v3101_v26, %v3098_v2  ;;  %v3130_v24 = vshrl.u32 %v5705_v12, 16  ;;  %v3133_v38 = vshll.u32 %v5705_v12, 16  ;;  %v3138_v30 = vshrl.u32 %v3089_v20, 16 }
 0x242   : > { %v3141_v18 = vshll.u32 %v3089_v20, 16  ;;  %v3115_v63 = vrot.slane %v3113_v61, 4  ;;  %v3118_v4 = vrot.slane %v3116_v10, 5  ;;  %v3123_v32 = vrot.slane %v3121_v27, 4 }
 0x243   : > { %v3126_v8 = vrot.slane %v3124_v13, 5  ;;  %v2932_v22 = vsel %vm1176_vm6, %v2930_v5, %v2931_v14  ;;  %v3132_v42 = vrot.slane %v3130_v24, 4  ;;  %v3135_v16 = vrot.slane %v3133_v38, 5 }
 0x244   : > { %v3140_v47 = vrot.slane %v3138_v30, 4  ;;  %v3143_v51 = vrot.slane %v3141_v18, 5  ;;  %v3119_v11 = vor.u32 %v3118_v4, %v3115_v63  ;;  %v3147_v39 = vshrl.u32 %v5714_v48, 16 }
 0x245   : > { %v3127_v34 = vor.u32 %v3126_v8, %v3123_v32  ;;  %v3150_v57 = vshll.u32 %v5714_v48, 16  ;;  %v3155_v12 = vshrl.u32 %v3090_v0, 16  ;;  %v3158_v21 = vshll.u32 %v3090_v0, 16 }
 0x246   : > { %v3164_v33 = vshrl.u32 %v5716_v19, 16  ;;  %v3167_v6 = vshll.u32 %v5716_v19, 16  ;;  %v3172_v1 = vshrl.u32 %v3091_v59, 16  ;;  %v3149_v37 = vrot.slane %v3147_v39, 4 }
 0x247   : > { %4321 = vmatmul.mubr.msk.bf16.vlgmr.msra.gmra.mrb[0].mxu1 %vm1218_vm5, %v2914_v41  ;;  %v3175_v41 = vshll.u32 %v3091_v59, 16  ;;  %v3128_v17 = vsel %vm1481_vm7, %v3119_v11, %v3127_v34  ;;  %v3152_v7 = vrot.slane %v3150_v57, 5  ;;  %v3157_v50 = vrot.slane %v3155_v12, 4  ;;  %v4639_v11 = vld [vmem:[%s6035_s21] sm:$0xff]   ;;  %v4640_v34 = vld [vmem:[%s6036_s30 + $0x8] sm:$0xff]   ;;  %s3992_s21 = sshll.u32 %s6041_s14, 5 }
 0x248   : > { %4337 = vmatpush3.bf16.msra.mxu1 %v5663_v54  ;;  %4324 = vmatprep.mubr.msk.bf16.mxu1 %vm1218_vm5, %v2917_v25  ;;  %v3087_v54 = vld [vmem:[#allocation2 + $0x28] sm:$0x1f]  ;;  %v3136_v25 = vor.u32 %v3135_v16, %v3132_v42  ;;  %v3169_v48 = vrot.slane %v3167_v6, 5  ;;  %v3181_v19 = vshrl.u32 %v5727_v60, 16  ;;  %v3184_v55 = vshll.u32 %v5727_v60, 16  ;;  %s3716_s20 = sadd.s32 %s3997_s12, %s3992_s21 }
 0x249   : > { %4338 = vmatprep.subr.bf16.mxu1 %v4638_v35  ;;  %v3104_v9 = vshrl.u32 %v3087_v54, 16  ;;  %v3107_v45 = vshll.u32 %v3087_v54, 16  ;;  %v3174_v54 = vrot.slane %v3172_v1, 4  ;;  %v3177_v29 = vrot.slane %v3175_v41, 5  ;;  %4356 = vmatprep.subr.bf16.mxu0 %v4639_v11  ;;  %s3993_s5 = sshll.u32 %s3716_s20, 7 }
 0x24a   : > { %v3189_v3 = vshrl.u32 %v3092_v36, 16  ;;  %v3198_v26 = vshrl.u32 %v5729_v43, 16  ;;  %v3183_v61 = vrot.slane %v3181_v19, 4  ;;  %v3186_v10 = vrot.slane %v3184_v55, 5  ;;  %4357 = vmatpush3.bf16.msra.mxu0 %v4639_v11  ;;  %s5922_s7 = scalar_lea.hbm %s6043_s16, %s3993_s5 }
 0x24b   : > { %v3106_v28 = vrot.slane %v3104_v9, 4  ;;  %v3109_v49 = vrot.slane %v3107_v45, 5  ;;  %v3192_v9 = vshll.u32 %v3092_v36, 16  ;;  %v3153_v45 = vor.u32 %v3152_v7, %v3149_v37  ;;  %4358 = vmatprep.subr.bf16.mxu0 %v4640_v34 }
 0x24c   : > { %4339 = vmatpush3.bf16.msra.mxu1 %v4638_v35  ;;  %v3144_v35 = vor.u32 %v3143_v51, %v3140_v47  ;;  %v3178_v2 = vor.u32 %v3177_v29, %v3174_v54  ;;  %v3191_v27 = vrot.slane %v3189_v3, 4  ;;  %v3200_v5 = vrot.slane %v3198_v26, 4  ;;  %v5794_v54 = vld [vmem:[%s6037_s9] ss:$0 sm:$0xff] }
 0x24d   : > { %v3110_v46 = vor.u32 %v3109_v49, %v3106_v28  ;;  %v3206_v28 = vshrl.u32 %v3093_v53, 16  ;;  %v3209_v49 = vshll.u32 %v3093_v53, 16  ;;  %v3194_v13 = vrot.slane %v3192_v9, 5 }
 0x24e   : > { %v3145_v58 = vsel %vm1481_vm7, %v3136_v25, %v3144_v35  ;;  %v3187_v38 = vor.u32 %v3186_v10, %v3183_v61  ;;  %v3218_v18 = vshll.u32 %v5741_v52, 16  ;;  %4359 = vmatpush3.bf16.msra.mxu0 %v4640_v34 }
 0x24f   : > { %4325 = vmatmul.mubr.msk.bf16.gmra.mrb[4].mxu1 %vm1218_vm5, %v2920_v56  ;;  %v3111_v31 = vsel %vm1481_vm7, %v3102_v40, %v3110_v46  ;;  %v3160_v56 = vrot.slane %v3158_v21, 5  ;;  %v3208_v40 = vrot.slane %v3206_v28, 4  ;;  %v3211_v24 = vrot.slane %v3209_v49, 5  ;;  %v3094_v46 = vld [vmem:[#allocation2 + $0x98] sm:$0x1f] }
 0x250   : > { %4328 = vmatprep.mubr.msk.bf16.mxu1 %vm1218_vm5, %v2923_v44  ;;  %v3166_v44 = vrot.slane %v3164_v33, 4  ;;  %v3195_v30 = vor.u32 %v3194_v13, %v3191_v27  ;;  %v3223_v63 = vshrl.u32 %v3094_v46, 16  ;;  %v3226_v4 = vshll.u32 %v3094_v46, 16 }
 0x251   : > { %v3161_v15 = vor.u32 %v3160_v56, %v3157_v50  ;;  %v3212_v8 = vor.u32 %v3211_v24, %v3208_v40  ;;  %v3220_v0 = vrot.slane %v3218_v18, 5 }
 0x252   : > { %v3228_v16 = vrot.slane %v3226_v4, 5 }
 0x253   : > { %v3162_v60 = vsel %vm1481_vm7, %v3153_v45, %v3161_v15 }
 0x257   : > { %4329 = vmatmul.mubr.msk.bf16.gmra.mrb[8].mxu1 %vm1218_vm5, %v2926_v62  ;;  %v3170_v62 = vor.u32 %v3169_v48, %v3166_v44 }
 0x258   : > { %4332 = vmatprep.mubr.msk.bf16.mxu1 %vm1218_vm5, %v2929_v23  ;;  %v3201_v23 = vshll.u32 %v5729_v43, 16  ;;  %v3215_v43 = vshrl.u32 %v5741_v52, 16 }
 0x259   : > { %v3179_v20 = vsel %vm1481_vm7, %v3170_v62, %v3178_v2 }
 0x25a   : > { %v3203_v14 = vrot.slane %v3201_v23, 5  ;;  %v3217_v42 = vrot.slane %v3215_v43, 4 }
 0x25c   : > { %v3204_v32 = vor.u32 %v3203_v14, %v3200_v5  ;;  %v3221_v51 = vor.u32 %v3220_v0, %v3217_v42 }
 0x25e   : > { %v3213_v47 = vsel %vm1481_vm7, %v3204_v32, %v3212_v8 }
 0x25f   : > { %4333 = vmatmul.mubr.msk.bf16.gmra.mrb[12].mxu1 %vm1218_vm5, %v2932_v22  ;;  %v3196_v22 = vsel %vm1481_vm7, %v3187_v38, %v3195_v30 }
 0x260   : > { %4340 = vmatprep.mubr.msk.bf16.mxu1 %vm1218_vm5, %v3111_v31  ;;  %v3225_v31 = vrot.slane %v3223_v63, 4 }
 0x262   : > { %v3229_v59 = vor.u32 %v3228_v16, %v3225_v31 }
 0x264   : > { %v3230_v52 = vsel %vm1481_vm7, %v3221_v51, %v3229_v59 }
 0x267   : > { %4341 = vmatmul.mubr.msk.bf16.vlgmr.msra.gmra.mrb[0].mxu1 %vm1218_vm5, %v3128_v17 }
 0x268   : > { %4344 = vmatprep.mubr.msk.bf16.mxu1 %vm1218_vm5, %v3145_v58  ;;  %v5799_v58 = vld [vmem:[%s6038_s13] ss:$0 sm:$0xff]  ;;  %s4729_s13 = scalar_lea.vmem %s5924_s26, 2048 }
 0x269   : > { %p4730_p2 = scmp.ne.s32.totalorder %s5924_s26, %s4729_s13 }
 0x26b   : > { %p4731_p4 = pnand %p4730_p2, %p5009_p11 }
 0x26d   : > { %p4732_p9 = pneg %p4731_p4 }
 0x26f   : > { %4345 = vmatmul.mubr.msk.bf16.gmra.mrb[4].mxu1 %vm1218_vm5, %v3162_v60 }
 0x270   : > { %4348 = vmatprep.mubr.msk.bf16.mxu1 %vm1218_vm5, %v3179_v20 }
 0x277   : > { %4349 = vmatmul.mubr.msk.bf16.gmra.mrb[8].mxu1 %vm1218_vm5, %v3196_v22 }
 0x278   : > { %4352 = vmatprep.mubr.msk.bf16.mxu1 %vm1218_vm5, %v3213_v47 }
 0x27f   : > { %4353 = vmatmul.mubr.msk.bf16.gmra.mrb[12].mxu1 %vm1218_vm5, %v3230_v52 }
 0x2ec   : > { %v4222_v39 = vpop.f32.mrb[20].mxu0 }
 0x2ed   : > { %v1693_v57 = vpop.f32.mrb[21].mxu0 }
 0x2ee   : > { %v4223_v12 = vpop.f32.mrb[22].mxu0 }
 0x2ef   : > { %v1696_v21 = vpop.f32.mrb[23].mxu0 }
 0x2f4   : > { %v4226_v33 = vpop.f32.mrb[24].mxu0 }
 0x2f5   : > { %v1709_v6 = vpop.f32.mrb[25].mxu0 }
 0x2f6   : > { %v4227_v1 = vpop.f32.mrb[26].mxu0 }
 0x2f7   : > { %v1712_v41 = vpop.f32.mrb[27].mxu0 }
 0x300   : > { %v4230_v25 = vpop.f32.mrb[28].mxu0 }
 0x301   : > { %v1725_v35 = vpop.f32.mrb[29].mxu0 }
 0x302   : > { %v4231_v17 = vpop.f32.mrb[30].mxu0 }
 0x303   : > { %v1728_v37 = vpop.f32.mrb[31].mxu0 }
 0x30a   : > { %v5783_v7 = vpop.f32.mrb[32].mxu0 }
 0x30b   : > { %v5785_v50 = vpop.f32.mrb[33].mxu0 }
 0x30c   : > { %v5787_v56 = vpop.f32.mrb[34].mxu0 }
 0x30d   : > { %v5789_v44 = vpop.f32.mrb[35].mxu0 }
 0x33a   : > { %v4342_v48 = vpop.f32.mrb[0].mxu1 }
 0x33b   : > { %v4376_v29 = vadd.f32 %v4342_v48, %v4222_v39  ;;  %v3306_v36 = vpop.f32.mrb[1].mxu1 }
 0x33c   : > { %v4377_v53 = vadd.f32 %v3306_v36, %v1693_v57  ;;  %v4343_v19 = vpop.f32.mrb[2].mxu1 }
 0x33d   : > { %v3394_v55 = vmul.f32 %v4376_v29, %v5794_v54  ;;  %v4378_v3 = vadd.f32 %v4343_v19, %v4223_v12  ;;  %v3309_v9 = vpop.f32.mrb[3].mxu1 }
 0x33e   : > { %v3392_v45 = vmul.f32 %v4377_v53, %v5794_v54  ;;  %v4379_v15 = vadd.f32 %v3309_v9, %v1696_v21 }
 0x33f   : > { %v3417_v62 = vadd.f32 %v5799_v58, %v3394_v55  ;;  %v3395_v2 = vmul.f32 %v4378_v3, %v5794_v54 }
 0x340   : > { %v3415_v26 = vadd.f32 %v5799_v58, %v3392_v45  ;;  %v3393_v23 = vmul.f32 %v4379_v15, %v5794_v54 }
 0x341   : > { %v3418_v28 = vadd.f32 %v5799_v58, %v3395_v2  ;;  %v3433_v10 = vmax.f32 %v3417_v62, 0.0 }
 0x342   : > { %v3416_v49 = vadd.f32 %v5799_v58, %v3393_v23  ;;  %v4346_v61 = vpop.f32.mrb[4].mxu1  ;;  %v3431_v20 = vmax.f32 %v3415_v26, 0.0 }
 0x343   : > { %v3434_v27 = vmax.f32 %v3418_v28, 0.0  ;;  %v4380_v13 = vadd.f32 %v4346_v61, %v4226_v33  ;;  %v3322_v60 = vpop.f32.mrb[5].mxu1 }
 0x344   : > { %v3432_v5 = vmax.f32 %v3416_v49, 0.0  ;;  %v4381_v14 = vadd.f32 %v3322_v60, %v1709_v6  ;;  %v4347_v40 = vpop.f32.mrb[6].mxu1 }
 0x345   : > { %v3448_v24 = vpack.c.bf16 %v3434_v27, %v3433_v10  ;;  %v3398_v46 = vmul.f32 %v4380_v13, %v5794_v54  ;;  %v4382_v38 = vadd.f32 %v4347_v40, %v4227_v1  ;;  %v3325_v30 = vpop.f32.mrb[7].mxu1 }
 0x346   : > { %v3447_v43 = vpack.c.bf16 %v3432_v5, %v3431_v20  ;;  %v3396_v18 = vmul.f32 %v4381_v14, %v5794_v54  ;;  %v4383_v63 = vadd.f32 %v3325_v30, %v1712_v41 }
 0x347   : > { %v3421_v4 = vadd.f32 %v5799_v58, %v3398_v46  ;;  %v3399_v32 = vmul.f32 %v4382_v38, %v5794_v54 }
 0x348   : > { %v3419_v8 = vadd.f32 %v5799_v58, %v3396_v18  ;;  %v3397_v22 = vmul.f32 %v4383_v63, %v5794_v54  ;;  %4360 = vmatprep.mubr.msk.bf16.mxu0 %vm1218_vm5, %v3447_v43  ;;  %v3640_v43 = vld [vmem:[%s5126_s6 + $0x10] sm:$0xff] }
 0x349   : > { %v3422_v42 = vadd.f32 %v5799_v58, %v3399_v32  ;;  %4361 = vmatmul.mubr.msk.bf16.vlgmr.msra.gmra.mrb[36].mxu0 %vm1218_vm5, %v3448_v24  ;;  %v3437_v16 = vmax.f32 %v3421_v4, 0.0  ;;  %v3638_v32 = vld [vmem:[%s5126_s6] sm:$0xff] }
 0x34a   : > { %v3420_v0 = vadd.f32 %v5799_v58, %v3397_v22  ;;  %v4350_v31 = vpop.f32.mrb[8].mxu1  ;;  %v3435_v52 = vmax.f32 %v3419_v8, 0.0 }
 0x34b   : > { %v3438_v47 = vmax.f32 %v3422_v42, 0.0  ;;  %v4384_v51 = vadd.f32 %v4350_v31, %v4230_v25  ;;  %v3338_v59 = vpop.f32.mrb[9].mxu1 }
 0x34c   : > { %v3436_v11 = vmax.f32 %v3420_v0, 0.0  ;;  %v4385_v34 = vadd.f32 %v3338_v59, %v1725_v35  ;;  %v4351_v39 = vpop.f32.mrb[10].mxu1  ;;  %v3641_v0 = vld [vmem:[%s5126_s6 + $0x18] sm:$0xff] }
 0x34d   : > { %v3450_v57 = vpack.c.bf16 %v3438_v47, %v3437_v16  ;;  %v3402_v12 = vmul.f32 %v4384_v51, %v5794_v54  ;;  %v4386_v21 = vadd.f32 %v4351_v39, %v4231_v17  ;;  %v3341_v33 = vpop.f32.mrb[11].mxu1  ;;  %v3639_v51 = vld [vmem:[%s5126_s6 + $0x8] sm:$0xff] }
 0x34e   : > { %v3449_v6 = vpack.c.bf16 %v3436_v11, %v3435_v52  ;;  %v3400_v1 = vmul.f32 %v4385_v34, %v5794_v54  ;;  %v4387_v41 = vadd.f32 %v3341_v33, %v1728_v37 }
 0x34f   : > { %v3425_v48 = vadd.f32 %v5799_v58, %v3402_v12  ;;  %v3403_v29 = vmul.f32 %v4386_v21, %v5794_v54 }
 0x350   : > { %v3423_v25 = vadd.f32 %v5799_v58, %v3400_v1  ;;  %v3401_v36 = vmul.f32 %v4387_v41, %v5794_v54  ;;  %4364 = vmatprep.mubr.msk.bf16.mxu0 %vm1218_vm5, %v3449_v6  ;;  %v3644_v41 = vld [vmem:[%s5126_s6 + $0x30] sm:$0xff] }
 0x351   : > { %v3426_v35 = vadd.f32 %v5799_v58, %v3403_v29  ;;  %4365 = vmatmul.mubr.msk.bf16.gmra.mrb[40].mxu0 %vm1218_vm5, %v3450_v57  ;;  %v3441_v19 = vmax.f32 %v3425_v48, 0.0 }
 0x352   : > { %v3424_v17 = vadd.f32 %v5799_v58, %v3401_v36  ;;  %v4354_v53 = vpop.f32.mrb[12].mxu1  ;;  %v3439_v9 = vmax.f32 %v3423_v25, 0.0  ;;  %v3642_v36 = vld [vmem:[%s5126_s6 + $0x20] sm:$0xff] }
 0x353   : > { %v3442_v55 = vmax.f32 %v3426_v35, 0.0  ;;  %v4388_v37 = vadd.f32 %v4354_v53, %v5783_v7  ;;  %v3354_v3 = vpop.f32.mrb[13].mxu1 }
 0x354   : > { %v3440_v45 = vmax.f32 %v3424_v17, 0.0  ;;  %v4389_v15 = vadd.f32 %v3354_v3, %v5785_v50  ;;  %v4355_v62 = vpop.f32.mrb[14].mxu1 }
 0x355   : > { %v3452_v2 = vpack.c.bf16 %v3442_v55, %v3441_v19  ;;  %v3406_v26 = vmul.f32 %v4388_v37, %v5794_v54  ;;  %v4390_v23 = vadd.f32 %v4355_v62, %v5787_v56  ;;  %v3357_v28 = vpop.f32.mrb[15].mxu1  ;;  %v3645_v19 = vld [vmem:[%s5126_s6 + $0x38] sm:$0xff] }
 0x356   : > { %v3451_v49 = vpack.c.bf16 %v3440_v45, %v3439_v9  ;;  %v3404_v61 = vmul.f32 %v4389_v15, %v5794_v54  ;;  %v4391_v10 = vadd.f32 %v3357_v28, %v5789_v44  ;;  %v3643_v9 = vld [vmem:[%s5126_s6 + $0x28] sm:$0xff] }
 0x357   : > { %v3429_v27 = vadd.f32 %v5799_v58, %v3406_v26  ;;  %v3407_v7 = vmul.f32 %v4390_v23, %v5794_v54 }
 0x358   : > { %v3427_v13 = vadd.f32 %v5799_v58, %v3404_v61  ;;  %v3405_v50 = vmul.f32 %v4391_v10, %v5794_v54  ;;  %4368 = vmatprep.mubr.msk.bf16.mxu0 %vm1218_vm5, %v3451_v49  ;;  %v5848_v54 = vld [vmem:[%s6039_s11] ss:$0 sm:$0xff]  ;;  %s4735_s11 = scalar_lea.vmem %s4734_s10, 4096 }
 0x359   : > { %v3430_v60 = vadd.f32 %v5799_v58, %v3407_v7  ;;  %4369 = vmatmul.mubr.msk.bf16.gmra.mrb[44].mxu0 %vm1218_vm5, %v3452_v2  ;;  %v3445_v20 = vmax.f32 %v3429_v27, 0.0  ;;  %v3648_v7 = vld [vmem:[%s5126_s6 + $0x50] sm:$0xff]  ;;  %p4737_p10 = scmp.lt.s32.totalorder %s4735_s11, %s4729_s13 }
 0x35a   : > { %v3428_v56 = vadd.f32 %v5799_v58, %v3405_v50  ;;  %v3443_v44 = vmax.f32 %v3427_v13, 0.0  ;;  %v5853_v58 = vld [vmem:[%s6040_s25] ss:$0 sm:$0xff] }
 0x35b   : > { %v3446_v5 = vmax.f32 %v3430_v60, 0.0  ;;  %p4738_p12 = por %p4737_p10, %p4736_p6 }
 0x35c   : > { %v3444_v14 = vmax.f32 %v3428_v56, 0.0  ;;  %v3646_v56 = vld [vmem:[%s5126_s6 + $0x40] sm:$0xff] }
 0x35d   : > { %v3454_v40 = vpack.c.bf16 %v3446_v5, %v3445_v20  ;;  %p4739_p13 = pnand %p4738_p12, %p4732_p9 }
 0x35e   : > { %v3453_v24 = vpack.c.bf16 %v3444_v14, %v3443_v44  ;;  %v3649_v14 = vld [vmem:[%s5126_s6 + $0x58] sm:$0xff] }
 0x360   : > { %4372 = vmatprep.mubr.msk.bf16.mxu0 %vm1218_vm5, %v3453_v24 }
 0x361   : > { %4373 = vmatmul.mubr.msk.bf16.gmra.mrb[48].mxu0 %vm1218_vm5, %v3454_v40 }
 0x41c   : > { %v4362_v46 = vpop.f32.mrb[36].mxu0 }
 0x41d   : > { %v3601_v38 = vmul.f32 %v4362_v46, %v5848_v54  ;;  %v3529_v30 = vpop.f32.mrb[37].mxu0 }
 0x41e   : > { %v3599_v18 = vmul.f32 %v5848_v54, %v3529_v30  ;;  %v4363_v63 = vpop.f32.mrb[38].mxu0 }
 0x41f   : > { %v3624_v4 = vadd.f32 %v5853_v58, %v3601_v38  ;;  %v3602_v8 = vmul.f32 %v4363_v63, %v5848_v54  ;;  %v3532_v22 = vpop.f32.mrb[39].mxu0  ;;  %v3647_v38 = vld [vmem:[%s5126_s6 + $0x48] sm:$0xff] }
 0x420   : > { %v3622_v42 = vadd.f32 %v5853_v58, %v3599_v18  ;;  %v3600_v31 = vmul.f32 %v5848_v54, %v3532_v22 }
 0x421   : > { %v3656_v16 = vadd.f32 %v3640_v43, %v3624_v4  ;;  %v3625_v47 = vadd.f32 %v5853_v58, %v3602_v8 }
 0x422   : > { %v3654_v59 = vadd.f32 %v3638_v32, %v3622_v42  ;;  %v3623_v52 = vadd.f32 %v5853_v58, %v3600_v31 }
 0x423   : > { %v3672_v11 = vmax.f32 %v3656_v16, 0.0  ;;  %v3657_v34 = vadd.f32 %v3641_v0, %v3625_v47  ;;  %v3652_v16 = vld [vmem:[%s5126_s6 + $0x70] sm:$0xff] }
 0x424   : > { %v3670_v39 = vmax.f32 %v3654_v59, 0.0  ;;  %v3655_v57 = vadd.f32 %v3639_v51, %v3623_v52  ;;  %v4366_v12 = vpop.f32.mrb[40].mxu0  ;;  %v3650_v52 = vld [vmem:[%s5126_s6 + $0x60] sm:$0xff] }
 0x425   : > { %3688 = vst [vmem:[%s5319_s27 + $0x10] sm:$0xff] %v3672_v11  ;;  %v3673_v21 = vmax.f32 %v3657_v34, 0.0  ;;  %v3605_v33 = vmul.f32 %v4366_v12, %v5848_v54  ;;  %v3545_v6 = vpop.f32.mrb[41].mxu0 }
 0x426   : > { %3686 = vst [vmem:[%s5319_s27] sm:$0xff] %v3670_v39  ;;  %v3671_v1 = vmax.f32 %v3655_v57, 0.0  ;;  %v3603_v48 = vmul.f32 %v5848_v54, %v3545_v6  ;;  %v4367_v29 = vpop.f32.mrb[42].mxu0  ;;  %v3653_v57 = vld [vmem:[%s5126_s6 + $0x78] sm:$0xff]  ;;  %v3651_v6 = vld [vmem:[%s5126_s6 + $0x68] sm:$0xff]  ;;  %s3703_s6 = scalar_lea.sflag [#allocation5], %s5120_s17 }
 0x427   : > { %3689 = vst [vmem:[%s5319_s27 + $0x18] sm:$0xff] %v3673_v21  ;;  %v3628_v25 = vadd.f32 %v5853_v58, %v3605_v33  ;;  %v3606_v35 = vmul.f32 %v4367_v29, %v5848_v54  ;;  %v3548_v17 = vpop.f32.mrb[43].mxu0 }
 0x428   : > { %3687 = vst [vmem:[%s5319_s27 + $0x8] sm:$0xff] %v3671_v1  ;;  %v3626_v53 = vadd.f32 %v5853_v58, %v3603_v48  ;;  %v3604_v55 = vmul.f32 %v5848_v54, %v3548_v17 }
 0x429   : > { %v3660_v37 = vadd.f32 %v3644_v41, %v3628_v25  ;;  %v3629_v3 = vadd.f32 %v5853_v58, %v3606_v35 }
 0x42a   : > { %v3658_v45 = vadd.f32 %v3642_v36, %v3626_v53  ;;  %v3627_v15 = vadd.f32 %v5853_v58, %v3604_v55 }
 0x42b   : > { %v3676_v62 = vmax.f32 %v3660_v37, 0.0  ;;  %v3661_v2 = vadd.f32 %v3645_v19, %v3629_v3 }
 0x42c   : > { %v3674_v26 = vmax.f32 %v3658_v45, 0.0  ;;  %v3659_v23 = vadd.f32 %v3643_v9, %v3627_v15  ;;  %v4370_v28 = vpop.f32.mrb[44].mxu0 }
 0x42d   : > { %3692 = vst [vmem:[%s5319_s27 + $0x30] sm:$0xff] %v3676_v62  ;;  %v3677_v49 = vmax.f32 %v3661_v2, 0.0  ;;  %v3609_v61 = vmul.f32 %v4370_v28, %v5848_v54  ;;  %v3561_v10 = vpop.f32.mrb[45].mxu0 }
 0x42e   : > { %3690 = vst [vmem:[%s5319_s27 + $0x20] sm:$0xff] %v3674_v26  ;;  %v3675_v27 = vmax.f32 %v3659_v23, 0.0  ;;  %v3607_v13 = vmul.f32 %v5848_v54, %v3561_v10  ;;  %v4371_v50 = vpop.f32.mrb[46].mxu0 }
 0x42f   : > { %3693 = vst [vmem:[%s5319_s27 + $0x38] sm:$0xff] %v3677_v49  ;;  %v3632_v60 = vadd.f32 %v5853_v58, %v3609_v61  ;;  %v3610_v20 = vmul.f32 %v4371_v50, %v5848_v54  ;;  %v3564_v5 = vpop.f32.mrb[47].mxu0 }
 0x430   : > { %3691 = vst [vmem:[%s5319_s27 + $0x28] sm:$0xff] %v3675_v27  ;;  %v3630_v44 = vadd.f32 %v5853_v58, %v3607_v13  ;;  %v3608_v40 = vmul.f32 %v5848_v54, %v3564_v5 }
 0x431   : > { %v3664_v24 = vadd.f32 %v3648_v7, %v3632_v60  ;;  %v3633_v46 = vadd.f32 %v5853_v58, %v3610_v20 }
 0x432   : > { %v3662_v30 = vadd.f32 %v3646_v56, %v3630_v44  ;;  %v3631_v43 = vadd.f32 %v5853_v58, %v3608_v40 }
 0x433   : > { %v3680_v18 = vmax.f32 %v3664_v24, 0.0  ;;  %v3665_v63 = vadd.f32 %v3649_v14, %v3633_v46 }
 0x434   : > { %v3678_v4 = vmax.f32 %v3662_v30, 0.0  ;;  %v3663_v32 = vadd.f32 %v3647_v38, %v3631_v43  ;;  %v4374_v8 = vpop.f32.mrb[48].mxu0 }
 0x435   : > { %3696 = vst [vmem:[%s5319_s27 + $0x50] sm:$0xff] %v3680_v18  ;;  %v3681_v22 = vmax.f32 %v3665_v63, 0.0  ;;  %v3613_v42 = vmul.f32 %v4374_v8, %v5848_v54  ;;  %v3577_v0 = vpop.f32.mrb[49].mxu0 }
 0x436   : > { %3694 = vst [vmem:[%s5319_s27 + $0x40] sm:$0xff] %v3678_v4  ;;  %v3679_v31 = vmax.f32 %v3663_v32, 0.0  ;;  %v3611_v47 = vmul.f32 %v5848_v54, %v3577_v0  ;;  %v4375_v51 = vpop.f32.mrb[50].mxu0 }
 0x437   : > { %3697 = vst [vmem:[%s5319_s27 + $0x58] sm:$0xff] %v3681_v22  ;;  %v3636_v59 = vadd.f32 %v5853_v58, %v3613_v42  ;;  %v3614_v11 = vmul.f32 %v4375_v51, %v5848_v54  ;;  %v3580_v34 = vpop.f32.mrb[51].mxu0 }
 0x438   : > { %3695 = vst [vmem:[%s5319_s27 + $0x48] sm:$0xff] %v3679_v31  ;;  %v3634_v39 = vadd.f32 %v5853_v58, %v3611_v47  ;;  %v3612_v12 = vmul.f32 %v5848_v54, %v3580_v34 }
 0x439   : > { %v3668_v21 = vadd.f32 %v3652_v16, %v3636_v59  ;;  %v3637_v33 = vadd.f32 %v5853_v58, %v3614_v11 }
 0x43a   : > { %v3666_v1 = vadd.f32 %v3650_v52, %v3634_v39  ;;  %v3635_v41 = vadd.f32 %v5853_v58, %v3612_v12 }
 0x43b   : > { %v3684_v48 = vmax.f32 %v3668_v21, 0.0  ;;  %v3669_v29 = vadd.f32 %v3653_v57, %v3637_v33 }
 0x43c   : > { %v3682_v25 = vmax.f32 %v3666_v1, 0.0  ;;  %v3667_v36 = vadd.f32 %v3651_v6, %v3635_v41 }
 0x43d   : > { %3700 = vst [vmem:[%s5319_s27 + $0x70] sm:$0xff] %v3684_v48  ;;  %v3685_v54 = vmax.f32 %v3669_v29, 0.0 }
 0x43e   : > { %3698 = vst [vmem:[%s5319_s27 + $0x60] sm:$0xff] %v3682_v25  ;;  %v3683_v58 = vmax.f32 %v3667_v36, 0.0 }
 0x43f   : > { %3701 = vst [vmem:[%s5319_s27 + $0x78] sm:$0xff] %v3685_v54 }
 0x440   : > { %3699 = vst [vmem:[%s5319_s27 + $0x68] sm:$0xff] %v3683_v58 }
 0x441   : > { %4742 = shalt.err (!%p4739_p13)
}
 0x442   : > { %s4743_s27 = scalar_lea.hbm %s5922_s7, 2048  ;;  %s4747_s25 = scalar_lea.hbm %s6043_s16, 8192 }
 0x443   : > { %p4744_p5 = scmp.ne.s32.totalorder %s5922_s7, %s4743_s27  ;;  %p4748_p3 = scmp.lt.u32.totalorder %s5922_s7, %s6043_s16 }
 0x444   : > { %p4749_p7 = scmp.lt.u32.totalorder %s4747_s25, %s4743_s27  ;;  %p4751_p2 = scmp.lt.u32.totalorder %s4743_s27, %s5922_s7 }
 0x445   : > { %p4745_p8 = pnand %p4744_p5, %p5009_p11 }
 0x446   : > { %p4750_p1 = por %p4749_p7, %p4748_p3 }
 0x447   : > { %p4746_p0 = pneg %p4745_p8 }
 0x448   : > { %p4752_p4 = por %p4751_p2, %p4750_p1 }
 0x44a   : > { %p4753_p9 = pnand %p4752_p4, %p4746_p0 }
 0x44c   : > { %4756 = shalt.err (!%p4753_p9)
}
 0x44d   : > { %s4846_s21 = smov 128   ;;  %s4847_s20 = smov 8  }
 0x44e   : > { %4512 = dma.vmem_to_hbm [thread:$0]  (%p5009_p11), %s5924_s26, 2048, %s5922_s7, %s3703_s6, %s4846_s21, %s4846_s21, %s4847_s20  }
 0x44f PF: > { %s6044_s5 = sld [smem:[#allocation14_spill]]  ;;  %s6045_s0 = sld [smem:[#allocation16_spill]] }
 0x450   : > { %p4532_p6 = scmp.ge.s32.totalorder %s4835_s24, 2 }
 0x455   : > { %s3734_s9 = sand.u32 1, %s6044_s5   ;;  %p6046_p10 = scmp.ne.s32.totalorder %s6045_s0, 0 }
 0x456   : > { %s3735_s13 = scalar_lea.sflag [#allocation5], %s3734_s9 }
 0x457   : > { %p4526_p12 = pnand %p4532_p6, %p6046_p10 }
 0x459   : > { %4802 = dma.done.wait (!%p4526_p12), %s3735_s13, 2048  }
 0x45a   : > { %4804 = vsyncadd (!%p4526_p12), %s3735_s13, 4294965248  ;;  %s30_s24 = sadd.s32 1, %s4835_s24   ;;  %s6047_s28 = sld [smem:[#allocation20_spill]] }
 0x45b   : > { %p27_p13 = scmp.ge.s32.totalorder %s30_s24, 6   ;;  %s6048_s26 = sld [smem:[#allocation17_spill]] }
 0x45c   : > { %s6049_s8 = sld [smem:[#allocation19_spill]]  ;;  %s6050_s17 = smov %s4811_s18 }
 0x45d   : > { %s6051_s18 = smov %s4815_s19  ;;  %s6053_s20 = smov %s4827_s22 }
 0x45e   : > { %s6054_s21 = smov %s4831_s23  ;;  %29 = sbr.rel (!%p27_p13) target bundleno = 18 (0x12), region = 145 }
 0x460   : > { %s6052_s19 = smov %s6047_s28 }
 0x461   : > { %s6055_s22 = smov %s6048_s26 }
 0x462   : > { %s6056_s23 = smov %s6049_s8 }
 0x465   :  { %3740 = vsyncpa [#allocation4], 1 }
 0x466   :  { %3742 = vsyncpa [#allocation4 + $0x1], 1 }
 0x467   :  { %3743 = vsyncpa [#allocation7], 1 }
 0x468   :  { %3745 = vsyncpa [#allocation7 + $0x1], 1 }
 0x469   :  { %3746 = vsyncpa [#allocation5], 1 }
 0x46a   :  { %3748 = vsyncpa [#allocation5 + $0x1], 1 }

</bundles_post_ra>
